<compile_context>
chip_gen: v7x
topology: tpu7x:2x2x1
jax: 0.10.0
libtpu: 0.0.40
codegen_flags: <defaults>
</compile_context>

<pallas_src>
import numpy as np
import jax
import jax.numpy as jnp
from jax.experimental import pallas as pl
from jax.experimental.pallas import tpu as pltpu


# -----------------------------------------------------------------------------
# Fused Discriminator forward kernel
# -----------------------------------------------------------------------------
def make_discriminator_kernel(B, T, D, H, L, ND, n_fc, critic):
    """Single fused kernel.

    Ref order (positional):
      x_ref      (T*B, D)        time-major flattened input
      w0_ref     (D, ND*3H)      layer-0 input weights (both directions), transposed
      b0_ref     (1, ND*3H)
      per layer l = 0..L-1:
        l > 0 :  wih_ref (ND*H, ND*3H) block-diag, bih_ref (1, ND*3H)
        always:  whh_ref (ND*H, ND*3H) block-diag, bhh_ref (1, ND*3H)
      per fc layer i: wfc_ref (in_i, out_i), bfc_ref (1, out_i)
      out_ref    (B, 1)
      gi0_scr    VMEM (T*B, ND*3H) scratch for precomputed layer-0 input gates
    """
    H3 = 3 * H

    def kernel(*refs):
        idx = 0
        x_ref = refs[idx]; idx += 1
        w0_ref = refs[idx]; idx += 1
        b0_ref = refs[idx]; idx += 1
        layer_refs = []
        for l in range(L):
            if l == 0:
                layer_refs.append((None, None, refs[idx], refs[idx + 1]))
                idx += 2
            else:
                layer_refs.append((refs[idx], refs[idx + 1],
                                   refs[idx + 2], refs[idx + 3]))
                idx += 4
        fc_refs = [(refs[idx + 2 * i], refs[idx + 2 * i + 1]) for i in range(n_fc)]
        idx += 2 * n_fc
        out_ref = refs[idx]; idx += 1
        gi0_scr = refs[idx]

        # (1) Hoisted layer-0 input projection: one large MXU matmul for every
        #     timestep and both directions, off the serial recurrence chain.
        gi0_scr[...] = (
            jnp.dot(x_ref[...], w0_ref[...], preferred_element_type=jnp.float32)
            + b0_ref[...])

        # Load recurrence weights once; they stay resident across the whole
        # unrolled time loop.
        layer_vals = []
        for (wih, bih, whh, bhh) in layer_refs:
            layer_vals.append((
                None if wih is None else wih[...],
                None if bih is None else bih[...],
                whh[...], bhh[...]))

        # (2) Serial recurrence; both directions advance in the same step.
        #     h[l] is (B, ND*H): cols [:H] = forward hidden, [H:] = backward.
        h = [jnp.zeros((B, ND * H), jnp.float32) for _ in range(L)]
        # T is static -> fully unrolled (short sequence); for long T this would
        # become a chunked lax.fori_loop.
        for s in range(T):
            rows_f = gi0_scr[s * B:(s + 1) * B, :]            # fwd gates, time s
            gi0 = rows_f[:, 0:H3]
            if ND == 2:
                rows_b = gi0_scr[(T - 1 - s) * B:(T - s) * B, :]  # bwd, time T-1-s
                gi0 = jnp.concatenate([gi0, rows_b[:, H3:2 * H3]], axis=1)

            for l in range(L):
                wih, bih, whh, bhh = layer_vals[l]
                if l == 0:
                    gi = gi0                                   # precomputed
                else:
                    gi = jnp.dot(h[l - 1], wih,
                                 preferred_element_type=jnp.float32) + bih
                gh = jnp.dot(h[l], whh,
                             preferred_element_type=jnp.float32) + bhh

                parts = []
                for d in range(ND):                            # gate math (r, z, n)
                    g0 = d * H3
                    r = jax.nn.sigmoid(gi[:, g0:g0 + H] + gh[:, g0:g0 + H])
                    z = jax.nn.sigmoid(gi[:, g0 + H:g0 + 2 * H]
                                       + gh[:, g0 + H:g0 + 2 * H])
                    n = jnp.tanh(gi[:, g0 + 2 * H:g0 + 3 * H]
                                 + r * gh[:, g0 + 2 * H:g0 + 3 * H])
                    h_prev = h[l][:, d * H:(d + 1) * H]
                    parts.append((1.0 - z) * n + z * h_prev)
                h[l] = parts[0] if ND == 1 else jnp.concatenate(parts, axis=1)

        # (3) Fused FC head: hidden slab never leaves the chip.
        #     Concat order matches PyTorch: fwd layers 0..L-1, then bwd layers.
        hid_parts = [h[l][:, 0:H] for l in range(L)]
        if ND == 2:
            hid_parts += [h[l][:, H:2 * H] for l in range(L)]
        y = hid_parts[0] if len(hid_parts) == 1 else jnp.concatenate(hid_parts, axis=1)

        for i, (wr, br) in enumerate(fc_refs):
            y = jnp.dot(y, wr[...], preferred_element_type=jnp.float32) + br[...]
            if i < n_fc - 1:
                y = jnp.where(y >= 0, y, 0.01 * y)             # LeakyReLU slope 0.01
        if not critic:
            y = jax.nn.sigmoid(y)
        out_ref[...] = y

    return kernel


# -----------------------------------------------------------------------------
# Weight packing (wrapper glue, plain JAX)
# -----------------------------------------------------------------------------
def _block_diag(a, b):
    za = jnp.zeros((a.shape[0], b.shape[1]), jnp.float32)
    zb = jnp.zeros((b.shape[0], a.shape[1]), jnp.float32)
    return jnp.concatenate(
        [jnp.concatenate([a, za], axis=1),
         jnp.concatenate([zb, b], axis=1)], axis=0)


def pack_params(fwd_params, bwd_params, fc_params, hidden_dim, bidirectional):
    L = len(fwd_params)
    bi = bidirectional
    f32 = lambda a: jnp.asarray(a, jnp.float32)

    flat = []
    # Layer-0 input projection (hoisted): concat both directions along lanes.
    w0 = f32(fwd_params[0][0]).T                              # (D, 3H)
    b0 = f32(fwd_params[0][2]).reshape(1, -1)
    if bi:
        w0 = jnp.concatenate([w0, f32(bwd_params[0][0]).T], axis=1)
        b0 = jnp.concatenate([b0, f32(bwd_params[0][2]).reshape(1, -1)], axis=1)
    flat += [w0, b0]

    for l in range(L):
        wif, whf, bif, bhf = [f32(a) for a in fwd_params[l]]
        if bi:
            wib, whb, bib, bhb = [f32(a) for a in bwd_params[l]]
        if l > 0:
            wih = _block_diag(wif.T, wib.T) if bi else wif.T
            bih = (jnp.concatenate([bif, bib]) if bi else bif).reshape(1, -1)
            flat += [wih, bih]
        whh = _block_diag(whf.T, whb.T) if bi else whf.T
        bhh = (jnp.concatenate([bhf, bhb]) if bi else bhf).reshape(1, -1)
        flat += [whh, bhh]

    for (w, b) in fc_params:
        flat += [f32(w).T, f32(b).reshape(1, -1)]
    return flat


def discriminator_forward(x, fwd_params, bwd_params, fc_params,
                          hidden_dim, bidirectional, critic):
    """Whole Discriminator forward as one fused Pallas kernel call."""
    B, T, D = x.shape
    H = hidden_dim
    L = len(fwd_params)
    ND = 2 if bidirectional else 1
    n_fc = len(fc_params)

    # Time-major flatten so each timestep's gate rows are a contiguous,
    # sublane-aligned block of the precomputed-gates scratch.
    x_flat = jnp.transpose(x, (1, 0, 2)).reshape(T * B, D).astype(jnp.float32)
    flat_w = pack_params(fwd_params, bwd_params, fc_params, H, bidirectional)

    n_inputs = 1 + len(flat_w)
    kernel = make_discriminator_kernel(B, T, D, H, L, ND, n_fc, critic)

    return pl.pallas_call(
        kernel,
        out_shape=jax.ShapeDtypeStruct((B, 1), jnp.float32),
        in_specs=[pl.BlockSpec(memory_space=pltpu.MemorySpace.VMEM)] * n_inputs,
        out_specs=pl.BlockSpec(memory_space=pltpu.MemorySpace.VMEM),
        scratch_shapes=[pltpu.VMEM((T * B, ND * 3 * H), jnp.float32)],
    )(x_flat, *flat_w)


# -----------------------------------------------------------------------------
# Deterministic parameter init (matches PyTorch layouts)
# -----------------------------------------------------------------------------
def init_params(key, input_size, hidden_dim, gru_layers, fc_layers, bidirectional):
    H = hidden_dim
    ND = 2 if bidirectional else 1
    n_keys = ND * gru_layers * 4 + fc_layers * 2
    keys = iter(jax.random.split(key, n_keys))

    def uniform(shape, bound):
        return jax.random.uniform(next(keys), shape, jnp.float32, -bound, bound)

    kb = 1.0 / np.sqrt(H)

    def gru_stack():
        params = []
        for l in range(gru_layers):
            d_in = input_size if l == 0 else H
            params.append((
                uniform((3 * H, d_in), kb),   # weight_ih
                uniform((3 * H, H), kb),      # weight_hh
                uniform((3 * H,), kb),        # bias_ih
                uniform((3 * H,), kb),        # bias_hh
            ))
        return params

    fwd = gru_stack()
    bwd = gru_stack() if bidirectional else None

    disc_hidden = ND * gru_layers * H
    fc = []
    for i in range(fc_layers - 1):
        fin = disc_hidden // (2 ** i)
        fout = disc_hidden // (2 ** (i + 1))
        kw = 1.0 / np.sqrt(fin)
        fc.append((uniform((fout, fin), kw), uniform((fout,), kw)))
    fin = disc_hidden // (2 ** (fc_layers - 1))
    kw = 1.0 / np.sqrt(fin)
    fc.append((uniform((1, fin), kw), uniform((1,), kw)))
    return fwd, bwd, fc


# -----------------------------------------------------------------------------
# Pure-JAX reference (same math, no Pallas) for a correctness check.
# -----------------------------------------------------------------------------
def _gru_cell_ref(x, h, w_ih, w_hh, b_ih, b_hh):
    H = h.shape[1]
    gi = x @ w_ih.T + b_ih
    gh = h @ w_hh.T + b_hh
    r = jax.nn.sigmoid(gi[:, :H] + gh[:, :H])
    z = jax.nn.sigmoid(gi[:, H:2 * H] + gh[:, H:2 * H])
    n = jnp.tanh(gi[:, 2 * H:] + r * gh[:, 2 * H:])
    return (1.0 - z) * n + z * h


def reference_forward(x, fwd_params, bwd_params, fc_params,
                      hidden_dim, bidirectional, critic):
    B, T, _ = x.shape
    L = len(fwd_params)

    def run(params, time_order):
        hs = [jnp.zeros((B, hidden_dim), jnp.float32) for _ in range(L)]
        for t in time_order:
            hs[0] = _gru_cell_ref(x[:, t, :], hs[0], *params[0])
            for j in range(1, L):
                hs[j] = _gru_cell_ref(hs[j - 1], hs[j], *params[j])
        return jnp.concatenate(hs, axis=1)

    hidden = run(fwd_params, range(T))
    if bidirectional:
        hidden = jnp.concatenate(
            [hidden, run(bwd_params, range(T - 1, -1, -1))], axis=1)

    h = hidden
    for (w, b) in fc_params[:-1]:
        y = h @ w.T + b
        h = jnp.where(y >= 0, y, 0.01 * y)
    w, b = fc_params[-1]
    h = h @ w.T + b
    if not critic:
        h = jax.nn.sigmoid(h)
    return h


if __name__ == "__main__":
    # Small config consistent with the module; B chosen as a multiple of 8 so
    # all per-step gate-row loads are sublane-aligned.
    B, T = 8, 8
    input_size, hidden_dim = 8, 16
    gru_layers, fc_layers = 2, 2
    bidirectional, critic = True, False
    # TODO(synk): dropout (gru_dropout / fc_dropout) is modeled as identity (eval mode).

    key = jax.random.PRNGKey(0)
    kx, kp = jax.random.split(key)
    x = jax.random.normal(kx, (B, T, input_size), jnp.float32)

    fwd_params, bwd_params, fc_params = init_params(
        kp, input_size, hidden_dim, gru_layers, fc_layers, bidirectional)

    out = discriminator_forward(x, fwd_params, bwd_params, fc_params,
                                hidden_dim, bidirectional, critic)
    out = jax.block_until_ready(out)

    ref = reference_forward(x, fwd_params, bwd_params, fc_params,
                            hidden_dim, bidirectional, critic)
    ref = jax.block_until_ready(ref)

    assert out.shape == (B, 1)
    np.testing.assert_allclose(np.asarray(out), np.asarray(ref),
                               rtol=2e-4, atol=2e-5)
    print("KERNEL_OK")
</pallas_src>

<mosaic_0001>
module attributes {stable_mosaic.version = 11 : i64} {
  func.func @kernel(%arg0: memref<64x8xf32, #tpu.memory_space<vmem>>, %arg1: memref<8x96xf32, #tpu.memory_space<vmem>>, %arg2: memref<1x96xf32, #tpu.memory_space<vmem>>, %arg3: memref<32x96xf32, #tpu.memory_space<vmem>>, %arg4: memref<1x96xf32, #tpu.memory_space<vmem>>, %arg5: memref<32x96xf32, #tpu.memory_space<vmem>>, %arg6: memref<1x96xf32, #tpu.memory_space<vmem>>, %arg7: memref<32x96xf32, #tpu.memory_space<vmem>>, %arg8: memref<1x96xf32, #tpu.memory_space<vmem>>, %arg9: memref<64x32xf32, #tpu.memory_space<vmem>>, %arg10: memref<1x32xf32, #tpu.memory_space<vmem>>, %arg11: memref<32x1xf32, #tpu.memory_space<vmem>>, %arg12: memref<1x1xf32, #tpu.memory_space<vmem>>, %arg13: memref<8x1xf32, #tpu.memory_space<vmem>>, %arg14: memref<64x96xf32, #tpu.memory_space<vmem>>) attributes {dimension_semantics = [], scalar_prefetch = 0 : i64, scratch_operands = 1 : i64, tpu.core_type = #tpu.core_type<tc>} {
    %c0 = arith.constant 0 : index
    %c0_0 = arith.constant 0 : index
    %0 = vector.load %arg0[%c0, %c0_0] : memref<64x8xf32, #tpu.memory_space<vmem>>, vector<64x8xf32>
    %c0_1 = arith.constant 0 : index
    %c0_2 = arith.constant 0 : index
    %1 = vector.load %arg1[%c0_1, %c0_2] : memref<8x96xf32, #tpu.memory_space<vmem>>, vector<8x96xf32>
    %cst = arith.constant dense<0.000000e+00> : vector<64x96xf32>
    %2 = tpu.matmul %0, %1, %cst {dimension_numbers = #tpu.dot_dimension_numbers<[1], [0], [0], [1], [0, 0, 1, 1], [], []>} : vector<64x8xf32>, vector<8x96xf32>, vector<64x96xf32> -> vector<64x96xf32>
    %c0_3 = arith.constant 0 : index
    %c0_4 = arith.constant 0 : index
    %3 = vector.load %arg2[%c0_3, %c0_4] : memref<1x96xf32, #tpu.memory_space<vmem>>, vector<1x96xf32>
    %4 = vector.broadcast %3 : vector<1x96xf32> to vector<64x96xf32>
    %5 = arith.addf %2, %4 : vector<64x96xf32>
    %c0_5 = arith.constant 0 : index
    %c0_6 = arith.constant 0 : index
    %6 = vector.load %arg14[%c0_5, %c0_6] : memref<64x96xf32, #tpu.memory_space<vmem>>, vector<64x96xf32>
    tpu.vector_store %arg14[%c0_5, %c0_6], %5 {strides = array<i32>} : memref<64x96xf32, #tpu.memory_space<vmem>>, vector<64x96xf32>,
    %c0_7 = arith.constant 0 : index
    %c0_8 = arith.constant 0 : index
    %7 = vector.load %arg3[%c0_7, %c0_8] : memref<32x96xf32, #tpu.memory_space<vmem>>, vector<32x96xf32>
    %c0_9 = arith.constant 0 : index
    %c0_10 = arith.constant 0 : index
    %8 = vector.load %arg4[%c0_9, %c0_10] : memref<1x96xf32, #tpu.memory_space<vmem>>, vector<1x96xf32>
    %c0_11 = arith.constant 0 : index
    %c0_12 = arith.constant 0 : index
    %9 = vector.load %arg5[%c0_11, %c0_12] : memref<32x96xf32, #tpu.memory_space<vmem>>, vector<32x96xf32>
    %c0_13 = arith.constant 0 : index
    %c0_14 = arith.constant 0 : index
    %10 = vector.load %arg6[%c0_13, %c0_14] : memref<1x96xf32, #tpu.memory_space<vmem>>, vector<1x96xf32>
    %c0_15 = arith.constant 0 : index
    %c0_16 = arith.constant 0 : index
    %11 = vector.load %arg7[%c0_15, %c0_16] : memref<32x96xf32, #tpu.memory_space<vmem>>, vector<32x96xf32>
    %c0_17 = arith.constant 0 : index
    %c0_18 = arith.constant 0 : index
    %12 = vector.load %arg8[%c0_17, %c0_18] : memref<1x96xf32, #tpu.memory_space<vmem>>, vector<1x96xf32>
    %cst_19 = arith.constant 0.000000e+00 : f32
    %13 = vector.broadcast %cst_19 : f32 to vector<8x32xf32>
    %cst_20 = arith.constant 0.000000e+00 : f32
    %14 = vector.broadcast %cst_20 : f32 to vector<8x32xf32>
    %c0_21 = arith.constant 0 : index
    %c0_22 = arith.constant 0 : index
    %15 = vector.load %arg14[%c0_21, %c0_22] : memref<64x96xf32, #tpu.memory_space<vmem>>, vector<8x96xf32>
    %16 = vector.extract_strided_slice %15 {offsets = [0, 0], sizes = [8, 48], strides = [1, 1]} : vector<8x96xf32> to vector<8x48xf32>
    %c56 = arith.constant 56 : index
    %c0_23 = arith.constant 0 : index
    %17 = vector.load %arg14[%c56, %c0_23] : memref<64x96xf32, #tpu.memory_space<vmem>>, vector<8x96xf32>
    %18 = vector.extract_strided_slice %17 {offsets = [0, 48], sizes = [8, 48], strides = [1, 1]} : vector<8x96xf32> to vector<8x48xf32>
    %19 = tpu.concatenate %16, %18 in 1 : vector<8x48xf32>, vector<8x48xf32> -> vector<8x96xf32>
    %cst_24 = arith.constant dense<0.000000e+00> : vector<8x96xf32>
    %20 = tpu.matmul %13, %7, %cst_24 {dimension_numbers = #tpu.dot_dimension_numbers<[1], [0], [0], [1], [0, 0, 1, 1], [], []>} : vector<8x32xf32>, vector<32x96xf32>, vector<8x96xf32> -> vector<8x96xf32>
    %21 = vector.broadcast %8 : vector<1x96xf32> to vector<8x96xf32>
    %22 = arith.addf %20, %21 : vector<8x96xf32>
    %23 = vector.extract_strided_slice %19 {offsets = [0, 0], sizes = [8, 16], strides = [1, 1]} : vector<8x96xf32> to vector<8x16xf32>
    %24 = vector.extract_strided_slice %22 {offsets = [0, 0], sizes = [8, 16], strides = [1, 1]} : vector<8x96xf32> to vector<8x16xf32>
    %25 = arith.addf %23, %24 : vector<8x16xf32>
    %26 = arith.negf %25 : vector<8x16xf32>
    %27 = math.exp %26 : vector<8x16xf32>
    %cst_25 = arith.constant 1.000000e+00 : f32
    %28 = vector.broadcast %cst_25 : f32 to vector<8x16xf32>
    %29 = arith.addf %28, %27 : vector<8x16xf32>
    %30 = arith.divf %28, %29 : vector<8x16xf32>
    %31 = vector.extract_strided_slice %19 {offsets = [0, 16], sizes = [8, 16], strides = [1, 1]} : vector<8x96xf32> to vector<8x16xf32>
    %32 = vector.extract_strided_slice %22 {offsets = [0, 16], sizes = [8, 16], strides = [1, 1]} : vector<8x96xf32> to vector<8x16xf32>
    %33 = arith.addf %31, %32 : vector<8x16xf32>
    %34 = arith.negf %33 : vector<8x16xf32>
    %35 = math.exp %34 : vector<8x16xf32>
    %cst_26 = arith.constant 1.000000e+00 : f32
    %36 = vector.broadcast %cst_26 : f32 to vector<8x16xf32>
    %37 = arith.addf %36, %35 : vector<8x16xf32>
    %38 = arith.divf %36, %37 : vector<8x16xf32>
    %39 = vector.extract_strided_slice %19 {offsets = [0, 32], sizes = [8, 16], strides = [1, 1]} : vector<8x96xf32> to vector<8x16xf32>
    %40 = vector.extract_strided_slice %22 {offsets = [0, 32], sizes = [8, 16], strides = [1, 1]} : vector<8x96xf32> to vector<8x16xf32>
    %41 = arith.mulf %30, %40 : vector<8x16xf32>
    %42 = arith.addf %39, %41 : vector<8x16xf32>
    %43 = math.tanh %42 : vector<8x16xf32>
    %44 = vector.extract_strided_slice %13 {offsets = [0, 0], sizes = [8, 16], strides = [1, 1]} : vector<8x32xf32> to vector<8x16xf32>
    %cst_27 = arith.constant 1.000000e+00 : f32
    %45 = vector.broadcast %cst_27 : f32 to vector<8x16xf32>
    %46 = arith.subf %45, %38 : vector<8x16xf32>
    %47 = arith.mulf %46, %43 : vector<8x16xf32>
    %48 = arith.mulf %38, %44 : vector<8x16xf32>
    %49 = arith.addf %47, %48 : vector<8x16xf32>
    %50 = vector.extract_strided_slice %19 {offsets = [0, 48], sizes = [8, 16], strides = [1, 1]} : vector<8x96xf32> to vector<8x16xf32>
    %51 = vector.extract_strided_slice %22 {offsets = [0, 48], sizes = [8, 16], strides = [1, 1]} : vector<8x96xf32> to vector<8x16xf32>
    %52 = arith.addf %50, %51 : vector<8x16xf32>
    %53 = arith.negf %52 : vector<8x16xf32>
    %54 = math.exp %53 : vector<8x16xf32>
    %cst_28 = arith.constant 1.000000e+00 : f32
    %55 = vector.broadcast %cst_28 : f32 to vector<8x16xf32>
    %56 = arith.addf %55, %54 : vector<8x16xf32>
    %57 = arith.divf %55, %56 : vector<8x16xf32>
    %58 = vector.extract_strided_slice %19 {offsets = [0, 64], sizes = [8, 16], strides = [1, 1]} : vector<8x96xf32> to vector<8x16xf32>
    %59 = vector.extract_strided_slice %22 {offsets = [0, 64], sizes = [8, 16], strides = [1, 1]} : vector<8x96xf32> to vector<8x16xf32>
    %60 = arith.addf %58, %59 : vector<8x16xf32>
    %61 = arith.negf %60 : vector<8x16xf32>
    %62 = math.exp %61 : vector<8x16xf32>
    %cst_29 = arith.constant 1.000000e+00 : f32
    %63 = vector.broadcast %cst_29 : f32 to vector<8x16xf32>
    %64 = arith.addf %63, %62 : vector<8x16xf32>
    %65 = arith.divf %63, %64 : vector<8x16xf32>
    %66 = vector.extract_strided_slice %19 {offsets = [0, 80], sizes = [8, 16], strides = [1, 1]} : vector<8x96xf32> to vector<8x16xf32>
    %67 = vector.extract_strided_slice %22 {offsets = [0, 80], sizes = [8, 16], strides = [1, 1]} : vector<8x96xf32> to vector<8x16xf32>
    %68 = arith.mulf %57, %67 : vector<8x16xf32>
    %69 = arith.addf %66, %68 : vector<8x16xf32>
    %70 = math.tanh %69 : vector<8x16xf32>
    %71 = vector.extract_strided_slice %13 {offsets = [0, 16], sizes = [8, 16], strides = [1, 1]} : vector<8x32xf32> to vector<8x16xf32>
    %cst_30 = arith.constant 1.000000e+00 : f32
    %72 = vector.broadcast %cst_30 : f32 to vector<8x16xf32>
    %73 = arith.subf %72, %65 : vector<8x16xf32>
    %74 = arith.mulf %73, %70 : vector<8x16xf32>
    %75 = arith.mulf %65, %71 : vector<8x16xf32>
    %76 = arith.addf %74, %75 : vector<8x16xf32>
    %77 = tpu.concatenate %49, %76 in 1 : vector<8x16xf32>, vector<8x16xf32> -> vector<8x32xf32>
    %cst_31 = arith.constant dense<0.000000e+00> : vector<8x96xf32>
    %78 = tpu.matmul %77, %9, %cst_31 {dimension_numbers = #tpu.dot_dimension_numbers<[1], [0], [0], [1], [0, 0, 1, 1], [], []>} : vector<8x32xf32>, vector<32x96xf32>, vector<8x96xf32> -> vector<8x96xf32>
    %79 = vector.broadcast %10 : vector<1x96xf32> to vector<8x96xf32>
    %80 = arith.addf %78, %79 : vector<8x96xf32>
    %cst_32 = arith.constant dense<0.000000e+00> : vector<8x96xf32>
    %81 = tpu.matmul %14, %11, %cst_32 {dimension_numbers = #tpu.dot_dimension_numbers<[1], [0], [0], [1], [0, 0, 1, 1], [], []>} : vector<8x32xf32>, vector<32x96xf32>, vector<8x96xf32> -> vector<8x96xf32>
    %82 = vector.broadcast %12 : vector<1x96xf32> to vector<8x96xf32>
    %83 = arith.addf %81, %82 : vector<8x96xf32>
    %84 = vector.extract_strided_slice %80 {offsets = [0, 0], sizes = [8, 16], strides = [1, 1]} : vector<8x96xf32> to vector<8x16xf32>
    %85 = vector.extract_strided_slice %83 {offsets = [0, 0], sizes = [8, 16], strides = [1, 1]} : vector<8x96xf32> to vector<8x16xf32>
    %86 = arith.addf %84, %85 : vector<8x16xf32>
    %87 = arith.negf %86 : vector<8x16xf32>
    %88 = math.exp %87 : vector<8x16xf32>
    %cst_33 = arith.constant 1.000000e+00 : f32
    %89 = vector.broadcast %cst_33 : f32 to vector<8x16xf32>
    %90 = arith.addf %89, %88 : vector<8x16xf32>
    %91 = arith.divf %89, %90 : vector<8x16xf32>
    %92 = vector.extract_strided_slice %80 {offsets = [0, 16], sizes = [8, 16], strides = [1, 1]} : vector<8x96xf32> to vector<8x16xf32>
    %93 = vector.extract_strided_slice %83 {offsets = [0, 16], sizes = [8, 16], strides = [1, 1]} : vector<8x96xf32> to vector<8x16xf32>
    %94 = arith.addf %92, %93 : vector<8x16xf32>
    %95 = arith.negf %94 : vector<8x16xf32>
    %96 = math.exp %95 : vector<8x16xf32>
    %cst_34 = arith.constant 1.000000e+00 : f32
    %97 = vector.broadcast %cst_34 : f32 to vector<8x16xf32>
    %98 = arith.addf %97, %96 : vector<8x16xf32>
    %99 = arith.divf %97, %98 : vector<8x16xf32>
    %100 = vector.extract_strided_slice %80 {offsets = [0, 32], sizes = [8, 16], strides = [1, 1]} : vector<8x96xf32> to vector<8x16xf32>
    %101 = vector.extract_strided_slice %83 {offsets = [0, 32], sizes = [8, 16], strides = [1, 1]} : vector<8x96xf32> to vector<8x16xf32>
    %102 = arith.mulf %91, %101 : vector<8x16xf32>
    %103 = arith.addf %100, %102 : vector<8x16xf32>
    %104 = math.tanh %103 : vector<8x16xf32>
    %105 = vector.extract_strided_slice %14 {offsets = [0, 0], sizes = [8, 16], strides = [1, 1]} : vector<8x32xf32> to vector<8x16xf32>
    %cst_35 = arith.constant 1.000000e+00 : f32
    %106 = vector.broadcast %cst_35 : f32 to vector<8x16xf32>
    %107 = arith.subf %106, %99 : vector<8x16xf32>
    %108 = arith.mulf %107, %104 : vector<8x16xf32>
    %109 = arith.mulf %99, %105 : vector<8x16xf32>
    %110 = arith.addf %108, %109 : vector<8x16xf32>
    %111 = vector.extract_strided_slice %80 {offsets = [0, 48], sizes = [8, 16], strides = [1, 1]} : vector<8x96xf32> to vector<8x16xf32>
    %112 = vector.extract_strided_slice %83 {offsets = [0, 48], sizes = [8, 16], strides = [1, 1]} : vector<8x96xf32> to vector<8x16xf32>
    %113 = arith.addf %111, %112 : vector<8x16xf32>
    %114 = arith.negf %113 : vector<8x16xf32>
    %115 = math.exp %114 : vector<8x16xf32>
    %cst_36 = arith.constant 1.000000e+00 : f32
    %116 = vector.broadcast %cst_36 : f32 to vector<8x16xf32>
    %117 = arith.addf %116, %115 : vector<8x16xf32>
    %118 = arith.divf %116, %117 : vector<8x16xf32>
    %119 = vector.extract_strided_slice %80 {offsets = [0, 64], sizes = [8, 16], strides = [1, 1]} : vector<8x96xf32> to vector<8x16xf32>
    %120 = vector.extract_strided_slice %83 {offsets = [0, 64], sizes = [8, 16], strides = [1, 1]} : vector<8x96xf32> to vector<8x16xf32>
    %121 = arith.addf %119, %120 : vector<8x16xf32>
    %122 = arith.negf %121 : vector<8x16xf32>
    %123 = math.exp %122 : vector<8x16xf32>
    %cst_37 = arith.constant 1.000000e+00 : f32
    %124 = vector.broadcast %cst_37 : f32 to vector<8x16xf32>
    %125 = arith.addf %124, %123 : vector<8x16xf32>
    %126 = arith.divf %124, %125 : vector<8x16xf32>
    %127 = vector.extract_strided_slice %80 {offsets = [0, 80], sizes = [8, 16], strides = [1, 1]} : vector<8x96xf32> to vector<8x16xf32>
    %128 = vector.extract_strided_slice %83 {offsets = [0, 80], sizes = [8, 16], strides = [1, 1]} : vector<8x96xf32> to vector<8x16xf32>
    %129 = arith.mulf %118, %128 : vector<8x16xf32>
    %130 = arith.addf %127, %129 : vector<8x16xf32>
    %131 = math.tanh %130 : vector<8x16xf32>
    %132 = vector.extract_strided_slice %14 {offsets = [0, 16], sizes = [8, 16], strides = [1, 1]} : vector<8x32xf32> to vector<8x16xf32>
    %cst_38 = arith.constant 1.000000e+00 : f32
    %133 = vector.broadcast %cst_38 : f32 to vector<8x16xf32>
    %134 = arith.subf %133, %126 : vector<8x16xf32>
    %135 = arith.mulf %134, %131 : vector<8x16xf32>
    %136 = arith.mulf %126, %132 : vector<8x16xf32>
    %137 = arith.addf %135, %136 : vector<8x16xf32>
    %138 = tpu.concatenate %110, %137 in 1 : vector<8x16xf32>, vector<8x16xf32> -> vector<8x32xf32>
    %c8 = arith.constant 8 : index
    %c0_39 = arith.constant 0 : index
    %139 = vector.load %arg14[%c8, %c0_39] : memref<64x96xf32, #tpu.memory_space<vmem>>, vector<8x96xf32>
    %140 = vector.extract_strided_slice %139 {offsets = [0, 0], sizes = [8, 48], strides = [1, 1]} : vector<8x96xf32> to vector<8x48xf32>
    %c48 = arith.constant 48 : index
    %c0_40 = arith.constant 0 : index
    %141 = vector.load %arg14[%c48, %c0_40] : memref<64x96xf32, #tpu.memory_space<vmem>>, vector<8x96xf32>
    %142 = vector.extract_strided_slice %141 {offsets = [0, 48], sizes = [8, 48], strides = [1, 1]} : vector<8x96xf32> to vector<8x48xf32>
    %143 = tpu.concatenate %140, %142 in 1 : vector<8x48xf32>, vector<8x48xf32> -> vector<8x96xf32>
    %cst_41 = arith.constant dense<0.000000e+00> : vector<8x96xf32>
    %144 = tpu.matmul %77, %7, %cst_41 {dimension_numbers = #tpu.dot_dimension_numbers<[1], [0], [0], [1], [0, 0, 1, 1], [], []>} : vector<8x32xf32>, vector<32x96xf32>, vector<8x96xf32> -> vector<8x96xf32>
    %145 = vector.broadcast %8 : vector<1x96xf32> to vector<8x96xf32>
    %146 = arith.addf %144, %145 : vector<8x96xf32>
    %147 = vector.extract_strided_slice %143 {offsets = [0, 0], sizes = [8, 16], strides = [1, 1]} : vector<8x96xf32> to vector<8x16xf32>
    %148 = vector.extract_strided_slice %146 {offsets = [0, 0], sizes = [8, 16], strides = [1, 1]} : vector<8x96xf32> to vector<8x16xf32>
    %149 = arith.addf %147, %148 : vector<8x16xf32>
    %150 = arith.negf %149 : vector<8x16xf32>
    %151 = math.exp %150 : vector<8x16xf32>
    %cst_42 = arith.constant 1.000000e+00 : f32
    %152 = vector.broadcast %cst_42 : f32 to vector<8x16xf32>
    %153 = arith.addf %152, %151 : vector<8x16xf32>
    %154 = arith.divf %152, %153 : vector<8x16xf32>
    %155 = vector.extract_strided_slice %143 {offsets = [0, 16], sizes = [8, 16], strides = [1, 1]} : vector<8x96xf32> to vector<8x16xf32>
    %156 = vector.extract_strided_slice %146 {offsets = [0, 16], sizes = [8, 16], strides = [1, 1]} : vector<8x96xf32> to vector<8x16xf32>
    %157 = arith.addf %155, %156 : vector<8x16xf32>
    %158 = arith.negf %157 : vector<8x16xf32>
    %159 = math.exp %158 : vector<8x16xf32>
    %cst_43 = arith.constant 1.000000e+00 : f32
    %160 = vector.broadcast %cst_43 : f32 to vector<8x16xf32>
    %161 = arith.addf %160, %159 : vector<8x16xf32>
    %162 = arith.divf %160, %161 : vector<8x16xf32>
    %163 = vector.extract_strided_slice %143 {offsets = [0, 32], sizes = [8, 16], strides = [1, 1]} : vector<8x96xf32> to vector<8x16xf32>
    %164 = vector.extract_strided_slice %146 {offsets = [0, 32], sizes = [8, 16], strides = [1, 1]} : vector<8x96xf32> to vector<8x16xf32>
    %165 = arith.mulf %154, %164 : vector<8x16xf32>
    %166 = arith.addf %163, %165 : vector<8x16xf32>
    %167 = math.tanh %166 : vector<8x16xf32>
    %168 = vector.extract_strided_slice %77 {offsets = [0, 0], sizes = [8, 16], strides = [1, 1]} : vector<8x32xf32> to vector<8x16xf32>
    %cst_44 = arith.constant 1.000000e+00 : f32
    %169 = vector.broadcast %cst_44 : f32 to vector<8x16xf32>
    %170 = arith.subf %169, %162 : vector<8x16xf32>
    %171 = arith.mulf %170, %167 : vector<8x16xf32>
    %172 = arith.mulf %162, %168 : vector<8x16xf32>
    %173 = arith.addf %171, %172 : vector<8x16xf32>
    %174 = vector.extract_strided_slice %143 {offsets = [0, 48], sizes = [8, 16], strides = [1, 1]} : vector<8x96xf32> to vector<8x16xf32>
    %175 = vector.extract_strided_slice %146 {offsets = [0, 48], sizes = [8, 16], strides = [1, 1]} : vector<8x96xf32> to vector<8x16xf32>
    %176 = arith.addf %174, %175 : vector<8x16xf32>
    %177 = arith.negf %176 : vector<8x16xf32>
    %178 = math.exp %177 : vector<8x16xf32>
    %cst_45 = arith.constant 1.000000e+00 : f32
    %179 = vector.broadcast %cst_45 : f32 to vector<8x16xf32>
    %180 = arith.addf %179, %178 : vector<8x16xf32>
    %181 = arith.divf %179, %180 : vector<8x16xf32>
    %182 = vector.extract_strided_slice %143 {offsets = [0, 64], sizes = [8, 16], strides = [1, 1]} : vector<8x96xf32> to vector<8x16xf32>
    %183 = vector.extract_strided_slice %146 {offsets = [0, 64], sizes = [8, 16], strides = [1, 1]} : vector<8x96xf32> to vector<8x16xf32>
    %184 = arith.addf %182, %183 : vector<8x16xf32>
    %185 = arith.negf %184 : vector<8x16xf32>
    %186 = math.exp %185 : vector<8x16xf32>
    %cst_46 = arith.constant 1.000000e+00 : f32
    %187 = vector.broadcast %cst_46 : f32 to vector<8x16xf32>
    %188 = arith.addf %187, %186 : vector<8x16xf32>
    %189 = arith.divf %187, %188 : vector<8x16xf32>
    %190 = vector.extract_strided_slice %143 {offsets = [0, 80], sizes = [8, 16], strides = [1, 1]} : vector<8x96xf32> to vector<8x16xf32>
    %191 = vector.extract_strided_slice %146 {offsets = [0, 80], sizes = [8, 16], strides = [1, 1]} : vector<8x96xf32> to vector<8x16xf32>
    %192 = arith.mulf %181, %191 : vector<8x16xf32>
    %193 = arith.addf %190, %192 : vector<8x16xf32>
    %194 = math.tanh %193 : vector<8x16xf32>
    %195 = vector.extract_strided_slice %77 {offsets = [0, 16], sizes = [8, 16], strides = [1, 1]} : vector<8x32xf32> to vector<8x16xf32>
    %cst_47 = arith.constant 1.000000e+00 : f32
    %196 = vector.broadcast %cst_47 : f32 to vector<8x16xf32>
    %197 = arith.subf %196, %189 : vector<8x16xf32>
    %198 = arith.mulf %197, %194 : vector<8x16xf32>
    %199 = arith.mulf %189, %195 : vector<8x16xf32>
    %200 = arith.addf %198, %199 : vector<8x16xf32>
    %201 = tpu.concatenate %173, %200 in 1 : vector<8x16xf32>, vector<8x16xf32> -> vector<8x32xf32>
    %cst_48 = arith.constant dense<0.000000e+00> : vector<8x96xf32>
    %202 = tpu.matmul %201, %9, %cst_48 {dimension_numbers = #tpu.dot_dimension_numbers<[1], [0], [0], [1], [0, 0, 1, 1], [], []>} : vector<8x32xf32>, vector<32x96xf32>, vector<8x96xf32> -> vector<8x96xf32>
    %203 = vector.broadcast %10 : vector<1x96xf32> to vector<8x96xf32>
    %204 = arith.addf %202, %203 : vector<8x96xf32>
    %cst_49 = arith.constant dense<0.000000e+00> : vector<8x96xf32>
    %205 = tpu.matmul %138, %11, %cst_49 {dimension_numbers = #tpu.dot_dimension_numbers<[1], [0], [0], [1], [0, 0, 1, 1], [], []>} : vector<8x32xf32>, vector<32x96xf32>, vector<8x96xf32> -> vector<8x96xf32>
    %206 = vector.broadcast %12 : vector<1x96xf32> to vector<8x96xf32>
    %207 = arith.addf %205, %206 : vector<8x96xf32>
    %208 = vector.extract_strided_slice %204 {offsets = [0, 0], sizes = [8, 16], strides = [1, 1]} : vector<8x96xf32> to vector<8x16xf32>
    %209 = vector.extract_strided_slice %207 {offsets = [0, 0], sizes = [8, 16], strides = [1, 1]} : vector<8x96xf32> to vector<8x16xf32>
    %210 = arith.addf %208, %209 : vector<8x16xf32>
    %211 = arith.negf %210 : vector<8x16xf32>
    %212 = math.exp %211 : vector<8x16xf32>
    %cst_50 = arith.constant 1.000000e+00 : f32
    %213 = vector.broadcast %cst_50 : f32 to vector<8x16xf32>
    %214 = arith.addf %213, %212 : vector<8x16xf32>
    %215 = arith.divf %213, %214 : vector<8x16xf32>
    %216 = vector.extract_strided_slice %204 {offsets = [0, 16], sizes = [8, 16], strides = [1, 1]} : vector<8x96xf32> to vector<8x16xf32>
    %217 = vector.extract_strided_slice %207 {offsets = [0, 16], sizes = [8, 16], strides = [1, 1]} : vector<8x96xf32> to vector<8x16xf32>
    %218 = arith.addf %216, %217 : vector<8x16xf32>
    %219 = arith.negf %218 : vector<8x16xf32>
    %220 = math.exp %219 : vector<8x16xf32>
    %cst_51 = arith.constant 1.000000e+00 : f32
    %221 = vector.broadcast %cst_51 : f32 to vector<8x16xf32>
    %222 = arith.addf %221, %220 : vector<8x16xf32>
    %223 = arith.divf %221, %222 : vector<8x16xf32>
    %224 = vector.extract_strided_slice %204 {offsets = [0, 32], sizes = [8, 16], strides = [1, 1]} : vector<8x96xf32> to vector<8x16xf32>
    %225 = vector.extract_strided_slice %207 {offsets = [0, 32], sizes = [8, 16], strides = [1, 1]} : vector<8x96xf32> to vector<8x16xf32>
    %226 = arith.mulf %215, %225 : vector<8x16xf32>
    %227 = arith.addf %224, %226 : vector<8x16xf32>
    %228 = math.tanh %227 : vector<8x16xf32>
    %229 = vector.extract_strided_slice %138 {offsets = [0, 0], sizes = [8, 16], strides = [1, 1]} : vector<8x32xf32> to vector<8x16xf32>
    %cst_52 = arith.constant 1.000000e+00 : f32
    %230 = vector.broadcast %cst_52 : f32 to vector<8x16xf32>
    %231 = arith.subf %230, %223 : vector<8x16xf32>
    %232 = arith.mulf %231, %228 : vector<8x16xf32>
    %233 = arith.mulf %223, %229 : vector<8x16xf32>
    %234 = arith.addf %232, %233 : vector<8x16xf32>
    %235 = vector.extract_strided_slice %204 {offsets = [0, 48], sizes = [8, 16], strides = [1, 1]} : vector<8x96xf32> to vector<8x16xf32>
    %236 = vector.extract_strided_slice %207 {offsets = [0, 48], sizes = [8, 16], strides = [1, 1]} : vector<8x96xf32> to vector<8x16xf32>
    %237 = arith.addf %235, %236 : vector<8x16xf32>
    %238 = arith.negf %237 : vector<8x16xf32>
    %239 = math.exp %238 : vector<8x16xf32>
    %cst_53 = arith.constant 1.000000e+00 : f32
    %240 = vector.broadcast %cst_53 : f32 to vector<8x16xf32>
    %241 = arith.addf %240, %239 : vector<8x16xf32>
    %242 = arith.divf %240, %241 : vector<8x16xf32>
    %243 = vector.extract_strided_slice %204 {offsets = [0, 64], sizes = [8, 16], strides = [1, 1]} : vector<8x96xf32> to vector<8x16xf32>
    %244 = vector.extract_strided_slice %207 {offsets = [0, 64], sizes = [8, 16], strides = [1, 1]} : vector<8x96xf32> to vector<8x16xf32>
    %245 = arith.addf %243, %244 : vector<8x16xf32>
    %246 = arith.negf %245 : vector<8x16xf32>
    %247 = math.exp %246 : vector<8x16xf32>
    %cst_54 = arith.constant 1.000000e+00 : f32
    %248 = vector.broadcast %cst_54 : f32 to vector<8x16xf32>
    %249 = arith.addf %248, %247 : vector<8x16xf32>
    %250 = arith.divf %248, %249 : vector<8x16xf32>
    %251 = vector.extract_strided_slice %204 {offsets = [0, 80], sizes = [8, 16], strides = [1, 1]} : vector<8x96xf32> to vector<8x16xf32>
    %252 = vector.extract_strided_slice %207 {offsets = [0, 80], sizes = [8, 16], strides = [1, 1]} : vector<8x96xf32> to vector<8x16xf32>
    %253 = arith.mulf %242, %252 : vector<8x16xf32>
    %254 = arith.addf %251, %253 : vector<8x16xf32>
    %255 = math.tanh %254 : vector<8x16xf32>
    %256 = vector.extract_strided_slice %138 {offsets = [0, 16], sizes = [8, 16], strides = [1, 1]} : vector<8x32xf32> to vector<8x16xf32>
    %cst_55 = arith.constant 1.000000e+00 : f32
    %257 = vector.broadcast %cst_55 : f32 to vector<8x16xf32>
    %258 = arith.subf %257, %250 : vector<8x16xf32>
    %259 = arith.mulf %258, %255 : vector<8x16xf32>
    %260 = arith.mulf %250, %256 : vector<8x16xf32>
    %261 = arith.addf %259, %260 : vector<8x16xf32>
    %262 = tpu.concatenate %234, %261 in 1 : vector<8x16xf32>, vector<8x16xf32> -> vector<8x32xf32>
    %c16 = arith.constant 16 : index
    %c0_56 = arith.constant 0 : index
    %263 = vector.load %arg14[%c16, %c0_56] : memref<64x96xf32, #tpu.memory_space<vmem>>, vector<8x96xf32>
    %264 = vector.extract_strided_slice %263 {offsets = [0, 0], sizes = [8, 48], strides = [1, 1]} : vector<8x96xf32> to vector<8x48xf32>
    %c40 = arith.constant 40 : index
    %c0_57 = arith.constant 0 : index
    %265 = vector.load %arg14[%c40, %c0_57] : memref<64x96xf32, #tpu.memory_space<vmem>>, vector<8x96xf32>
    %266 = vector.extract_strided_slice %265 {offsets = [0, 48], sizes = [8, 48], strides = [1, 1]} : vector<8x96xf32> to vector<8x48xf32>
    %267 = tpu.concatenate %264, %266 in 1 : vector<8x48xf32>, vector<8x48xf32> -> vector<8x96xf32>
    %cst_58 = arith.constant dense<0.000000e+00> : vector<8x96xf32>
    %268 = tpu.matmul %201, %7, %cst_58 {dimension_numbers = #tpu.dot_dimension_numbers<[1], [0], [0], [1], [0, 0, 1, 1], [], []>} : vector<8x32xf32>, vector<32x96xf32>, vector<8x96xf32> -> vector<8x96xf32>
    %269 = vector.broadcast %8 : vector<1x96xf32> to vector<8x96xf32>
    %270 = arith.addf %268, %269 : vector<8x96xf32>
    %271 = vector.extract_strided_slice %267 {offsets = [0, 0], sizes = [8, 16], strides = [1, 1]} : vector<8x96xf32> to vector<8x16xf32>
    %272 = vector.extract_strided_slice %270 {offsets = [0, 0], sizes = [8, 16], strides = [1, 1]} : vector<8x96xf32> to vector<8x16xf32>
    %273 = arith.addf %271, %272 : vector<8x16xf32>
    %274 = arith.negf %273 : vector<8x16xf32>
    %275 = math.exp %274 : vector<8x16xf32>
    %cst_59 = arith.constant 1.000000e+00 : f32
    %276 = vector.broadcast %cst_59 : f32 to vector<8x16xf32>
    %277 = arith.addf %276, %275 : vector<8x16xf32>
    %278 = arith.divf %276, %277 : vector<8x16xf32>
    %279 = vector.extract_strided_slice %267 {offsets = [0, 16], sizes = [8, 16], strides = [1, 1]} : vector<8x96xf32> to vector<8x16xf32>
    %280 = vector.extract_strided_slice %270 {offsets = [0, 16], sizes = [8, 16], strides = [1, 1]} : vector<8x96xf32> to vector<8x16xf32>
    %281 = arith.addf %279, %280 : vector<8x16xf32>
    %282 = arith.negf %281 : vector<8x16xf32>
    %283 = math.exp %282 : vector<8x16xf32>
    %cst_60 = arith.constant 1.000000e+00 : f32
    %284 = vector.broadcast %cst_60 : f32 to vector<8x16xf32>
    %285 = arith.addf %284, %283 : vector<8x16xf32>
    %286 = arith.divf %284, %285 : vector<8x16xf32>
    %287 = vector.extract_strided_slice %267 {offsets = [0, 32], sizes = [8, 16], strides = [1, 1]} : vector<8x96xf32> to vector<8x16xf32>
    %288 = vector.extract_strided_slice %270 {offsets = [0, 32], sizes = [8, 16], strides = [1, 1]} : vector<8x96xf32> to vector<8x16xf32>
    %289 = arith.mulf %278, %288 : vector<8x16xf32>
    %290 = arith.addf %287, %289 : vector<8x16xf32>
    %291 = math.tanh %290 : vector<8x16xf32>
    %292 = vector.extract_strided_slice %201 {offsets = [0, 0], sizes = [8, 16], strides = [1, 1]} : vector<8x32xf32> to vector<8x16xf32>
    %cst_61 = arith.constant 1.000000e+00 : f32
    %293 = vector.broadcast %cst_61 : f32 to vector<8x16xf32>
    %294 = arith.subf %293, %286 : vector<8x16xf32>
    %295 = arith.mulf %294, %291 : vector<8x16xf32>
    %296 = arith.mulf %286, %292 : vector<8x16xf32>
    %297 = arith.addf %295, %296 : vector<8x16xf32>
    %298 = vector.extract_strided_slice %267 {offsets = [0, 48], sizes = [8, 16], strides = [1, 1]} : vector<8x96xf32> to vector<8x16xf32>
    %299 = vector.extract_strided_slice %270 {offsets = [0, 48], sizes = [8, 16], strides = [1, 1]} : vector<8x96xf32> to vector<8x16xf32>
    %300 = arith.addf %298, %299 : vector<8x16xf32>
    %301 = arith.negf %300 : vector<8x16xf32>
    %302 = math.exp %301 : vector<8x16xf32>
    %cst_62 = arith.constant 1.000000e+00 : f32
    %303 = vector.broadcast %cst_62 : f32 to vector<8x16xf32>
    %304 = arith.addf %303, %302 : vector<8x16xf32>
    %305 = arith.divf %303, %304 : vector<8x16xf32>
    %306 = vector.extract_strided_slice %267 {offsets = [0, 64], sizes = [8, 16], strides = [1, 1]} : vector<8x96xf32> to vector<8x16xf32>
    %307 = vector.extract_strided_slice %270 {offsets = [0, 64], sizes = [8, 16], strides = [1, 1]} : vector<8x96xf32> to vector<8x16xf32>
    %308 = arith.addf %306, %307 : vector<8x16xf32>
    %309 = arith.negf %308 : vector<8x16xf32>
    %310 = math.exp %309 : vector<8x16xf32>
    %cst_63 = arith.constant 1.000000e+00 : f32
    %311 = vector.broadcast %cst_63 : f32 to vector<8x16xf32>
    %312 = arith.addf %311, %310 : vector<8x16xf32>
    %313 = arith.divf %311, %312 : vector<8x16xf32>
    %314 = vector.extract_strided_slice %267 {offsets = [0, 80], sizes = [8, 16], strides = [1, 1]} : vector<8x96xf32> to vector<8x16xf32>
    %315 = vector.extract_strided_slice %270 {offsets = [0, 80], sizes = [8, 16], strides = [1, 1]} : vector<8x96xf32> to vector<8x16xf32>
    %316 = arith.mulf %305, %315 : vector<8x16xf32>
    %317 = arith.addf %314, %316 : vector<8x16xf32>
    %318 = math.tanh %317 : vector<8x16xf32>
    %319 = vector.extract_strided_slice %201 {offsets = [0, 16], sizes = [8, 16], strides = [1, 1]} : vector<8x32xf32> to vector<8x16xf32>
    %cst_64 = arith.constant 1.000000e+00 : f32
    %320 = vector.broadcast %cst_64 : f32 to vector<8x16xf32>
    %321 = arith.subf %320, %313 : vector<8x16xf32>
    %322 = arith.mulf %321, %318 : vector<8x16xf32>
    %323 = arith.mulf %313, %319 : vector<8x16xf32>
    %324 = arith.addf %322, %323 : vector<8x16xf32>
    %325 = tpu.concatenate %297, %324 in 1 : vector<8x16xf32>, vector<8x16xf32> -> vector<8x32xf32>
    %cst_65 = arith.constant dense<0.000000e+00> : vector<8x96xf32>
    %326 = tpu.matmul %325, %9, %cst_65 {dimension_numbers = #tpu.dot_dimension_numbers<[1], [0], [0], [1], [0, 0, 1, 1], [], []>} : vector<8x32xf32>, vector<32x96xf32>, vector<8x96xf32> -> vector<8x96xf32>
    %327 = vector.broadcast %10 : vector<1x96xf32> to vector<8x96xf32>
    %328 = arith.addf %326, %327 : vector<8x96xf32>
    %cst_66 = arith.constant dense<0.000000e+00> : vector<8x96xf32>
    %329 = tpu.matmul %262, %11, %cst_66 {dimension_numbers = #tpu.dot_dimension_numbers<[1], [0], [0], [1], [0, 0, 1, 1], [], []>} : vector<8x32xf32>, vector<32x96xf32>, vector<8x96xf32> -> vector<8x96xf32>
    %330 = vector.broadcast %12 : vector<1x96xf32> to vector<8x96xf32>
    %331 = arith.addf %329, %330 : vector<8x96xf32>
    %332 = vector.extract_strided_slice %328 {offsets = [0, 0], sizes = [8, 16], strides = [1, 1]} : vector<8x96xf32> to vector<8x16xf32>
    %333 = vector.extract_strided_slice %331 {offsets = [0, 0], sizes = [8, 16], strides = [1, 1]} : vector<8x96xf32> to vector<8x16xf32>
    %334 = arith.addf %332, %333 : vector<8x16xf32>
    %335 = arith.negf %334 : vector<8x16xf32>
    %336 = math.exp %335 : vector<8x16xf32>
    %cst_67 = arith.constant 1.000000e+00 : f32
    %337 = vector.broadcast %cst_67 : f32 to vector<8x16xf32>
    %338 = arith.addf %337, %336 : vector<8x16xf32>
    %339 = arith.divf %337, %338 : vector<8x16xf32>
    %340 = vector.extract_strided_slice %328 {offsets = [0, 16], sizes = [8, 16], strides = [1, 1]} : vector<8x96xf32> to vector<8x16xf32>
    %341 = vector.extract_strided_slice %331 {offsets = [0, 16], sizes = [8, 16], strides = [1, 1]} : vector<8x96xf32> to vector<8x16xf32>
    %342 = arith.addf %340, %341 : vector<8x16xf32>
    %343 = arith.negf %342 : vector<8x16xf32>
    %344 = math.exp %343 : vector<8x16xf32>
    %cst_68 = arith.constant 1.000000e+00 : f32
    %345 = vector.broadcast %cst_68 : f32 to vector<8x16xf32>
    %346 = arith.addf %345, %344 : vector<8x16xf32>
    %347 = arith.divf %345, %346 : vector<8x16xf32>
    %348 = vector.extract_strided_slice %328 {offsets = [0, 32], sizes = [8, 16], strides = [1, 1]} : vector<8x96xf32> to vector<8x16xf32>
    %349 = vector.extract_strided_slice %331 {offsets = [0, 32], sizes = [8, 16], strides = [1, 1]} : vector<8x96xf32> to vector<8x16xf32>
    %350 = arith.mulf %339, %349 : vector<8x16xf32>
    %351 = arith.addf %348, %350 : vector<8x16xf32>
    %352 = math.tanh %351 : vector<8x16xf32>
    %353 = vector.extract_strided_slice %262 {offsets = [0, 0], sizes = [8, 16], strides = [1, 1]} : vector<8x32xf32> to vector<8x16xf32>
    %cst_69 = arith.constant 1.000000e+00 : f32
    %354 = vector.broadcast %cst_69 : f32 to vector<8x16xf32>
    %355 = arith.subf %354, %347 : vector<8x16xf32>
    %356 = arith.mulf %355, %352 : vector<8x16xf32>
    %357 = arith.mulf %347, %353 : vector<8x16xf32>
    %358 = arith.addf %356, %357 : vector<8x16xf32>
    %359 = vector.extract_strided_slice %328 {offsets = [0, 48], sizes = [8, 16], strides = [1, 1]} : vector<8x96xf32> to vector<8x16xf32>
    %360 = vector.extract_strided_slice %331 {offsets = [0, 48], sizes = [8, 16], strides = [1, 1]} : vector<8x96xf32> to vector<8x16xf32>
    %361 = arith.addf %359, %360 : vector<8x16xf32>
    %362 = arith.negf %361 : vector<8x16xf32>
    %363 = math.exp %362 : vector<8x16xf32>
    %cst_70 = arith.constant 1.000000e+00 : f32
    %364 = vector.broadcast %cst_70 : f32 to vector<8x16xf32>
    %365 = arith.addf %364, %363 : vector<8x16xf32>
    %366 = arith.divf %364, %365 : vector<8x16xf32>
    %367 = vector.extract_strided_slice %328 {offsets = [0, 64], sizes = [8, 16], strides = [1, 1]} : vector<8x96xf32> to vector<8x16xf32>
    %368 = vector.extract_strided_slice %331 {offsets = [0, 64], sizes = [8, 16], strides = [1, 1]} : vector<8x96xf32> to vector<8x16xf32>
    %369 = arith.addf %367, %368 : vector<8x16xf32>
    %370 = arith.negf %369 : vector<8x16xf32>
    %371 = math.exp %370 : vector<8x16xf32>
    %cst_71 = arith.constant 1.000000e+00 : f32
    %372 = vector.broadcast %cst_71 : f32 to vector<8x16xf32>
    %373 = arith.addf %372, %371 : vector<8x16xf32>
    %374 = arith.divf %372, %373 : vector<8x16xf32>
    %375 = vector.extract_strided_slice %328 {offsets = [0, 80], sizes = [8, 16], strides = [1, 1]} : vector<8x96xf32> to vector<8x16xf32>
    %376 = vector.extract_strided_slice %331 {offsets = [0, 80], sizes = [8, 16], strides = [1, 1]} : vector<8x96xf32> to vector<8x16xf32>
    %377 = arith.mulf %366, %376 : vector<8x16xf32>
    %378 = arith.addf %375, %377 : vector<8x16xf32>
    %379 = math.tanh %378 : vector<8x16xf32>
    %380 = vector.extract_strided_slice %262 {offsets = [0, 16], sizes = [8, 16], strides = [1, 1]} : vector<8x32xf32> to vector<8x16xf32>
    %cst_72 = arith.constant 1.000000e+00 : f32
    %381 = vector.broadcast %cst_72 : f32 to vector<8x16xf32>
    %382 = arith.subf %381, %374 : vector<8x16xf32>
    %383 = arith.mulf %382, %379 : vector<8x16xf32>
    %384 = arith.mulf %374, %380 : vector<8x16xf32>
    %385 = arith.addf %383, %384 : vector<8x16xf32>
    %386 = tpu.concatenate %358, %385 in 1 : vector<8x16xf32>, vector<8x16xf32> -> vector<8x32xf32>
    %c24 = arith.constant 24 : index
    %c0_73 = arith.constant 0 : index
    %387 = vector.load %arg14[%c24, %c0_73] : memref<64x96xf32, #tpu.memory_space<vmem>>, vector<8x96xf32>
    %388 = vector.extract_strided_slice %387 {offsets = [0, 0], sizes = [8, 48], strides = [1, 1]} : vector<8x96xf32> to vector<8x48xf32>
    %c32 = arith.constant 32 : index
    %c0_74 = arith.constant 0 : index
    %389 = vector.load %arg14[%c32, %c0_74] : memref<64x96xf32, #tpu.memory_space<vmem>>, vector<8x96xf32>
    %390 = vector.extract_strided_slice %389 {offsets = [0, 48], sizes = [8, 48], strides = [1, 1]} : vector<8x96xf32> to vector<8x48xf32>
    %391 = tpu.concatenate %388, %390 in 1 : vector<8x48xf32>, vector<8x48xf32> -> vector<8x96xf32>
    %cst_75 = arith.constant dense<0.000000e+00> : vector<8x96xf32>
    %392 = tpu.matmul %325, %7, %cst_75 {dimension_numbers = #tpu.dot_dimension_numbers<[1], [0], [0], [1], [0, 0, 1, 1], [], []>} : vector<8x32xf32>, vector<32x96xf32>, vector<8x96xf32> -> vector<8x96xf32>
    %393 = vector.broadcast %8 : vector<1x96xf32> to vector<8x96xf32>
    %394 = arith.addf %392, %393 : vector<8x96xf32>
    %395 = vector.extract_strided_slice %391 {offsets = [0, 0], sizes = [8, 16], strides = [1, 1]} : vector<8x96xf32> to vector<8x16xf32>
    %396 = vector.extract_strided_slice %394 {offsets = [0, 0], sizes = [8, 16], strides = [1, 1]} : vector<8x96xf32> to vector<8x16xf32>
    %397 = arith.addf %395, %396 : vector<8x16xf32>
    %398 = arith.negf %397 : vector<8x16xf32>
    %399 = math.exp %398 : vector<8x16xf32>
    %cst_76 = arith.constant 1.000000e+00 : f32
    %400 = vector.broadcast %cst_76 : f32 to vector<8x16xf32>
    %401 = arith.addf %400, %399 : vector<8x16xf32>
    %402 = arith.divf %400, %401 : vector<8x16xf32>
    %403 = vector.extract_strided_slice %391 {offsets = [0, 16], sizes = [8, 16], strides = [1, 1]} : vector<8x96xf32> to vector<8x16xf32>
    %404 = vector.extract_strided_slice %394 {offsets = [0, 16], sizes = [8, 16], strides = [1, 1]} : vector<8x96xf32> to vector<8x16xf32>
    %405 = arith.addf %403, %404 : vector<8x16xf32>
    %406 = arith.negf %405 : vector<8x16xf32>
    %407 = math.exp %406 : vector<8x16xf32>
    %cst_77 = arith.constant 1.000000e+00 : f32
    %408 = vector.broadcast %cst_77 : f32 to vector<8x16xf32>
    %409 = arith.addf %408, %407 : vector<8x16xf32>
    %410 = arith.divf %408, %409 : vector<8x16xf32>
    %411 = vector.extract_strided_slice %391 {offsets = [0, 32], sizes = [8, 16], strides = [1, 1]} : vector<8x96xf32> to vector<8x16xf32>
    %412 = vector.extract_strided_slice %394 {offsets = [0, 32], sizes = [8, 16], strides = [1, 1]} : vector<8x96xf32> to vector<8x16xf32>
    %413 = arith.mulf %402, %412 : vector<8x16xf32>
    %414 = arith.addf %411, %413 : vector<8x16xf32>
    %415 = math.tanh %414 : vector<8x16xf32>
    %416 = vector.extract_strided_slice %325 {offsets = [0, 0], sizes = [8, 16], strides = [1, 1]} : vector<8x32xf32> to vector<8x16xf32>
    %cst_78 = arith.constant 1.000000e+00 : f32
    %417 = vector.broadcast %cst_78 : f32 to vector<8x16xf32>
    %418 = arith.subf %417, %410 : vector<8x16xf32>
    %419 = arith.mulf %418, %415 : vector<8x16xf32>
    %420 = arith.mulf %410, %416 : vector<8x16xf32>
    %421 = arith.addf %419, %420 : vector<8x16xf32>
    %422 = vector.extract_strided_slice %391 {offsets = [0, 48], sizes = [8, 16], strides = [1, 1]} : vector<8x96xf32> to vector<8x16xf32>
    %423 = vector.extract_strided_slice %394 {offsets = [0, 48], sizes = [8, 16], strides = [1, 1]} : vector<8x96xf32> to vector<8x16xf32>
    %424 = arith.addf %422, %423 : vector<8x16xf32>
    %425 = arith.negf %424 : vector<8x16xf32>
    %426 = math.exp %425 : vector<8x16xf32>
    %cst_79 = arith.constant 1.000000e+00 : f32
    %427 = vector.broadcast %cst_79 : f32 to vector<8x16xf32>
    %428 = arith.addf %427, %426 : vector<8x16xf32>
    %429 = arith.divf %427, %428 : vector<8x16xf32>
    %430 = vector.extract_strided_slice %391 {offsets = [0, 64], sizes = [8, 16], strides = [1, 1]} : vector<8x96xf32> to vector<8x16xf32>
    %431 = vector.extract_strided_slice %394 {offsets = [0, 64], sizes = [8, 16], strides = [1, 1]} : vector<8x96xf32> to vector<8x16xf32>
    %432 = arith.addf %430, %431 : vector<8x16xf32>
    %433 = arith.negf %432 : vector<8x16xf32>
    %434 = math.exp %433 : vector<8x16xf32>
    %cst_80 = arith.constant 1.000000e+00 : f32
    %435 = vector.broadcast %cst_80 : f32 to vector<8x16xf32>
    %436 = arith.addf %435, %434 : vector<8x16xf32>
    %437 = arith.divf %435, %436 : vector<8x16xf32>
    %438 = vector.extract_strided_slice %391 {offsets = [0, 80], sizes = [8, 16], strides = [1, 1]} : vector<8x96xf32> to vector<8x16xf32>
    %439 = vector.extract_strided_slice %394 {offsets = [0, 80], sizes = [8, 16], strides = [1, 1]} : vector<8x96xf32> to vector<8x16xf32>
    %440 = arith.mulf %429, %439 : vector<8x16xf32>
    %441 = arith.addf %438, %440 : vector<8x16xf32>
    %442 = math.tanh %441 : vector<8x16xf32>
    %443 = vector.extract_strided_slice %325 {offsets = [0, 16], sizes = [8, 16], strides = [1, 1]} : vector<8x32xf32> to vector<8x16xf32>
    %cst_81 = arith.constant 1.000000e+00 : f32
    %444 = vector.broadcast %cst_81 : f32 to vector<8x16xf32>
    %445 = arith.subf %444, %437 : vector<8x16xf32>
    %446 = arith.mulf %445, %442 : vector<8x16xf32>
    %447 = arith.mulf %437, %443 : vector<8x16xf32>
    %448 = arith.addf %446, %447 : vector<8x16xf32>
    %449 = tpu.concatenate %421, %448 in 1 : vector<8x16xf32>, vector<8x16xf32> -> vector<8x32xf32>
    %cst_82 = arith.constant dense<0.000000e+00> : vector<8x96xf32>
    %450 = tpu.matmul %449, %9, %cst_82 {dimension_numbers = #tpu.dot_dimension_numbers<[1], [0], [0], [1], [0, 0, 1, 1], [], []>} : vector<8x32xf32>, vector<32x96xf32>, vector<8x96xf32> -> vector<8x96xf32>
    %451 = vector.broadcast %10 : vector<1x96xf32> to vector<8x96xf32>
    %452 = arith.addf %450, %451 : vector<8x96xf32>
    %cst_83 = arith.constant dense<0.000000e+00> : vector<8x96xf32>
    %453 = tpu.matmul %386, %11, %cst_83 {dimension_numbers = #tpu.dot_dimension_numbers<[1], [0], [0], [1], [0, 0, 1, 1], [], []>} : vector<8x32xf32>, vector<32x96xf32>, vector<8x96xf32> -> vector<8x96xf32>
    %454 = vector.broadcast %12 : vector<1x96xf32> to vector<8x96xf32>
    %455 = arith.addf %453, %454 : vector<8x96xf32>
    %456 = vector.extract_strided_slice %452 {offsets = [0, 0], sizes = [8, 16], strides = [1, 1]} : vector<8x96xf32> to vector<8x16xf32>
    %457 = vector.extract_strided_slice %455 {offsets = [0, 0], sizes = [8, 16], strides = [1, 1]} : vector<8x96xf32> to vector<8x16xf32>
    %458 = arith.addf %456, %457 : vector<8x16xf32>
    %459 = arith.negf %458 : vector<8x16xf32>
    %460 = math.exp %459 : vector<8x16xf32>
    %cst_84 = arith.constant 1.000000e+00 : f32
    %461 = vector.broadcast %cst_84 : f32 to vector<8x16xf32>
    %462 = arith.addf %461, %460 : vector<8x16xf32>
    %463 = arith.divf %461, %462 : vector<8x16xf32>
    %464 = vector.extract_strided_slice %452 {offsets = [0, 16], sizes = [8, 16], strides = [1, 1]} : vector<8x96xf32> to vector<8x16xf32>
    %465 = vector.extract_strided_slice %455 {offsets = [0, 16], sizes = [8, 16], strides = [1, 1]} : vector<8x96xf32> to vector<8x16xf32>
    %466 = arith.addf %464, %465 : vector<8x16xf32>
    %467 = arith.negf %466 : vector<8x16xf32>
    %468 = math.exp %467 : vector<8x16xf32>
    %cst_85 = arith.constant 1.000000e+00 : f32
    %469 = vector.broadcast %cst_85 : f32 to vector<8x16xf32>
    %470 = arith.addf %469, %468 : vector<8x16xf32>
    %471 = arith.divf %469, %470 : vector<8x16xf32>
    %472 = vector.extract_strided_slice %452 {offsets = [0, 32], sizes = [8, 16], strides = [1, 1]} : vector<8x96xf32> to vector<8x16xf32>
    %473 = vector.extract_strided_slice %455 {offsets = [0, 32], sizes = [8, 16], strides = [1, 1]} : vector<8x96xf32> to vector<8x16xf32>
    %474 = arith.mulf %463, %473 : vector<8x16xf32>
    %475 = arith.addf %472, %474 : vector<8x16xf32>
    %476 = math.tanh %475 : vector<8x16xf32>
    %477 = vector.extract_strided_slice %386 {offsets = [0, 0], sizes = [8, 16], strides = [1, 1]} : vector<8x32xf32> to vector<8x16xf32>
    %cst_86 = arith.constant 1.000000e+00 : f32
    %478 = vector.broadcast %cst_86 : f32 to vector<8x16xf32>
    %479 = arith.subf %478, %471 : vector<8x16xf32>
    %480 = arith.mulf %479, %476 : vector<8x16xf32>
    %481 = arith.mulf %471, %477 : vector<8x16xf32>
    %482 = arith.addf %480, %481 : vector<8x16xf32>
    %483 = vector.extract_strided_slice %452 {offsets = [0, 48], sizes = [8, 16], strides = [1, 1]} : vector<8x96xf32> to vector<8x16xf32>
    %484 = vector.extract_strided_slice %455 {offsets = [0, 48], sizes = [8, 16], strides = [1, 1]} : vector<8x96xf32> to vector<8x16xf32>
    %485 = arith.addf %483, %484 : vector<8x16xf32>
    %486 = arith.negf %485 : vector<8x16xf32>
    %487 = math.exp %486 : vector<8x16xf32>
    %cst_87 = arith.constant 1.000000e+00 : f32
    %488 = vector.broadcast %cst_87 : f32 to vector<8x16xf32>
    %489 = arith.addf %488, %487 : vector<8x16xf32>
    %490 = arith.divf %488, %489 : vector<8x16xf32>
    %491 = vector.extract_strided_slice %452 {offsets = [0, 64], sizes = [8, 16], strides = [1, 1]} : vector<8x96xf32> to vector<8x16xf32>
    %492 = vector.extract_strided_slice %455 {offsets = [0, 64], sizes = [8, 16], strides = [1, 1]} : vector<8x96xf32> to vector<8x16xf32>
    %493 = arith.addf %491, %492 : vector<8x16xf32>
    %494 = arith.negf %493 : vector<8x16xf32>
    %495 = math.exp %494 : vector<8x16xf32>
    %cst_88 = arith.constant 1.000000e+00 : f32
    %496 = vector.broadcast %cst_88 : f32 to vector<8x16xf32>
    %497 = arith.addf %496, %495 : vector<8x16xf32>
    %498 = arith.divf %496, %497 : vector<8x16xf32>
    %499 = vector.extract_strided_slice %452 {offsets = [0, 80], sizes = [8, 16], strides = [1, 1]} : vector<8x96xf32> to vector<8x16xf32>
    %500 = vector.extract_strided_slice %455 {offsets = [0, 80], sizes = [8, 16], strides = [1, 1]} : vector<8x96xf32> to vector<8x16xf32>
    %501 = arith.mulf %490, %500 : vector<8x16xf32>
    %502 = arith.addf %499, %501 : vector<8x16xf32>
    %503 = math.tanh %502 : vector<8x16xf32>
    %504 = vector.extract_strided_slice %386 {offsets = [0, 16], sizes = [8, 16], strides = [1, 1]} : vector<8x32xf32> to vector<8x16xf32>
    %cst_89 = arith.constant 1.000000e+00 : f32
    %505 = vector.broadcast %cst_89 : f32 to vector<8x16xf32>
    %506 = arith.subf %505, %498 : vector<8x16xf32>
    %507 = arith.mulf %506, %503 : vector<8x16xf32>
    %508 = arith.mulf %498, %504 : vector<8x16xf32>
    %509 = arith.addf %507, %508 : vector<8x16xf32>
    %510 = tpu.concatenate %482, %509 in 1 : vector<8x16xf32>, vector<8x16xf32> -> vector<8x32xf32>
    %c32_90 = arith.constant 32 : index
    %c0_91 = arith.constant 0 : index
    %511 = vector.load %arg14[%c32_90, %c0_91] : memref<64x96xf32, #tpu.memory_space<vmem>>, vector<8x96xf32>
    %512 = vector.extract_strided_slice %511 {offsets = [0, 0], sizes = [8, 48], strides = [1, 1]} : vector<8x96xf32> to vector<8x48xf32>
    %c24_92 = arith.constant 24 : index
    %c0_93 = arith.constant 0 : index
    %513 = vector.load %arg14[%c24_92, %c0_93] : memref<64x96xf32, #tpu.memory_space<vmem>>, vector<8x96xf32>
    %514 = vector.extract_strided_slice %513 {offsets = [0, 48], sizes = [8, 48], strides = [1, 1]} : vector<8x96xf32> to vector<8x48xf32>
    %515 = tpu.concatenate %512, %514 in 1 : vector<8x48xf32>, vector<8x48xf32> -> vector<8x96xf32>
    %cst_94 = arith.constant dense<0.000000e+00> : vector<8x96xf32>
    %516 = tpu.matmul %449, %7, %cst_94 {dimension_numbers = #tpu.dot_dimension_numbers<[1], [0], [0], [1], [0, 0, 1, 1], [], []>} : vector<8x32xf32>, vector<32x96xf32>, vector<8x96xf32> -> vector<8x96xf32>
    %517 = vector.broadcast %8 : vector<1x96xf32> to vector<8x96xf32>
    %518 = arith.addf %516, %517 : vector<8x96xf32>
    %519 = vector.extract_strided_slice %515 {offsets = [0, 0], sizes = [8, 16], strides = [1, 1]} : vector<8x96xf32> to vector<8x16xf32>
    %520 = vector.extract_strided_slice %518 {offsets = [0, 0], sizes = [8, 16], strides = [1, 1]} : vector<8x96xf32> to vector<8x16xf32>
    %521 = arith.addf %519, %520 : vector<8x16xf32>
    %522 = arith.negf %521 : vector<8x16xf32>
    %523 = math.exp %522 : vector<8x16xf32>
    %cst_95 = arith.constant 1.000000e+00 : f32
    %524 = vector.broadcast %cst_95 : f32 to vector<8x16xf32>
    %525 = arith.addf %524, %523 : vector<8x16xf32>
    %526 = arith.divf %524, %525 : vector<8x16xf32>
    %527 = vector.extract_strided_slice %515 {offsets = [0, 16], sizes = [8, 16], strides = [1, 1]} : vector<8x96xf32> to vector<8x16xf32>
    %528 = vector.extract_strided_slice %518 {offsets = [0, 16], sizes = [8, 16], strides = [1, 1]} : vector<8x96xf32> to vector<8x16xf32>
    %529 = arith.addf %527, %528 : vector<8x16xf32>
    %530 = arith.negf %529 : vector<8x16xf32>
    %531 = math.exp %530 : vector<8x16xf32>
    %cst_96 = arith.constant 1.000000e+00 : f32
    %532 = vector.broadcast %cst_96 : f32 to vector<8x16xf32>
    %533 = arith.addf %532, %531 : vector<8x16xf32>
    %534 = arith.divf %532, %533 : vector<8x16xf32>
    %535 = vector.extract_strided_slice %515 {offsets = [0, 32], sizes = [8, 16], strides = [1, 1]} : vector<8x96xf32> to vector<8x16xf32>
    %536 = vector.extract_strided_slice %518 {offsets = [0, 32], sizes = [8, 16], strides = [1, 1]} : vector<8x96xf32> to vector<8x16xf32>
    %537 = arith.mulf %526, %536 : vector<8x16xf32>
    %538 = arith.addf %535, %537 : vector<8x16xf32>
    %539 = math.tanh %538 : vector<8x16xf32>
    %540 = vector.extract_strided_slice %449 {offsets = [0, 0], sizes = [8, 16], strides = [1, 1]} : vector<8x32xf32> to vector<8x16xf32>
    %cst_97 = arith.constant 1.000000e+00 : f32
    %541 = vector.broadcast %cst_97 : f32 to vector<8x16xf32>
    %542 = arith.subf %541, %534 : vector<8x16xf32>
    %543 = arith.mulf %542, %539 : vector<8x16xf32>
    %544 = arith.mulf %534, %540 : vector<8x16xf32>
    %545 = arith.addf %543, %544 : vector<8x16xf32>
    %546 = vector.extract_strided_slice %515 {offsets = [0, 48], sizes = [8, 16], strides = [1, 1]} : vector<8x96xf32> to vector<8x16xf32>
    %547 = vector.extract_strided_slice %518 {offsets = [0, 48], sizes = [8, 16], strides = [1, 1]} : vector<8x96xf32> to vector<8x16xf32>
    %548 = arith.addf %546, %547 : vector<8x16xf32>
    %549 = arith.negf %548 : vector<8x16xf32>
    %550 = math.exp %549 : vector<8x16xf32>
    %cst_98 = arith.constant 1.000000e+00 : f32
    %551 = vector.broadcast %cst_98 : f32 to vector<8x16xf32>
    %552 = arith.addf %551, %550 : vector<8x16xf32>
    %553 = arith.divf %551, %552 : vector<8x16xf32>
    %554 = vector.extract_strided_slice %515 {offsets = [0, 64], sizes = [8, 16], strides = [1, 1]} : vector<8x96xf32> to vector<8x16xf32>
    %555 = vector.extract_strided_slice %518 {offsets = [0, 64], sizes = [8, 16], strides = [1, 1]} : vector<8x96xf32> to vector<8x16xf32>
    %556 = arith.addf %554, %555 : vector<8x16xf32>
    %557 = arith.negf %556 : vector<8x16xf32>
    %558 = math.exp %557 : vector<8x16xf32>
    %cst_99 = arith.constant 1.000000e+00 : f32
    %559 = vector.broadcast %cst_99 : f32 to vector<8x16xf32>
    %560 = arith.addf %559, %558 : vector<8x16xf32>
    %561 = arith.divf %559, %560 : vector<8x16xf32>
    %562 = vector.extract_strided_slice %515 {offsets = [0, 80], sizes = [8, 16], strides = [1, 1]} : vector<8x96xf32> to vector<8x16xf32>
    %563 = vector.extract_strided_slice %518 {offsets = [0, 80], sizes = [8, 16], strides = [1, 1]} : vector<8x96xf32> to vector<8x16xf32>
    %564 = arith.mulf %553, %563 : vector<8x16xf32>
    %565 = arith.addf %562, %564 : vector<8x16xf32>
    %566 = math.tanh %565 : vector<8x16xf32>
    %567 = vector.extract_strided_slice %449 {offsets = [0, 16], sizes = [8, 16], strides = [1, 1]} : vector<8x32xf32> to vector<8x16xf32>
    %cst_100 = arith.constant 1.000000e+00 : f32
    %568 = vector.broadcast %cst_100 : f32 to vector<8x16xf32>
    %569 = arith.subf %568, %561 : vector<8x16xf32>
    %570 = arith.mulf %569, %566 : vector<8x16xf32>
    %571 = arith.mulf %561, %567 : vector<8x16xf32>
    %572 = arith.addf %570, %571 : vector<8x16xf32>
    %573 = tpu.concatenate %545, %572 in 1 : vector<8x16xf32>, vector<8x16xf32> -> vector<8x32xf32>
    %cst_101 = arith.constant dense<0.000000e+00> : vector<8x96xf32>
    %574 = tpu.matmul %573, %9, %cst_101 {dimension_numbers = #tpu.dot_dimension_numbers<[1], [0], [0], [1], [0, 0, 1, 1], [], []>} : vector<8x32xf32>, vector<32x96xf32>, vector<8x96xf32> -> vector<8x96xf32>
    %575 = vector.broadcast %10 : vector<1x96xf32> to vector<8x96xf32>
    %576 = arith.addf %574, %575 : vector<8x96xf32>
    %cst_102 = arith.constant dense<0.000000e+00> : vector<8x96xf32>
    %577 = tpu.matmul %510, %11, %cst_102 {dimension_numbers = #tpu.dot_dimension_numbers<[1], [0], [0], [1], [0, 0, 1, 1], [], []>} : vector<8x32xf32>, vector<32x96xf32>, vector<8x96xf32> -> vector<8x96xf32>
    %578 = vector.broadcast %12 : vector<1x96xf32> to vector<8x96xf32>
    %579 = arith.addf %577, %578 : vector<8x96xf32>
    %580 = vector.extract_strided_slice %576 {offsets = [0, 0], sizes = [8, 16], strides = [1, 1]} : vector<8x96xf32> to vector<8x16xf32>
    %581 = vector.extract_strided_slice %579 {offsets = [0, 0], sizes = [8, 16], strides = [1, 1]} : vector<8x96xf32> to vector<8x16xf32>
    %582 = arith.addf %580, %581 : vector<8x16xf32>
    %583 = arith.negf %582 : vector<8x16xf32>
    %584 = math.exp %583 : vector<8x16xf32>
    %cst_103 = arith.constant 1.000000e+00 : f32
    %585 = vector.broadcast %cst_103 : f32 to vector<8x16xf32>
    %586 = arith.addf %585, %584 : vector<8x16xf32>
    %587 = arith.divf %585, %586 : vector<8x16xf32>
    %588 = vector.extract_strided_slice %576 {offsets = [0, 16], sizes = [8, 16], strides = [1, 1]} : vector<8x96xf32> to vector<8x16xf32>
    %589 = vector.extract_strided_slice %579 {offsets = [0, 16], sizes = [8, 16], strides = [1, 1]} : vector<8x96xf32> to vector<8x16xf32>
    %590 = arith.addf %588, %589 : vector<8x16xf32>
    %591 = arith.negf %590 : vector<8x16xf32>
    %592 = math.exp %591 : vector<8x16xf32>
    %cst_104 = arith.constant 1.000000e+00 : f32
    %593 = vector.broadcast %cst_104 : f32 to vector<8x16xf32>
    %594 = arith.addf %593, %592 : vector<8x16xf32>
    %595 = arith.divf %593, %594 : vector<8x16xf32>
    %596 = vector.extract_strided_slice %576 {offsets = [0, 32], sizes = [8, 16], strides = [1, 1]} : vector<8x96xf32> to vector<8x16xf32>
    %597 = vector.extract_strided_slice %579 {offsets = [0, 32], sizes = [8, 16], strides = [1, 1]} : vector<8x96xf32> to vector<8x16xf32>
    %598 = arith.mulf %587, %597 : vector<8x16xf32>
    %599 = arith.addf %596, %598 : vector<8x16xf32>
    %600 = math.tanh %599 : vector<8x16xf32>
    %601 = vector.extract_strided_slice %510 {offsets = [0, 0], sizes = [8, 16], strides = [1, 1]} : vector<8x32xf32> to vector<8x16xf32>
    %cst_105 = arith.constant 1.000000e+00 : f32
    %602 = vector.broadcast %cst_105 : f32 to vector<8x16xf32>
    %603 = arith.subf %602, %595 : vector<8x16xf32>
    %604 = arith.mulf %603, %600 : vector<8x16xf32>
    %605 = arith.mulf %595, %601 : vector<8x16xf32>
    %606 = arith.addf %604, %605 : vector<8x16xf32>
    %607 = vector.extract_strided_slice %576 {offsets = [0, 48], sizes = [8, 16], strides = [1, 1]} : vector<8x96xf32> to vector<8x16xf32>
    %608 = vector.extract_strided_slice %579 {offsets = [0, 48], sizes = [8, 16], strides = [1, 1]} : vector<8x96xf32> to vector<8x16xf32>
    %609 = arith.addf %607, %608 : vector<8x16xf32>
    %610 = arith.negf %609 : vector<8x16xf32>
    %611 = math.exp %610 : vector<8x16xf32>
    %cst_106 = arith.constant 1.000000e+00 : f32
    %612 = vector.broadcast %cst_106 : f32 to vector<8x16xf32>
    %613 = arith.addf %612, %611 : vector<8x16xf32>
    %614 = arith.divf %612, %613 : vector<8x16xf32>
    %615 = vector.extract_strided_slice %576 {offsets = [0, 64], sizes = [8, 16], strides = [1, 1]} : vector<8x96xf32> to vector<8x16xf32>
    %616 = vector.extract_strided_slice %579 {offsets = [0, 64], sizes = [8, 16], strides = [1, 1]} : vector<8x96xf32> to vector<8x16xf32>
    %617 = arith.addf %615, %616 : vector<8x16xf32>
    %618 = arith.negf %617 : vector<8x16xf32>
    %619 = math.exp %618 : vector<8x16xf32>
    %cst_107 = arith.constant 1.000000e+00 : f32
    %620 = vector.broadcast %cst_107 : f32 to vector<8x16xf32>
    %621 = arith.addf %620, %619 : vector<8x16xf32>
    %622 = arith.divf %620, %621 : vector<8x16xf32>
    %623 = vector.extract_strided_slice %576 {offsets = [0, 80], sizes = [8, 16], strides = [1, 1]} : vector<8x96xf32> to vector<8x16xf32>
    %624 = vector.extract_strided_slice %579 {offsets = [0, 80], sizes = [8, 16], strides = [1, 1]} : vector<8x96xf32> to vector<8x16xf32>
    %625 = arith.mulf %614, %624 : vector<8x16xf32>
    %626 = arith.addf %623, %625 : vector<8x16xf32>
    %627 = math.tanh %626 : vector<8x16xf32>
    %628 = vector.extract_strided_slice %510 {offsets = [0, 16], sizes = [8, 16], strides = [1, 1]} : vector<8x32xf32> to vector<8x16xf32>
    %cst_108 = arith.constant 1.000000e+00 : f32
    %629 = vector.broadcast %cst_108 : f32 to vector<8x16xf32>
    %630 = arith.subf %629, %622 : vector<8x16xf32>
    %631 = arith.mulf %630, %627 : vector<8x16xf32>
    %632 = arith.mulf %622, %628 : vector<8x16xf32>
    %633 = arith.addf %631, %632 : vector<8x16xf32>
    %634 = tpu.concatenate %606, %633 in 1 : vector<8x16xf32>, vector<8x16xf32> -> vector<8x32xf32>
    %c40_109 = arith.constant 40 : index
    %c0_110 = arith.constant 0 : index
    %635 = vector.load %arg14[%c40_109, %c0_110] : memref<64x96xf32, #tpu.memory_space<vmem>>, vector<8x96xf32>
    %636 = vector.extract_strided_slice %635 {offsets = [0, 0], sizes = [8, 48], strides = [1, 1]} : vector<8x96xf32> to vector<8x48xf32>
    %c16_111 = arith.constant 16 : index
    %c0_112 = arith.constant 0 : index
    %637 = vector.load %arg14[%c16_111, %c0_112] : memref<64x96xf32, #tpu.memory_space<vmem>>, vector<8x96xf32>
    %638 = vector.extract_strided_slice %637 {offsets = [0, 48], sizes = [8, 48], strides = [1, 1]} : vector<8x96xf32> to vector<8x48xf32>
    %639 = tpu.concatenate %636, %638 in 1 : vector<8x48xf32>, vector<8x48xf32> -> vector<8x96xf32>
    %cst_113 = arith.constant dense<0.000000e+00> : vector<8x96xf32>
    %640 = tpu.matmul %573, %7, %cst_113 {dimension_numbers = #tpu.dot_dimension_numbers<[1], [0], [0], [1], [0, 0, 1, 1], [], []>} : vector<8x32xf32>, vector<32x96xf32>, vector<8x96xf32> -> vector<8x96xf32>
    %641 = vector.broadcast %8 : vector<1x96xf32> to vector<8x96xf32>
    %642 = arith.addf %640, %641 : vector<8x96xf32>
    %643 = vector.extract_strided_slice %639 {offsets = [0, 0], sizes = [8, 16], strides = [1, 1]} : vector<8x96xf32> to vector<8x16xf32>
    %644 = vector.extract_strided_slice %642 {offsets = [0, 0], sizes = [8, 16], strides = [1, 1]} : vector<8x96xf32> to vector<8x16xf32>
    %645 = arith.addf %643, %644 : vector<8x16xf32>
    %646 = arith.negf %645 : vector<8x16xf32>
    %647 = math.exp %646 : vector<8x16xf32>
    %cst_114 = arith.constant 1.000000e+00 : f32
    %648 = vector.broadcast %cst_114 : f32 to vector<8x16xf32>
    %649 = arith.addf %648, %647 : vector<8x16xf32>
    %650 = arith.divf %648, %649 : vector<8x16xf32>
    %651 = vector.extract_strided_slice %639 {offsets = [0, 16], sizes = [8, 16], strides = [1, 1]} : vector<8x96xf32> to vector<8x16xf32>
    %652 = vector.extract_strided_slice %642 {offsets = [0, 16], sizes = [8, 16], strides = [1, 1]} : vector<8x96xf32> to vector<8x16xf32>
    %653 = arith.addf %651, %652 : vector<8x16xf32>
    %654 = arith.negf %653 : vector<8x16xf32>
    %655 = math.exp %654 : vector<8x16xf32>
    %cst_115 = arith.constant 1.000000e+00 : f32
    %656 = vector.broadcast %cst_115 : f32 to vector<8x16xf32>
    %657 = arith.addf %656, %655 : vector<8x16xf32>
    %658 = arith.divf %656, %657 : vector<8x16xf32>
    %659 = vector.extract_strided_slice %639 {offsets = [0, 32], sizes = [8, 16], strides = [1, 1]} : vector<8x96xf32> to vector<8x16xf32>
    %660 = vector.extract_strided_slice %642 {offsets = [0, 32], sizes = [8, 16], strides = [1, 1]} : vector<8x96xf32> to vector<8x16xf32>
    %661 = arith.mulf %650, %660 : vector<8x16xf32>
    %662 = arith.addf %659, %661 : vector<8x16xf32>
    %663 = math.tanh %662 : vector<8x16xf32>
    %664 = vector.extract_strided_slice %573 {offsets = [0, 0], sizes = [8, 16], strides = [1, 1]} : vector<8x32xf32> to vector<8x16xf32>
    %cst_116 = arith.constant 1.000000e+00 : f32
    %665 = vector.broadcast %cst_116 : f32 to vector<8x16xf32>
    %666 = arith.subf %665, %658 : vector<8x16xf32>
    %667 = arith.mulf %666, %663 : vector<8x16xf32>
    %668 = arith.mulf %658, %664 : vector<8x16xf32>
    %669 = arith.addf %667, %668 : vector<8x16xf32>
    %670 = vector.extract_strided_slice %639 {offsets = [0, 48], sizes = [8, 16], strides = [1, 1]} : vector<8x96xf32> to vector<8x16xf32>
    %671 = vector.extract_strided_slice %642 {offsets = [0, 48], sizes = [8, 16], strides = [1, 1]} : vector<8x96xf32> to vector<8x16xf32>
    %672 = arith.addf %670, %671 : vector<8x16xf32>
    %673 = arith.negf %672 : vector<8x16xf32>
    %674 = math.exp %673 : vector<8x16xf32>
    %cst_117 = arith.constant 1.000000e+00 : f32
    %675 = vector.broadcast %cst_117 : f32 to vector<8x16xf32>
    %676 = arith.addf %675, %674 : vector<8x16xf32>
    %677 = arith.divf %675, %676 : vector<8x16xf32>
    %678 = vector.extract_strided_slice %639 {offsets = [0, 64], sizes = [8, 16], strides = [1, 1]} : vector<8x96xf32> to vector<8x16xf32>
    %679 = vector.extract_strided_slice %642 {offsets = [0, 64], sizes = [8, 16], strides = [1, 1]} : vector<8x96xf32> to vector<8x16xf32>
    %680 = arith.addf %678, %679 : vector<8x16xf32>
    %681 = arith.negf %680 : vector<8x16xf32>
    %682 = math.exp %681 : vector<8x16xf32>
    %cst_118 = arith.constant 1.000000e+00 : f32
    %683 = vector.broadcast %cst_118 : f32 to vector<8x16xf32>
    %684 = arith.addf %683, %682 : vector<8x16xf32>
    %685 = arith.divf %683, %684 : vector<8x16xf32>
    %686 = vector.extract_strided_slice %639 {offsets = [0, 80], sizes = [8, 16], strides = [1, 1]} : vector<8x96xf32> to vector<8x16xf32>
    %687 = vector.extract_strided_slice %642 {offsets = [0, 80], sizes = [8, 16], strides = [1, 1]} : vector<8x96xf32> to vector<8x16xf32>
    %688 = arith.mulf %677, %687 : vector<8x16xf32>
    %689 = arith.addf %686, %688 : vector<8x16xf32>
    %690 = math.tanh %689 : vector<8x16xf32>
    %691 = vector.extract_strided_slice %573 {offsets = [0, 16], sizes = [8, 16], strides = [1, 1]} : vector<8x32xf32> to vector<8x16xf32>
    %cst_119 = arith.constant 1.000000e+00 : f32
    %692 = vector.broadcast %cst_119 : f32 to vector<8x16xf32>
    %693 = arith.subf %692, %685 : vector<8x16xf32>
    %694 = arith.mulf %693, %690 : vector<8x16xf32>
    %695 = arith.mulf %685, %691 : vector<8x16xf32>
    %696 = arith.addf %694, %695 : vector<8x16xf32>
    %697 = tpu.concatenate %669, %696 in 1 : vector<8x16xf32>, vector<8x16xf32> -> vector<8x32xf32>
    %cst_120 = arith.constant dense<0.000000e+00> : vector<8x96xf32>
    %698 = tpu.matmul %697, %9, %cst_120 {dimension_numbers = #tpu.dot_dimension_numbers<[1], [0], [0], [1], [0, 0, 1, 1], [], []>} : vector<8x32xf32>, vector<32x96xf32>, vector<8x96xf32> -> vector<8x96xf32>
    %699 = vector.broadcast %10 : vector<1x96xf32> to vector<8x96xf32>
    %700 = arith.addf %698, %699 : vector<8x96xf32>
    %cst_121 = arith.constant dense<0.000000e+00> : vector<8x96xf32>
    %701 = tpu.matmul %634, %11, %cst_121 {dimension_numbers = #tpu.dot_dimension_numbers<[1], [0], [0], [1], [0, 0, 1, 1], [], []>} : vector<8x32xf32>, vector<32x96xf32>, vector<8x96xf32> -> vector<8x96xf32>
    %702 = vector.broadcast %12 : vector<1x96xf32> to vector<8x96xf32>
    %703 = arith.addf %701, %702 : vector<8x96xf32>
    %704 = vector.extract_strided_slice %700 {offsets = [0, 0], sizes = [8, 16], strides = [1, 1]} : vector<8x96xf32> to vector<8x16xf32>
    %705 = vector.extract_strided_slice %703 {offsets = [0, 0], sizes = [8, 16], strides = [1, 1]} : vector<8x96xf32> to vector<8x16xf32>
    %706 = arith.addf %704, %705 : vector<8x16xf32>
    %707 = arith.negf %706 : vector<8x16xf32>
    %708 = math.exp %707 : vector<8x16xf32>
    %cst_122 = arith.constant 1.000000e+00 : f32
    %709 = vector.broadcast %cst_122 : f32 to vector<8x16xf32>
    %710 = arith.addf %709, %708 : vector<8x16xf32>
    %711 = arith.divf %709, %710 : vector<8x16xf32>
    %712 = vector.extract_strided_slice %700 {offsets = [0, 16], sizes = [8, 16], strides = [1, 1]} : vector<8x96xf32> to vector<8x16xf32>
    %713 = vector.extract_strided_slice %703 {offsets = [0, 16], sizes = [8, 16], strides = [1, 1]} : vector<8x96xf32> to vector<8x16xf32>
    %714 = arith.addf %712, %713 : vector<8x16xf32>
    %715 = arith.negf %714 : vector<8x16xf32>
    %716 = math.exp %715 : vector<8x16xf32>
    %cst_123 = arith.constant 1.000000e+00 : f32
    %717 = vector.broadcast %cst_123 : f32 to vector<8x16xf32>
    %718 = arith.addf %717, %716 : vector<8x16xf32>
    %719 = arith.divf %717, %718 : vector<8x16xf32>
    %720 = vector.extract_strided_slice %700 {offsets = [0, 32], sizes = [8, 16], strides = [1, 1]} : vector<8x96xf32> to vector<8x16xf32>
    %721 = vector.extract_strided_slice %703 {offsets = [0, 32], sizes = [8, 16], strides = [1, 1]} : vector<8x96xf32> to vector<8x16xf32>
    %722 = arith.mulf %711, %721 : vector<8x16xf32>
    %723 = arith.addf %720, %722 : vector<8x16xf32>
    %724 = math.tanh %723 : vector<8x16xf32>
    %725 = vector.extract_strided_slice %634 {offsets = [0, 0], sizes = [8, 16], strides = [1, 1]} : vector<8x32xf32> to vector<8x16xf32>
    %cst_124 = arith.constant 1.000000e+00 : f32
    %726 = vector.broadcast %cst_124 : f32 to vector<8x16xf32>
    %727 = arith.subf %726, %719 : vector<8x16xf32>
    %728 = arith.mulf %727, %724 : vector<8x16xf32>
    %729 = arith.mulf %719, %725 : vector<8x16xf32>
    %730 = arith.addf %728, %729 : vector<8x16xf32>
    %731 = vector.extract_strided_slice %700 {offsets = [0, 48], sizes = [8, 16], strides = [1, 1]} : vector<8x96xf32> to vector<8x16xf32>
    %732 = vector.extract_strided_slice %703 {offsets = [0, 48], sizes = [8, 16], strides = [1, 1]} : vector<8x96xf32> to vector<8x16xf32>
    %733 = arith.addf %731, %732 : vector<8x16xf32>
    %734 = arith.negf %733 : vector<8x16xf32>
    %735 = math.exp %734 : vector<8x16xf32>
    %cst_125 = arith.constant 1.000000e+00 : f32
    %736 = vector.broadcast %cst_125 : f32 to vector<8x16xf32>
    %737 = arith.addf %736, %735 : vector<8x16xf32>
    %738 = arith.divf %736, %737 : vector<8x16xf32>
    %739 = vector.extract_strided_slice %700 {offsets = [0, 64], sizes = [8, 16], strides = [1, 1]} : vector<8x96xf32> to vector<8x16xf32>
    %740 = vector.extract_strided_slice %703 {offsets = [0, 64], sizes = [8, 16], strides = [1, 1]} : vector<8x96xf32> to vector<8x16xf32>
    %741 = arith.addf %739, %740 : vector<8x16xf32>
    %742 = arith.negf %741 : vector<8x16xf32>
    %743 = math.exp %742 : vector<8x16xf32>
    %cst_126 = arith.constant 1.000000e+00 : f32
    %744 = vector.broadcast %cst_126 : f32 to vector<8x16xf32>
    %745 = arith.addf %744, %743 : vector<8x16xf32>
    %746 = arith.divf %744, %745 : vector<8x16xf32>
    %747 = vector.extract_strided_slice %700 {offsets = [0, 80], sizes = [8, 16], strides = [1, 1]} : vector<8x96xf32> to vector<8x16xf32>
    %748 = vector.extract_strided_slice %703 {offsets = [0, 80], sizes = [8, 16], strides = [1, 1]} : vector<8x96xf32> to vector<8x16xf32>
    %749 = arith.mulf %738, %748 : vector<8x16xf32>
    %750 = arith.addf %747, %749 : vector<8x16xf32>
    %751 = math.tanh %750 : vector<8x16xf32>
    %752 = vector.extract_strided_slice %634 {offsets = [0, 16], sizes = [8, 16], strides = [1, 1]} : vector<8x32xf32> to vector<8x16xf32>
    %cst_127 = arith.constant 1.000000e+00 : f32
    %753 = vector.broadcast %cst_127 : f32 to vector<8x16xf32>
    %754 = arith.subf %753, %746 : vector<8x16xf32>
    %755 = arith.mulf %754, %751 : vector<8x16xf32>
    %756 = arith.mulf %746, %752 : vector<8x16xf32>
    %757 = arith.addf %755, %756 : vector<8x16xf32>
    %758 = tpu.concatenate %730, %757 in 1 : vector<8x16xf32>, vector<8x16xf32> -> vector<8x32xf32>
    %c48_128 = arith.constant 48 : index
    %c0_129 = arith.constant 0 : index
    %759 = vector.load %arg14[%c48_128, %c0_129] : memref<64x96xf32, #tpu.memory_space<vmem>>, vector<8x96xf32>
    %760 = vector.extract_strided_slice %759 {offsets = [0, 0], sizes = [8, 48], strides = [1, 1]} : vector<8x96xf32> to vector<8x48xf32>
    %c8_130 = arith.constant 8 : index
    %c0_131 = arith.constant 0 : index
    %761 = vector.load %arg14[%c8_130, %c0_131] : memref<64x96xf32, #tpu.memory_space<vmem>>, vector<8x96xf32>
    %762 = vector.extract_strided_slice %761 {offsets = [0, 48], sizes = [8, 48], strides = [1, 1]} : vector<8x96xf32> to vector<8x48xf32>
    %763 = tpu.concatenate %760, %762 in 1 : vector<8x48xf32>, vector<8x48xf32> -> vector<8x96xf32>
    %cst_132 = arith.constant dense<0.000000e+00> : vector<8x96xf32>
    %764 = tpu.matmul %697, %7, %cst_132 {dimension_numbers = #tpu.dot_dimension_numbers<[1], [0], [0], [1], [0, 0, 1, 1], [], []>} : vector<8x32xf32>, vector<32x96xf32>, vector<8x96xf32> -> vector<8x96xf32>
    %765 = vector.broadcast %8 : vector<1x96xf32> to vector<8x96xf32>
    %766 = arith.addf %764, %765 : vector<8x96xf32>
    %767 = vector.extract_strided_slice %763 {offsets = [0, 0], sizes = [8, 16], strides = [1, 1]} : vector<8x96xf32> to vector<8x16xf32>
    %768 = vector.extract_strided_slice %766 {offsets = [0, 0], sizes = [8, 16], strides = [1, 1]} : vector<8x96xf32> to vector<8x16xf32>
    %769 = arith.addf %767, %768 : vector<8x16xf32>
    %770 = arith.negf %769 : vector<8x16xf32>
    %771 = math.exp %770 : vector<8x16xf32>
    %cst_133 = arith.constant 1.000000e+00 : f32
    %772 = vector.broadcast %cst_133 : f32 to vector<8x16xf32>
    %773 = arith.addf %772, %771 : vector<8x16xf32>
    %774 = arith.divf %772, %773 : vector<8x16xf32>
    %775 = vector.extract_strided_slice %763 {offsets = [0, 16], sizes = [8, 16], strides = [1, 1]} : vector<8x96xf32> to vector<8x16xf32>
    %776 = vector.extract_strided_slice %766 {offsets = [0, 16], sizes = [8, 16], strides = [1, 1]} : vector<8x96xf32> to vector<8x16xf32>
    %777 = arith.addf %775, %776 : vector<8x16xf32>
    %778 = arith.negf %777 : vector<8x16xf32>
    %779 = math.exp %778 : vector<8x16xf32>
    %cst_134 = arith.constant 1.000000e+00 : f32
    %780 = vector.broadcast %cst_134 : f32 to vector<8x16xf32>
    %781 = arith.addf %780, %779 : vector<8x16xf32>
    %782 = arith.divf %780, %781 : vector<8x16xf32>
    %783 = vector.extract_strided_slice %763 {offsets = [0, 32], sizes = [8, 16], strides = [1, 1]} : vector<8x96xf32> to vector<8x16xf32>
    %784 = vector.extract_strided_slice %766 {offsets = [0, 32], sizes = [8, 16], strides = [1, 1]} : vector<8x96xf32> to vector<8x16xf32>
    %785 = arith.mulf %774, %784 : vector<8x16xf32>
    %786 = arith.addf %783, %785 : vector<8x16xf32>
    %787 = math.tanh %786 : vector<8x16xf32>
    %788 = vector.extract_strided_slice %697 {offsets = [0, 0], sizes = [8, 16], strides = [1, 1]} : vector<8x32xf32> to vector<8x16xf32>
    %cst_135 = arith.constant 1.000000e+00 : f32
    %789 = vector.broadcast %cst_135 : f32 to vector<8x16xf32>
    %790 = arith.subf %789, %782 : vector<8x16xf32>
    %791 = arith.mulf %790, %787 : vector<8x16xf32>
    %792 = arith.mulf %782, %788 : vector<8x16xf32>
    %793 = arith.addf %791, %792 : vector<8x16xf32>
    %794 = vector.extract_strided_slice %763 {offsets = [0, 48], sizes = [8, 16], strides = [1, 1]} : vector<8x96xf32> to vector<8x16xf32>
    %795 = vector.extract_strided_slice %766 {offsets = [0, 48], sizes = [8, 16], strides = [1, 1]} : vector<8x96xf32> to vector<8x16xf32>
    %796 = arith.addf %794, %795 : vector<8x16xf32>
    %797 = arith.negf %796 : vector<8x16xf32>
    %798 = math.exp %797 : vector<8x16xf32>
    %cst_136 = arith.constant 1.000000e+00 : f32
    %799 = vector.broadcast %cst_136 : f32 to vector<8x16xf32>
    %800 = arith.addf %799, %798 : vector<8x16xf32>
    %801 = arith.divf %799, %800 : vector<8x16xf32>
    %802 = vector.extract_strided_slice %763 {offsets = [0, 64], sizes = [8, 16], strides = [1, 1]} : vector<8x96xf32> to vector<8x16xf32>
    %803 = vector.extract_strided_slice %766 {offsets = [0, 64], sizes = [8, 16], strides = [1, 1]} : vector<8x96xf32> to vector<8x16xf32>
    %804 = arith.addf %802, %803 : vector<8x16xf32>
    %805 = arith.negf %804 : vector<8x16xf32>
    %806 = math.exp %805 : vector<8x16xf32>
    %cst_137 = arith.constant 1.000000e+00 : f32
    %807 = vector.broadcast %cst_137 : f32 to vector<8x16xf32>
    %808 = arith.addf %807, %806 : vector<8x16xf32>
    %809 = arith.divf %807, %808 : vector<8x16xf32>
    %810 = vector.extract_strided_slice %763 {offsets = [0, 80], sizes = [8, 16], strides = [1, 1]} : vector<8x96xf32> to vector<8x16xf32>
    %811 = vector.extract_strided_slice %766 {offsets = [0, 80], sizes = [8, 16], strides = [1, 1]} : vector<8x96xf32> to vector<8x16xf32>
    %812 = arith.mulf %801, %811 : vector<8x16xf32>
    %813 = arith.addf %810, %812 : vector<8x16xf32>
    %814 = math.tanh %813 : vector<8x16xf32>
    %815 = vector.extract_strided_slice %697 {offsets = [0, 16], sizes = [8, 16], strides = [1, 1]} : vector<8x32xf32> to vector<8x16xf32>
    %cst_138 = arith.constant 1.000000e+00 : f32
    %816 = vector.broadcast %cst_138 : f32 to vector<8x16xf32>
    %817 = arith.subf %816, %809 : vector<8x16xf32>
    %818 = arith.mulf %817, %814 : vector<8x16xf32>
    %819 = arith.mulf %809, %815 : vector<8x16xf32>
    %820 = arith.addf %818, %819 : vector<8x16xf32>
    %821 = tpu.concatenate %793, %820 in 1 : vector<8x16xf32>, vector<8x16xf32> -> vector<8x32xf32>
    %cst_139 = arith.constant dense<0.000000e+00> : vector<8x96xf32>
    %822 = tpu.matmul %821, %9, %cst_139 {dimension_numbers = #tpu.dot_dimension_numbers<[1], [0], [0], [1], [0, 0, 1, 1], [], []>} : vector<8x32xf32>, vector<32x96xf32>, vector<8x96xf32> -> vector<8x96xf32>
    %823 = vector.broadcast %10 : vector<1x96xf32> to vector<8x96xf32>
    %824 = arith.addf %822, %823 : vector<8x96xf32>
    %cst_140 = arith.constant dense<0.000000e+00> : vector<8x96xf32>
    %825 = tpu.matmul %758, %11, %cst_140 {dimension_numbers = #tpu.dot_dimension_numbers<[1], [0], [0], [1], [0, 0, 1, 1], [], []>} : vector<8x32xf32>, vector<32x96xf32>, vector<8x96xf32> -> vector<8x96xf32>
    %826 = vector.broadcast %12 : vector<1x96xf32> to vector<8x96xf32>
    %827 = arith.addf %825, %826 : vector<8x96xf32>
    %828 = vector.extract_strided_slice %824 {offsets = [0, 0], sizes = [8, 16], strides = [1, 1]} : vector<8x96xf32> to vector<8x16xf32>
    %829 = vector.extract_strided_slice %827 {offsets = [0, 0], sizes = [8, 16], strides = [1, 1]} : vector<8x96xf32> to vector<8x16xf32>
    %830 = arith.addf %828, %829 : vector<8x16xf32>
    %831 = arith.negf %830 : vector<8x16xf32>
    %832 = math.exp %831 : vector<8x16xf32>
    %cst_141 = arith.constant 1.000000e+00 : f32
    %833 = vector.broadcast %cst_141 : f32 to vector<8x16xf32>
    %834 = arith.addf %833, %832 : vector<8x16xf32>
    %835 = arith.divf %833, %834 : vector<8x16xf32>
    %836 = vector.extract_strided_slice %824 {offsets = [0, 16], sizes = [8, 16], strides = [1, 1]} : vector<8x96xf32> to vector<8x16xf32>
    %837 = vector.extract_strided_slice %827 {offsets = [0, 16], sizes = [8, 16], strides = [1, 1]} : vector<8x96xf32> to vector<8x16xf32>
    %838 = arith.addf %836, %837 : vector<8x16xf32>
    %839 = arith.negf %838 : vector<8x16xf32>
    %840 = math.exp %839 : vector<8x16xf32>
    %cst_142 = arith.constant 1.000000e+00 : f32
    %841 = vector.broadcast %cst_142 : f32 to vector<8x16xf32>
    %842 = arith.addf %841, %840 : vector<8x16xf32>
    %843 = arith.divf %841, %842 : vector<8x16xf32>
    %844 = vector.extract_strided_slice %824 {offsets = [0, 32], sizes = [8, 16], strides = [1, 1]} : vector<8x96xf32> to vector<8x16xf32>
    %845 = vector.extract_strided_slice %827 {offsets = [0, 32], sizes = [8, 16], strides = [1, 1]} : vector<8x96xf32> to vector<8x16xf32>
    %846 = arith.mulf %835, %845 : vector<8x16xf32>
    %847 = arith.addf %844, %846 : vector<8x16xf32>
    %848 = math.tanh %847 : vector<8x16xf32>
    %849 = vector.extract_strided_slice %758 {offsets = [0, 0], sizes = [8, 16], strides = [1, 1]} : vector<8x32xf32> to vector<8x16xf32>
    %cst_143 = arith.constant 1.000000e+00 : f32
    %850 = vector.broadcast %cst_143 : f32 to vector<8x16xf32>
    %851 = arith.subf %850, %843 : vector<8x16xf32>
    %852 = arith.mulf %851, %848 : vector<8x16xf32>
    %853 = arith.mulf %843, %849 : vector<8x16xf32>
    %854 = arith.addf %852, %853 : vector<8x16xf32>
    %855 = vector.extract_strided_slice %824 {offsets = [0, 48], sizes = [8, 16], strides = [1, 1]} : vector<8x96xf32> to vector<8x16xf32>
    %856 = vector.extract_strided_slice %827 {offsets = [0, 48], sizes = [8, 16], strides = [1, 1]} : vector<8x96xf32> to vector<8x16xf32>
    %857 = arith.addf %855, %856 : vector<8x16xf32>
    %858 = arith.negf %857 : vector<8x16xf32>
    %859 = math.exp %858 : vector<8x16xf32>
    %cst_144 = arith.constant 1.000000e+00 : f32
    %860 = vector.broadcast %cst_144 : f32 to vector<8x16xf32>
    %861 = arith.addf %860, %859 : vector<8x16xf32>
    %862 = arith.divf %860, %861 : vector<8x16xf32>
    %863 = vector.extract_strided_slice %824 {offsets = [0, 64], sizes = [8, 16], strides = [1, 1]} : vector<8x96xf32> to vector<8x16xf32>
    %864 = vector.extract_strided_slice %827 {offsets = [0, 64], sizes = [8, 16], strides = [1, 1]} : vector<8x96xf32> to vector<8x16xf32>
    %865 = arith.addf %863, %864 : vector<8x16xf32>
    %866 = arith.negf %865 : vector<8x16xf32>
    %867 = math.exp %866 : vector<8x16xf32>
    %cst_145 = arith.constant 1.000000e+00 : f32
    %868 = vector.broadcast %cst_145 : f32 to vector<8x16xf32>
    %869 = arith.addf %868, %867 : vector<8x16xf32>
    %870 = arith.divf %868, %869 : vector<8x16xf32>
    %871 = vector.extract_strided_slice %824 {offsets = [0, 80], sizes = [8, 16], strides = [1, 1]} : vector<8x96xf32> to vector<8x16xf32>
    %872 = vector.extract_strided_slice %827 {offsets = [0, 80], sizes = [8, 16], strides = [1, 1]} : vector<8x96xf32> to vector<8x16xf32>
    %873 = arith.mulf %862, %872 : vector<8x16xf32>
    %874 = arith.addf %871, %873 : vector<8x16xf32>
    %875 = math.tanh %874 : vector<8x16xf32>
    %876 = vector.extract_strided_slice %758 {offsets = [0, 16], sizes = [8, 16], strides = [1, 1]} : vector<8x32xf32> to vector<8x16xf32>
    %cst_146 = arith.constant 1.000000e+00 : f32
    %877 = vector.broadcast %cst_146 : f32 to vector<8x16xf32>
    %878 = arith.subf %877, %870 : vector<8x16xf32>
    %879 = arith.mulf %878, %875 : vector<8x16xf32>
    %880 = arith.mulf %870, %876 : vector<8x16xf32>
    %881 = arith.addf %879, %880 : vector<8x16xf32>
    %882 = tpu.concatenate %854, %881 in 1 : vector<8x16xf32>, vector<8x16xf32> -> vector<8x32xf32>
    %c56_147 = arith.constant 56 : index
    %c0_148 = arith.constant 0 : index
    %883 = vector.load %arg14[%c56_147, %c0_148] : memref<64x96xf32, #tpu.memory_space<vmem>>, vector<8x96xf32>
    %884 = vector.extract_strided_slice %883 {offsets = [0, 0], sizes = [8, 48], strides = [1, 1]} : vector<8x96xf32> to vector<8x48xf32>
    %c0_149 = arith.constant 0 : index
    %c0_150 = arith.constant 0 : index
    %885 = vector.load %arg14[%c0_149, %c0_150] : memref<64x96xf32, #tpu.memory_space<vmem>>, vector<8x96xf32>
    %886 = vector.extract_strided_slice %885 {offsets = [0, 48], sizes = [8, 48], strides = [1, 1]} : vector<8x96xf32> to vector<8x48xf32>
    %887 = tpu.concatenate %884, %886 in 1 : vector<8x48xf32>, vector<8x48xf32> -> vector<8x96xf32>
    %cst_151 = arith.constant dense<0.000000e+00> : vector<8x96xf32>
    %888 = tpu.matmul %821, %7, %cst_151 {dimension_numbers = #tpu.dot_dimension_numbers<[1], [0], [0], [1], [0, 0, 1, 1], [], []>} : vector<8x32xf32>, vector<32x96xf32>, vector<8x96xf32> -> vector<8x96xf32>
    %889 = vector.broadcast %8 : vector<1x96xf32> to vector<8x96xf32>
    %890 = arith.addf %888, %889 : vector<8x96xf32>
    %891 = vector.extract_strided_slice %887 {offsets = [0, 0], sizes = [8, 16], strides = [1, 1]} : vector<8x96xf32> to vector<8x16xf32>
    %892 = vector.extract_strided_slice %890 {offsets = [0, 0], sizes = [8, 16], strides = [1, 1]} : vector<8x96xf32> to vector<8x16xf32>
    %893 = arith.addf %891, %892 : vector<8x16xf32>
    %894 = arith.negf %893 : vector<8x16xf32>
    %895 = math.exp %894 : vector<8x16xf32>
    %cst_152 = arith.constant 1.000000e+00 : f32
    %896 = vector.broadcast %cst_152 : f32 to vector<8x16xf32>
    %897 = arith.addf %896, %895 : vector<8x16xf32>
    %898 = arith.divf %896, %897 : vector<8x16xf32>
    %899 = vector.extract_strided_slice %887 {offsets = [0, 16], sizes = [8, 16], strides = [1, 1]} : vector<8x96xf32> to vector<8x16xf32>
    %900 = vector.extract_strided_slice %890 {offsets = [0, 16], sizes = [8, 16], strides = [1, 1]} : vector<8x96xf32> to vector<8x16xf32>
    %901 = arith.addf %899, %900 : vector<8x16xf32>
    %902 = arith.negf %901 : vector<8x16xf32>
    %903 = math.exp %902 : vector<8x16xf32>
    %cst_153 = arith.constant 1.000000e+00 : f32
    %904 = vector.broadcast %cst_153 : f32 to vector<8x16xf32>
    %905 = arith.addf %904, %903 : vector<8x16xf32>
    %906 = arith.divf %904, %905 : vector<8x16xf32>
    %907 = vector.extract_strided_slice %887 {offsets = [0, 32], sizes = [8, 16], strides = [1, 1]} : vector<8x96xf32> to vector<8x16xf32>
    %908 = vector.extract_strided_slice %890 {offsets = [0, 32], sizes = [8, 16], strides = [1, 1]} : vector<8x96xf32> to vector<8x16xf32>
    %909 = arith.mulf %898, %908 : vector<8x16xf32>
    %910 = arith.addf %907, %909 : vector<8x16xf32>
    %911 = math.tanh %910 : vector<8x16xf32>
    %912 = vector.extract_strided_slice %821 {offsets = [0, 0], sizes = [8, 16], strides = [1, 1]} : vector<8x32xf32> to vector<8x16xf32>
    %cst_154 = arith.constant 1.000000e+00 : f32
    %913 = vector.broadcast %cst_154 : f32 to vector<8x16xf32>
    %914 = arith.subf %913, %906 : vector<8x16xf32>
    %915 = arith.mulf %914, %911 : vector<8x16xf32>
    %916 = arith.mulf %906, %912 : vector<8x16xf32>
    %917 = arith.addf %915, %916 : vector<8x16xf32>
    %918 = vector.extract_strided_slice %887 {offsets = [0, 48], sizes = [8, 16], strides = [1, 1]} : vector<8x96xf32> to vector<8x16xf32>
    %919 = vector.extract_strided_slice %890 {offsets = [0, 48], sizes = [8, 16], strides = [1, 1]} : vector<8x96xf32> to vector<8x16xf32>
    %920 = arith.addf %918, %919 : vector<8x16xf32>
    %921 = arith.negf %920 : vector<8x16xf32>
    %922 = math.exp %921 : vector<8x16xf32>
    %cst_155 = arith.constant 1.000000e+00 : f32
    %923 = vector.broadcast %cst_155 : f32 to vector<8x16xf32>
    %924 = arith.addf %923, %922 : vector<8x16xf32>
    %925 = arith.divf %923, %924 : vector<8x16xf32>
    %926 = vector.extract_strided_slice %887 {offsets = [0, 64], sizes = [8, 16], strides = [1, 1]} : vector<8x96xf32> to vector<8x16xf32>
    %927 = vector.extract_strided_slice %890 {offsets = [0, 64], sizes = [8, 16], strides = [1, 1]} : vector<8x96xf32> to vector<8x16xf32>
    %928 = arith.addf %926, %927 : vector<8x16xf32>
    %929 = arith.negf %928 : vector<8x16xf32>
    %930 = math.exp %929 : vector<8x16xf32>
    %cst_156 = arith.constant 1.000000e+00 : f32
    %931 = vector.broadcast %cst_156 : f32 to vector<8x16xf32>
    %932 = arith.addf %931, %930 : vector<8x16xf32>
    %933 = arith.divf %931, %932 : vector<8x16xf32>
    %934 = vector.extract_strided_slice %887 {offsets = [0, 80], sizes = [8, 16], strides = [1, 1]} : vector<8x96xf32> to vector<8x16xf32>
    %935 = vector.extract_strided_slice %890 {offsets = [0, 80], sizes = [8, 16], strides = [1, 1]} : vector<8x96xf32> to vector<8x16xf32>
    %936 = arith.mulf %925, %935 : vector<8x16xf32>
    %937 = arith.addf %934, %936 : vector<8x16xf32>
    %938 = math.tanh %937 : vector<8x16xf32>
    %939 = vector.extract_strided_slice %821 {offsets = [0, 16], sizes = [8, 16], strides = [1, 1]} : vector<8x32xf32> to vector<8x16xf32>
    %cst_157 = arith.constant 1.000000e+00 : f32
    %940 = vector.broadcast %cst_157 : f32 to vector<8x16xf32>
    %941 = arith.subf %940, %933 : vector<8x16xf32>
    %942 = arith.mulf %941, %938 : vector<8x16xf32>
    %943 = arith.mulf %933, %939 : vector<8x16xf32>
    %944 = arith.addf %942, %943 : vector<8x16xf32>
    %945 = tpu.concatenate %917, %944 in 1 : vector<8x16xf32>, vector<8x16xf32> -> vector<8x32xf32>
    %cst_158 = arith.constant dense<0.000000e+00> : vector<8x96xf32>
    %946 = tpu.matmul %945, %9, %cst_158 {dimension_numbers = #tpu.dot_dimension_numbers<[1], [0], [0], [1], [0, 0, 1, 1], [], []>} : vector<8x32xf32>, vector<32x96xf32>, vector<8x96xf32> -> vector<8x96xf32>
    %947 = vector.broadcast %10 : vector<1x96xf32> to vector<8x96xf32>
    %948 = arith.addf %946, %947 : vector<8x96xf32>
    %cst_159 = arith.constant dense<0.000000e+00> : vector<8x96xf32>
    %949 = tpu.matmul %882, %11, %cst_159 {dimension_numbers = #tpu.dot_dimension_numbers<[1], [0], [0], [1], [0, 0, 1, 1], [], []>} : vector<8x32xf32>, vector<32x96xf32>, vector<8x96xf32> -> vector<8x96xf32>
    %950 = vector.broadcast %12 : vector<1x96xf32> to vector<8x96xf32>
    %951 = arith.addf %949, %950 : vector<8x96xf32>
    %952 = vector.extract_strided_slice %948 {offsets = [0, 0], sizes = [8, 16], strides = [1, 1]} : vector<8x96xf32> to vector<8x16xf32>
    %953 = vector.extract_strided_slice %951 {offsets = [0, 0], sizes = [8, 16], strides = [1, 1]} : vector<8x96xf32> to vector<8x16xf32>
    %954 = arith.addf %952, %953 : vector<8x16xf32>
    %955 = arith.negf %954 : vector<8x16xf32>
    %956 = math.exp %955 : vector<8x16xf32>
    %cst_160 = arith.constant 1.000000e+00 : f32
    %957 = vector.broadcast %cst_160 : f32 to vector<8x16xf32>
    %958 = arith.addf %957, %956 : vector<8x16xf32>
    %959 = arith.divf %957, %958 : vector<8x16xf32>
    %960 = vector.extract_strided_slice %948 {offsets = [0, 16], sizes = [8, 16], strides = [1, 1]} : vector<8x96xf32> to vector<8x16xf32>
    %961 = vector.extract_strided_slice %951 {offsets = [0, 16], sizes = [8, 16], strides = [1, 1]} : vector<8x96xf32> to vector<8x16xf32>
    %962 = arith.addf %960, %961 : vector<8x16xf32>
    %963 = arith.negf %962 : vector<8x16xf32>
    %964 = math.exp %963 : vector<8x16xf32>
    %cst_161 = arith.constant 1.000000e+00 : f32
    %965 = vector.broadcast %cst_161 : f32 to vector<8x16xf32>
    %966 = arith.addf %965, %964 : vector<8x16xf32>
    %967 = arith.divf %965, %966 : vector<8x16xf32>
    %968 = vector.extract_strided_slice %948 {offsets = [0, 32], sizes = [8, 16], strides = [1, 1]} : vector<8x96xf32> to vector<8x16xf32>
    %969 = vector.extract_strided_slice %951 {offsets = [0, 32], sizes = [8, 16], strides = [1, 1]} : vector<8x96xf32> to vector<8x16xf32>
    %970 = arith.mulf %959, %969 : vector<8x16xf32>
    %971 = arith.addf %968, %970 : vector<8x16xf32>
    %972 = math.tanh %971 : vector<8x16xf32>
    %973 = vector.extract_strided_slice %882 {offsets = [0, 0], sizes = [8, 16], strides = [1, 1]} : vector<8x32xf32> to vector<8x16xf32>
    %cst_162 = arith.constant 1.000000e+00 : f32
    %974 = vector.broadcast %cst_162 : f32 to vector<8x16xf32>
    %975 = arith.subf %974, %967 : vector<8x16xf32>
    %976 = arith.mulf %975, %972 : vector<8x16xf32>
    %977 = arith.mulf %967, %973 : vector<8x16xf32>
    %978 = arith.addf %976, %977 : vector<8x16xf32>
    %979 = vector.extract_strided_slice %948 {offsets = [0, 48], sizes = [8, 16], strides = [1, 1]} : vector<8x96xf32> to vector<8x16xf32>
    %980 = vector.extract_strided_slice %951 {offsets = [0, 48], sizes = [8, 16], strides = [1, 1]} : vector<8x96xf32> to vector<8x16xf32>
    %981 = arith.addf %979, %980 : vector<8x16xf32>
    %982 = arith.negf %981 : vector<8x16xf32>
    %983 = math.exp %982 : vector<8x16xf32>
    %cst_163 = arith.constant 1.000000e+00 : f32
    %984 = vector.broadcast %cst_163 : f32 to vector<8x16xf32>
    %985 = arith.addf %984, %983 : vector<8x16xf32>
    %986 = arith.divf %984, %985 : vector<8x16xf32>
    %987 = vector.extract_strided_slice %948 {offsets = [0, 64], sizes = [8, 16], strides = [1, 1]} : vector<8x96xf32> to vector<8x16xf32>
    %988 = vector.extract_strided_slice %951 {offsets = [0, 64], sizes = [8, 16], strides = [1, 1]} : vector<8x96xf32> to vector<8x16xf32>
    %989 = arith.addf %987, %988 : vector<8x16xf32>
    %990 = arith.negf %989 : vector<8x16xf32>
    %991 = math.exp %990 : vector<8x16xf32>
    %cst_164 = arith.constant 1.000000e+00 : f32
    %992 = vector.broadcast %cst_164 : f32 to vector<8x16xf32>
    %993 = arith.addf %992, %991 : vector<8x16xf32>
    %994 = arith.divf %992, %993 : vector<8x16xf32>
    %995 = vector.extract_strided_slice %948 {offsets = [0, 80], sizes = [8, 16], strides = [1, 1]} : vector<8x96xf32> to vector<8x16xf32>
    %996 = vector.extract_strided_slice %951 {offsets = [0, 80], sizes = [8, 16], strides = [1, 1]} : vector<8x96xf32> to vector<8x16xf32>
    %997 = arith.mulf %986, %996 : vector<8x16xf32>
    %998 = arith.addf %995, %997 : vector<8x16xf32>
    %999 = math.tanh %998 : vector<8x16xf32>
    %1000 = vector.extract_strided_slice %882 {offsets = [0, 16], sizes = [8, 16], strides = [1, 1]} : vector<8x32xf32> to vector<8x16xf32>
    %cst_165 = arith.constant 1.000000e+00 : f32
    %1001 = vector.broadcast %cst_165 : f32 to vector<8x16xf32>
    %1002 = arith.subf %1001, %994 : vector<8x16xf32>
    %1003 = arith.mulf %1002, %999 : vector<8x16xf32>
    %1004 = arith.mulf %994, %1000 : vector<8x16xf32>
    %1005 = arith.addf %1003, %1004 : vector<8x16xf32>
    %1006 = tpu.concatenate %978, %1005 in 1 : vector<8x16xf32>, vector<8x16xf32> -> vector<8x32xf32>
    %1007 = vector.extract_strided_slice %945 {offsets = [0, 0], sizes = [8, 16], strides = [1, 1]} : vector<8x32xf32> to vector<8x16xf32>
    %1008 = vector.extract_strided_slice %1006 {offsets = [0, 0], sizes = [8, 16], strides = [1, 1]} : vector<8x32xf32> to vector<8x16xf32>
    %1009 = vector.extract_strided_slice %945 {offsets = [0, 16], sizes = [8, 16], strides = [1, 1]} : vector<8x32xf32> to vector<8x16xf32>
    %1010 = vector.extract_strided_slice %1006 {offsets = [0, 16], sizes = [8, 16], strides = [1, 1]} : vector<8x32xf32> to vector<8x16xf32>
    %1011 = tpu.concatenate %1007, %1008, %1009, %1010 in 1 : vector<8x16xf32>, vector<8x16xf32>, vector<8x16xf32>, vector<8x16xf32> -> vector<8x64xf32>
    %c0_166 = arith.constant 0 : index
    %c0_167 = arith.constant 0 : index
    %1012 = vector.load %arg9[%c0_166, %c0_167] : memref<64x32xf32, #tpu.memory_space<vmem>>, vector<64x32xf32>
    %cst_168 = arith.constant dense<0.000000e+00> : vector<8x32xf32>
    %1013 = tpu.matmul %1011, %1012, %cst_168 {dimension_numbers = #tpu.dot_dimension_numbers<[1], [0], [0], [1], [0, 0, 1, 1], [], []>} : vector<8x64xf32>, vector<64x32xf32>, vector<8x32xf32> -> vector<8x32xf32>
    %c0_169 = arith.constant 0 : index
    %c0_170 = arith.constant 0 : index
    %1014 = vector.load %arg10[%c0_169, %c0_170] : memref<1x32xf32, #tpu.memory_space<vmem>>, vector<1x32xf32>
    %1015 = vector.broadcast %1014 : vector<1x32xf32> to vector<8x32xf32>
    %1016 = arith.addf %1013, %1015 : vector<8x32xf32>
    %cst_171 = arith.constant 0.000000e+00 : f32
    %1017 = vector.broadcast %cst_171 : f32 to vector<8x32xf32>
    %1018 = arith.cmpf oge, %1016, %1017 : vector<8x32xf32>
    %cst_172 = arith.constant 0.00999999977 : f32
    %1019 = vector.broadcast %cst_172 : f32 to vector<8x32xf32>
    %1020 = arith.mulf %1019, %1016 : vector<8x32xf32>
    %1021 = arith.select %1018, %1016, %1020 : vector<8x32xi1>, vector<8x32xf32>
    %c0_173 = arith.constant 0 : index
    %c0_174 = arith.constant 0 : index
    %1022 = vector.load %arg11[%c0_173, %c0_174] : memref<32x1xf32, #tpu.memory_space<vmem>>, vector<32x1xf32>
    %cst_175 = arith.constant dense<0.000000e+00> : vector<8x1xf32>
    %1023 = tpu.matmul %1021, %1022, %cst_175 {dimension_numbers = #tpu.dot_dimension_numbers<[1], [0], [0], [1], [0, 0, 1, 1], [], []>} : vector<8x32xf32>, vector<32x1xf32>, vector<8x1xf32> -> vector<8x1xf32>
    %c0_176 = arith.constant 0 : index
    %c0_177 = arith.constant 0 : index
    %1024 = vector.load %arg12[%c0_176, %c0_177] : memref<1x1xf32, #tpu.memory_space<vmem>>, vector<1x1xf32>
    %1025 = vector.broadcast %1024 : vector<1x1xf32> to vector<8x1xf32>
    %1026 = arith.addf %1023, %1025 : vector<8x1xf32>
    %1027 = arith.negf %1026 : vector<8x1xf32>
    %1028 = math.exp %1027 : vector<8x1xf32>
    %cst_178 = arith.constant 1.000000e+00 : f32
    %1029 = vector.broadcast %cst_178 : f32 to vector<8x1xf32>
    %1030 = arith.addf %1029, %1028 : vector<8x1xf32>
    %1031 = arith.divf %1029, %1030 : vector<8x1xf32>
    %c0_179 = arith.constant 0 : index
    %c0_180 = arith.constant 0 : index
    %1032 = vector.load %arg13[%c0_179, %c0_180] : memref<8x1xf32, #tpu.memory_space<vmem>>, vector<8x1xf32>
    tpu.vector_store %arg13[%c0_179, %c0_180], %1031 {strides = array<i32>} : memref<8x1xf32, #tpu.memory_space<vmem>>, vector<8x1xf32>,
    return
  }
}

</mosaic_0001>

<bundles_post_ra>
// kernel: tpu_custom_call.1
= control target key start
LH: loop header
LB: loop body
LE: loop exit
PB: predicated region body
PF: predicated region fallthrough
CT: control target
= control target key end

     0   :  { %vm62_vm0 = vcmask 64512   ;;  %v3632_v2 = vmov 0.0|0.0   ;;  %vm3633_vm1 = vmmov 0   ;;  %v3634_v4 = vmov 0.0   ;;  %s3636_s17 = smov 32   ;;  %s3639_s19 = smov 16   ;;  %s4278_s1 = inlined_call_operand.vmem [shape: f32[8,96], index: 1, kind: input, shape index: {}]   ;;  %s4279_s0 = inlined_call_operand.vmem [shape: f32[64,8], index: 0, kind: input, shape index: {}]   ;;  %s4280_s3 = inlined_call_operand.vmem [shape: f32[32,96], index: 3, kind: input, shape index: {}]   ;;  %s4281_s2 = inlined_call_operand.vmem [shape: f32[1,96], index: 2, kind: input, shape index: {}]   ;;  %s4282_s4 = inlined_call_operand.vmem [shape: f32[1,96], index: 4, kind: input, shape index: {}]   ;;  %s4283_s7 = inlined_call_operand.vmem [shape: f32[32,96], index: 7, kind: input, shape index: {}]   ;;  %s4284_s5 = inlined_call_operand.vmem [shape: f32[32,96], index: 5, kind: input, shape index: {}]   ;;  %s4285_s8 = inlined_call_operand.vmem [shape: f32[1,96], index: 8, kind: input, shape index: {}]   ;;  %s4286_s6 = inlined_call_operand.vmem [shape: f32[1,96], index: 6, kind: input, shape index: {}]   ;;  %s4287_s9 = inlined_call_operand.vmem [shape: f32[64,32], index: 9, kind: input, shape index: {}]   ;;  %s4288_s11 = inlined_call_operand.vmem [shape: f32[32,1], index: 11, kind: input, shape index: {}]   ;;  %s4289_s12 = inlined_call_operand.<no memory space> [shape: f32[1,1], index: 12, kind: input, shape index: {}]   ;;  %s4290_s10 = inlined_call_operand.vmem [shape: f32[1,32], index: 10, kind: input, shape index: {}]   ;;  %s4291_s13 = inlined_call_operand.vmem [shape: f32[8,1], index: 13, kind: output, shape index: {}]  }
   0x1   :  { %v54_v0 = vld [vmem:[%s4278_s1] sm:$0xff]  ;;  %3358 = vmatprep.subr.bf16.mxu1 %v3632_v2  ;;  %v47_v3 = vld [vmem:[%s4279_s0 + $0x8] sm:$0xff]  ;;  %3072 = vmatprep.mubr.msk.f32.mxu1 %vm3633_vm1, %v3634_v4  ;;  %v48_v7 = vld [vmem:[%s4279_s0 + $0x10] sm:$0xff]  ;;  %vm192_vm2 = vcmask 785408   ;;  %vm218_vm3 = vcmask 392192   ;;  %vm333_vm4 = vcmask 130048  }
   0x2   :  { %v46_v1 = vld [vmem:[%s4279_s0] sm:$0xff]  ;;  %3050 = vmatprep.subr.mxu0 %v54_v0  ;;  %v202_v6 = vld [vmem:[%s4280_s3 + $0x8] sm:$0xff]  ;;  %v203_v9 = vld [vmem:[%s4280_s3 + $0x10] sm:$0xff]  ;;  %vm226_vm5 = vcmask 261120   ;;  %s3640_s20 = smov 48   ;;  %vm2679_vm6 = vcmask 523264  }
   0x3   :  { %3052 = vmatprep.mubr.msk.f32.mxu0 %vm62_vm0, %v46_v1  ;;  %v201_v5 = vld [vmem:[%s4280_s3] sm:$0xff]  ;;  %3051 = vmatpush3.msra.mxu0 %v54_v0  ;;  %v204_v10 = vld [vmem:[%s4280_s3 + $0x18] sm:$0xff]  ;;  %v51_v14 = vld [vmem:[%s4279_s0 + $0x28] sm:$0xff]  ;;  %vm2846_vm8 = vcmask 7168  }
   0x4   :  { %v3733_v8 = vpack.c.bf16 %v202_v6, %v201_v5  ;;  %3053 = vmatmul.mubr.msk.f32.vlgmr.msra.gmra.mrb[0].mxu0 %vm62_vm0, %v47_v3  ;;  %3370 = vmatprep.subr.bf16.mxu0 %v3632_v2  ;;  %v49_v11 = vld [vmem:[%s4279_s0 + $0x18] sm:$0xff]  ;;  %v3748_v12 = vpack.c.bf16 %v204_v10, %v203_v9  ;;  %v50_v13 = vld [vmem:[%s4279_s0 + $0x20] sm:$0xff]  ;;  %v52_v15 = vld [vmem:[%s4279_s0 + $0x30] sm:$0xff] }
   0x5   :  { %3055 = vmatprep.mubr.msk.f32.mxu0 %vm62_vm0, %v48_v7  ;;  %v53_v16 = vld [vmem:[%s4279_s0 + $0x38] sm:$0xff]  ;;  %v2852_v17 = vld [vmem:[%s4281_s2] ss:$0 sm:$0xff]  ;;  %s3635_s2 = smov 96   ;;  %v212_v61 = vld [vmem:[%s4283_s7 + $0x8] sm:$0xff] }
   0x6   :  { %3360 = vmatpush3.bf16.msra.mxu1 %v3733_v8  ;;  %v3783_v25 = vld [vmem:[%s4282_s4] ss:$0 sm:$0xff]  ;;  %v213_v62 = vld [vmem:[%s4283_s7 + $0x10] sm:$0xff]  ;;  %v214_v0 = vld [vmem:[%s4283_s7 + $0x18] sm:$0xff] }
   0x7   :  { %3361 = vmatprep.subr.bf16.mxu1 %v3632_v2  ;;  %v211_v60 = vld [vmem:[%s4283_s7] sm:$0xff]  ;;  %v207_v3 = vld [vmem:[%s4284_s5 + $0x8] sm:$0xff]  ;;  %v208_v6 = vld [vmem:[%s4284_s5 + $0x10] sm:$0xff]  ;;  %v3854_v9 = vpack.c.bf16 %v214_v0, %v213_v62  ;;  %s3637_s7 = smov 112  }
   0x8   :  { %3056 = vmatmul.mubr.msk.f32.gmra.mrb[2].mxu0 %vm62_vm0, %v49_v11  ;;  %v3834_v63 = vpack.c.bf16 %v212_v61, %v211_v60  ;;  %v206_v1 = vld [vmem:[%s4284_s5] sm:$0xff]  ;;  %v209_v7 = vld [vmem:[%s4284_s5 + $0x18] sm:$0xff]  ;;  %s3638_s5 = smov 80  }
   0x9   :  { %3058 = vmatprep.mubr.msk.f32.mxu0 %vm62_vm0, %v50_v13  ;;  %v3845_v5 = vpack.c.bf16 %v207_v3, %v206_v1  ;;  %v3858_v10 = vpack.c.bf16 %v209_v7, %v208_v6 }
   0xa   :  { %3363 = vmatpush3.bf16.msra.mxu1 %v3748_v12  ;;  %3372 = vmatpush3.bf16.msra.mxu0 %v3834_v63 }
   0xb   :  { %3364 = vmatprep.subr.bf16.mxu1 %v3632_v2  ;;  %3373 = vmatprep.subr.bf16.mxu0 %v3632_v2 }
   0xc   :  { %3059 = vmatmul.mubr.msk.f32.gmra.mrb[4].mxu0 %vm62_vm0, %v51_v14 }
   0xd   :  { %3073 = vmatmul.mubr.f32.vlgmr.msra.gmra.mrb[0].mxu1 %v3634_v4  ;;  %3061 = vmatprep.mubr.msk.f32.mxu0 %vm62_vm0, %v52_v15 }
   0xe   :  { %3083 = vmatprep.mubr.msk.f32.mxu1 %vm3633_vm1, %v3634_v4  ;;  %3366 = vmatpush3.bf16.msra.mxu1 %v3845_v5 }
   0xf   :  { %3367 = vmatprep.subr.bf16.mxu1 %v3632_v2  ;;  %3375 = vmatpush3.bf16.msra.mxu0 %v3854_v9 }
  0x10   :  { %3062 = vmatmul.mubr.msk.f32.gmra.mrb[6].mxu0 %vm62_vm0, %v53_v16  ;;  %3382 = vmatprep.subr.bf16.mxu0 %v3632_v2 }
  0x11   :  { %3094 = vmatprep.mubr.msk.f32.mxu0 %vm3633_vm1, %v3634_v4 }
  0x12   :  { %3369 = vmatpush3.bf16.msra.mxu1 %v3858_v10 }
  0x13   :  { %3376 = vmatprep.subr.bf16.mxu1 %v3632_v2 }
  0x14   :  { %3095 = vmatmul.mubr.f32.vlgmr.msra.gmra.mrb[8].mxu0 %v3634_v4 }
  0x15   :  { %3384 = vmatpush3.bf16.msra.mxu0 %v3845_v5  ;;  %3116 = vmatprep.mubr.msk.f32.mxu0 %vm3633_vm1, %v3634_v4 }
  0x16   :  { %3385 = vmatprep.subr.bf16.mxu0 %v3632_v2 }
  0x19   :  { %3387 = vmatpush3.bf16.msra.mxu0 %v3858_v10 }
  0x1a   :  { %3394 = vmatprep.subr.bf16.mxu0 %v3632_v2 }
  0xd7   :  { %v3054_v18 = vpop.f32.mrb[0].mxu0 }
  0xd8   :  { %v159_v19 = vadd.f32 %v3054_v18, %v2852_v17  ;;  %v153_v20 = vpop.f32.mrb[1].mxu0  ;;  %v3878_v18 = vld [vmem:[%s4285_s8] ss:$0 sm:$0xff] }
  0xd9   :  { %v154_v21 = vadd.f32 %v2852_v17, %v153_v20 }
  0xda   :  { %194 = vst.msk [vmem:[#allocation2 + $0x8] sm:$0xff] %vm192_vm2, %v159_v19 }
  0xdb   :  { %193 = vst.msk [vmem:[#allocation2] sm:$0xff] %vm192_vm2, %v154_v21  ;;  %v3057_v22 = vpop.f32.mrb[2].mxu0 }
  0xdc   :  { %v169_v23 = vadd.f32 %v3057_v22, %v2852_v17  ;;  %v163_v24 = vpop.f32.mrb[3].mxu0 }
  0xdd   :  { %v164_v26 = vadd.f32 %v2852_v17, %v163_v24 }
  0xde   :  { %196 = vst.msk [vmem:[#allocation2 + $0x18] sm:$0xff] %vm192_vm2, %v169_v23 }
  0xdf   :  { %195 = vst.msk [vmem:[#allocation2 + $0x10] sm:$0xff] %vm192_vm2, %v164_v26  ;;  %v3060_v28 = vpop.f32.mrb[4].mxu0  ;;  %v3900_v26 = vld [vmem:[%s4286_s6] ss:$0 sm:$0xff] }
  0xe0   :  { %v296_v27 = vpop.f32.mrb[0].mxu1  ;;  %v179_v31 = vadd.f32 %v3060_v28, %v2852_v17  ;;  %v173_v32 = vpop.f32.mrb[5].mxu0 }
  0xe1   :  { %v297_v29 = vadd.f32 %v3783_v25, %v296_v27  ;;  %v3074_v30 = vpop.f32.mrb[1].mxu1  ;;  %v174_v33 = vadd.f32 %v2852_v17, %v173_v32  ;;  %v3811_v44 = vld [vmem:[#allocation2 + $0x8] sm:$0xff] }
  0xe2   :  { %198 = vst.msk [vmem:[#allocation2 + $0x28] sm:$0xff] %vm192_vm2, %v179_v31  ;;  %v216_v45 = vld [vmem:[#allocation2] sm:$0xff] }
  0xe3   :  { %308 = vrot.lane.b32.xlu0 %v297_v29, %s3635_s2  ;;  %197 = vst.msk [vmem:[#allocation2 + $0x20] sm:$0xff] %vm192_vm2, %v174_v33  ;;  %v3063_v34 = vpop.f32.mrb[6].mxu0 }
  0xe4   :  { %v189_v35 = vadd.f32 %v3063_v34, %v2852_v17  ;;  %v183_v36 = vpop.f32.mrb[7].mxu0 }
  0xe5   :  { %v184_v37 = vadd.f32 %v2852_v17, %v183_v36  ;;  %v3795_v39 = vld [vmem:[#allocation2 + $0x18] sm:$0xff] }
  0xe6   :  { %200 = vst.msk [vmem:[#allocation2 + $0x38] sm:$0xff] %vm192_vm2, %v189_v35  ;;  %v3793_v38 = vld [vmem:[#allocation2 + $0x10] sm:$0xff] }
  0xe7   :  { %199 = vst.msk [vmem:[#allocation2 + $0x30] sm:$0xff] %vm192_vm2, %v184_v37  ;;  %v486_v19 = vpop.f32.mrb[8].mxu0 }
  0xe8   :  { %v487_v20 = vadd.f32 %v3878_v18, %v486_v19  ;;  %v3096_v21 = vpop.f32.mrb[9].mxu0 }
  0xe9   :  { %v3797_v40 = vld [vmem:[#allocation2 + $0x28] sm:$0xff] }
  0xea   :  { %v3799_v41 = vld [vmem:[#allocation2 + $0x20] sm:$0xff]  ;;  %v3804_v42 = vsel %vm218_vm3, %v3797_v40, %v3793_v38 }
  0xeb   :  { %v3809_v43 = vsel %vm218_vm3, %v3799_v41, %v3795_v39 }
  0xed   :  { %v217_v46 = vld [vmem:[#allocation2 + $0x38] sm:$0xff] }
  0xee   :  { %v3813_v47 = vld [vmem:[#allocation2 + $0x30] sm:$0xff]  ;;  %v3816_v48 = vsel %vm218_vm3, %v217_v46, %v216_v45  ;;  %v219_v50 = vsel %vm218_vm3, %v216_v45, %v217_v46 }
  0xef   :  { %v3821_v49 = vsel %vm218_vm3, %v3813_v47, %v3811_v44  ;;  %v300_v51 = vadd.f32 %v297_v29, %v219_v50 }
  0xf1   :  { %v2862_v52 = vmul.f32 -1.442695, %v300_v51 }
  0xf3   :  { %3529 = vpow2.f32 %v2862_v52 }
  0xfd   :  { %v3530_v53 = vpop.eup %3529 }
  0xfe   :  { %v304_v54 = vadd.f32 1.0, %v3530_v53 }
 0x100   :  { %3531 = vrcp.f32 %v304_v54 }
 0x10a   :  { %v3532_v55 = vpop.eup %3531 }
 0x10b   :  { %v318_v13 = vsub.f32 1.0, %v3532_v55  ;;  %v324_v15 = vmul.f32 0.0, %v3532_v55 }
 0x155   :  { %v309_v56 = vpop.permute.xlu0 %308 }
 0x156   :  { %v311_v57 = vmul.f32 %v3532_v55, %v309_v56 }
 0x158   :  { %313 = vrot.lane.b32.xlu0 %v311_v57, %s3636_s17 }
 0x1ca   :  { %v314_v58 = vpop.permute.xlu0 %313 }
 0x1cb   :  { %v316_v59 = vadd.f32 %v314_v58, %v219_v50  ;;  %v526_v50 = vsel %vm218_vm3, %v3811_v44, %v3813_v47 }
 0x1cd   :  { %3533 = vtanh.f32 %v316_v59 }
 0x1d7   :  { %v3534_v11 = vpop.eup %3533 }
 0x1d8   :  { %320 = vrot.lane.b32.xlu1 %v3534_v11, %s3637_s7 }
 0x24a   :  { %v321_v14 = vpop.permute.xlu1 %320 }
 0x24b   :  { %v323_v16 = vmul.f32 %v321_v14, %v318_v13 }
 0x24d   :  { %v325_v17 = vadd.f32 %v324_v15, %v323_v16 }
 0x24f   :  { %330 = vrot.lane.b32.xlu0 %v325_v17, %s3638_s5  ;;  %327 = vrot.lane.b32.xlu1 %v325_v17, %s3637_s7 }
 0x253   :  { %498 = vrot.lane.b32.xlu0 %v487_v20, %s3635_s2 }
 0x2c1   :  { %v331_v22 = vpop.permute.xlu0 %330  ;;  %v328_v23 = vpop.permute.xlu1 %327 }
 0x2c2   :  { %v334_v24 = vsel %vm333_vm4, %v328_v23, %v331_v22 }
 0x2c3   :  { %3084 = vmatmul.mubr.msk.f32.vlgmr.msra.gmra.mrb[2].mxu1 %vm226_vm5, %v334_v24 }
 0x2c4   :  { %3378 = vmatpush3.bf16.msra.mxu1 %v3733_v8  ;;  %3105 = vmatprep.mubr.msk.f32.mxu1 %vm3633_vm1, %v3634_v4 }
 0x2c5   :  { %3379 = vmatprep.subr.bf16.mxu1 %v3632_v2  ;;  %v499_v37 = vpop.permute.xlu0 %498 }
 0x2c8   :  { %3381 = vmatpush3.bf16.msra.mxu1 %v3748_v12 }
 0x2c9   :  { %3388 = vmatprep.subr.bf16.mxu1 %v3632_v2 }
 0x2cb   :  { %3106 = vmatmul.mubr.msk.f32.vlgmr.msra.gmra.mrb[4].mxu1 %vm226_vm5, %v334_v24 }
 0x2cc   :  { %3390 = vmatpush3.bf16.msra.mxu1 %v3834_v63  ;;  %3127 = vmatprep.mubr.msk.f32.mxu1 %vm3633_vm1, %v3634_v4 }
 0x2cd   :  { %3391 = vmatprep.subr.bf16.mxu1 %v3632_v2 }
 0x2d0   :  { %3393 = vmatpush3.bf16.msra.mxu1 %v3854_v9 }
 0x2d1   :  { %3400 = vmatprep.subr.bf16.mxu1 %v3632_v2 }
 0x396   :  { %v410_v27 = vpop.f32.mrb[2].mxu1 }
 0x397   :  { %v411_v28 = vadd.f32 %v3900_v26, %v410_v27  ;;  %v3085_v29 = vpop.f32.mrb[3].mxu1 }
 0x399   :  { %v490_v30 = vadd.f32 %v487_v20, %v411_v28 }
 0x39b   :  { %v2866_v31 = vmul.f32 -1.442695, %v490_v30 }
 0x39d   :  { %3535 = vpow2.f32 %v2866_v31 }
 0x39e   :  { %v593_v32 = vpop.f32.mrb[4].mxu1 }
 0x39f   :  { %v594_v33 = vadd.f32 %v3783_v25, %v593_v32  ;;  %v3107_v34 = vpop.f32.mrb[5].mxu1 }
 0x3a1   :  { %605 = vrot.lane.b32.xlu1 %v594_v33, %s3635_s2  ;;  %v597_v51 = vadd.f32 %v594_v33, %v526_v50 }
 0x3a3   :  { %v2868_v52 = vmul.f32 -1.442695, %v597_v51 }
 0x3a7   :  { %v3536_v35 = vpop.eup %3535 }
 0x3a8   :  { %v494_v36 = vadd.f32 1.0, %v3536_v35 }
 0x3aa   :  { %3537 = vrcp.f32 %v494_v36 }
 0x3ab   :  { %3539 = vpow2.f32 %v2868_v52 }
 0x3b4   :  { %v3538_v45 = vpop.eup %3537 }
 0x3b5   :  { %v501_v46 = vmul.f32 %v3538_v45, %v499_v37  ;;  %v3540_v53 = vpop.eup %3539  ;;  %v508_v7 = vsub.f32 1.0, %v3538_v45  ;;  %v514_v16 = vmul.f32 0.0, %v3538_v45 }
 0x3b6   :  { %v601_v54 = vadd.f32 1.0, %v3540_v53 }
 0x3b7   :  { %503 = vrot.lane.b32.xlu0 %v501_v46, %s3636_s17  ;;  %v831_v46 = vsel %vm218_vm3, %v3793_v38, %v3797_v40 }
 0x3b8   :  { %3541 = vrcp.f32 %v601_v54 }
 0x3bb   :  { %621 = vrot.lane.b32.xlu0 %v334_v24, %s3639_s19 }
 0x3c2   :  { %v3542_v55 = vpop.eup %3541 }
 0x3c3   :  { %v615_v0 = vsub.f32 1.0, %v3542_v55 }
 0x413   :  { %v606_v56 = vpop.permute.xlu1 %605 }
 0x414   :  { %v608_v57 = vmul.f32 %v3542_v55, %v606_v56 }
 0x416   :  { %610 = vrot.lane.b32.xlu1 %v608_v57, %s3636_s17 }
 0x429   :  { %v504_v58 = vpop.permute.xlu0 %503 }
 0x42a   :  { %v506_v59 = vadd.f32 %v504_v58, %v411_v28 }
 0x42c   :  { %3543 = vtanh.f32 %v506_v59 }
 0x42d   :  { %v622_v47 = vpop.permute.xlu0 %621 }
 0x42e   :  { %v624_v6 = vmul.f32 %v3542_v55, %v622_v47 }
 0x436   :  { %v3544_v60 = vpop.eup %3543 }
 0x437   :  { %510 = vrot.lane.b32.xlu0 %v3544_v60, %s3637_s7 }
 0x488   :  { %v611_v61 = vpop.permute.xlu1 %610 }
 0x489   :  { %v613_v62 = vadd.f32 %v611_v61, %v526_v50 }
 0x48b   :  { %3545 = vtanh.f32 %v613_v62 }
 0x495   :  { %v3546_v44 = vpop.eup %3545 }
 0x496   :  { %617 = vrot.lane.b32.xlu1 %v3546_v44, %s3637_s7 }
 0x49a   :  { %626 = vrot.lane.b32.xlu1 %v334_v24, %s3640_s20 }
 0x4a9   :  { %v511_v1 = vpop.permute.xlu0 %510 }
 0x4aa   :  { %v513_v13 = vmul.f32 %v511_v1, %v508_v7 }
 0x4ac   :  { %v515_v19 = vadd.f32 %v514_v16, %v513_v13 }
 0x508   :  { %v618_v3 = vpop.permute.xlu1 %617 }
 0x509   :  { %v620_v11 = vmul.f32 %v618_v3, %v615_v0 }
 0x50b   :  { %v625_v14 = vadd.f32 %v624_v6, %v620_v11 }
 0x50c   :  { %v627_v15 = vpop.permute.xlu1 %626 }
 0x50d   :  { %v629_v17 = vmul.f32 %v3542_v55, %v627_v15  ;;  %632 = vrot.lane.b32.xlu1 %v625_v14, %s3637_s7 }
 0x50f   :  { %v630_v20 = vadd.f32 %v629_v17, %v620_v11 }
 0x511   :  { %517 = vrot.lane.b32.xlu1 %v515_v19, %s3637_s7  ;;  %636 = vrot.lane.b32.xlu0 %v630_v20, %s3638_s5 }
 0x515   :  { %520 = vrot.lane.b32.xlu0 %v515_v19, %s3638_s5 }
 0x57f   :  { %v633_v21 = vpop.permute.xlu1 %632 }
 0x583   :  { %v637_v22 = vpop.permute.xlu0 %636  ;;  %v518_v24 = vpop.permute.xlu1 %517 }
 0x584   :  { %v3919_v23 = vsel %vm333_vm4, %v633_v21, %v637_v22 }
 0x585   :  { %3117 = vmatmul.mubr.msk.f32.vlgmr.msra.gmra.mrb[10].mxu0 %vm226_vm5, %v3919_v23 }
 0x586   :  { %3396 = vmatpush3.bf16.msra.mxu0 %v3733_v8  ;;  %3138 = vmatprep.mubr.msk.f32.mxu0 %vm3633_vm1, %v3634_v4 }
 0x587   :  { %v521_v27 = vpop.permute.xlu0 %520  ;;  %3397 = vmatprep.subr.bf16.mxu0 %v3632_v2 }
 0x588   :  { %v523_v28 = vsel %vm333_vm4, %v518_v24, %v521_v27 }
 0x589   :  { %3128 = vmatmul.mubr.msk.f32.vlgmr.msra.gmra.mrb[6].mxu1 %vm226_vm5, %v523_v28 }
 0x58a   :  { %3399 = vmatpush3.bf16.msra.mxu0 %v3748_v12  ;;  %3402 = vmatpush3.bf16.msra.mxu1 %v3845_v5 }
 0x58b   :  { %3403 = vmatprep.subr.bf16.mxu1 %v3632_v2  ;;  %3406 = vmatprep.subr.bf16.mxu0 %v3632_v2 }
 0x58c   :  { %3149 = vmatprep.mubr.msk.f32.mxu1 %vm3633_vm1, %v3634_v4 }
 0x58d   :  { %3139 = vmatmul.mubr.msk.f32.vlgmr.msra.gmra.mrb[12].mxu0 %vm226_vm5, %v3919_v23 }
 0x58e   :  { %3405 = vmatpush3.bf16.msra.mxu1 %v3858_v10  ;;  %3408 = vmatpush3.bf16.msra.mxu0 %v3834_v63 }
 0x58f   :  { %3412 = vmatprep.subr.bf16.mxu1 %v3632_v2  ;;  %3409 = vmatprep.subr.bf16.mxu0 %v3632_v2 }
 0x590   :  { %3160 = vmatprep.mubr.msk.f32.mxu0 %vm3633_vm1, %v3634_v4 }
 0x592   :  { %3411 = vmatpush3.bf16.msra.mxu0 %v3854_v9 }
 0x593   :  { %3418 = vmatprep.subr.bf16.mxu0 %v3632_v2 }
 0x658   :  { %v709_v29 = vpop.f32.mrb[10].mxu0 }
 0x659   :  { %v3118_v30 = vpop.f32.mrb[11].mxu0  ;;  %v710_v37 = vadd.f32 %v3900_v26, %v709_v29 }
 0x65c   :  { %v782_v31 = vpop.f32.mrb[6].mxu1 }
 0x65d   :  { %v783_v32 = vadd.f32 %v3878_v18, %v782_v31  ;;  %v3129_v33 = vpop.f32.mrb[7].mxu1 }
 0x65f   :  { %794 = vrot.lane.b32.xlu0 %v783_v32, %s3635_s2  ;;  %v786_v45 = vadd.f32 %v783_v32, %v710_v37 }
 0x660   :  { %v898_v34 = vpop.f32.mrb[12].mxu0 }
 0x661   :  { %v899_v35 = vadd.f32 %v3783_v25, %v898_v34  ;;  %v3140_v36 = vpop.f32.mrb[13].mxu0  ;;  %v2871_v50 = vmul.f32 -1.442695, %v786_v45 }
 0x663   :  { %910 = vrot.lane.b32.xlu1 %v899_v35, %s3635_s2  ;;  %v902_v51 = vadd.f32 %v899_v35, %v831_v46  ;;  %3547 = vpow2.f32 %v2871_v50 }
 0x665   :  { %v2873_v52 = vmul.f32 -1.442695, %v902_v51 }
 0x667   :  { %3549 = vpow2.f32 %v2873_v52 }
 0x66d   :  { %v3548_v53 = vpop.eup %3547 }
 0x66e   :  { %v790_v54 = vadd.f32 1.0, %v3548_v53 }
 0x670   :  { %3551 = vrcp.f32 %v790_v54 }
 0x671   :  { %v3550_v55 = vpop.eup %3549 }
 0x672   :  { %v906_v56 = vadd.f32 1.0, %v3550_v55 }
 0x674   :  { %3553 = vrcp.f32 %v906_v56  ;;  %v1136_v56 = vsel %vm218_vm3, %v3795_v39, %v3799_v41 }
 0x67a   :  { %v3552_v57 = vpop.eup %3551 }
 0x67b   :  { %v804_v20 = vsub.f32 1.0, %v3552_v57 }
 0x67e   :  { %v3554_v60 = vpop.eup %3553 }
 0x67f   :  { %v920_v7 = vsub.f32 1.0, %v3554_v60 }
 0x6d1   :  { %v795_v58 = vpop.permute.xlu0 %794 }
 0x6d2   :  { %v797_v59 = vmul.f32 %v3552_v57, %v795_v58 }
 0x6d4   :  { %799 = vrot.lane.b32.xlu0 %v797_v59, %s3636_s17 }
 0x6d5   :  { %v911_v61 = vpop.permute.xlu1 %910 }
 0x6d6   :  { %v913_v62 = vmul.f32 %v3554_v60, %v911_v61 }
 0x6d8   :  { %915 = vrot.lane.b32.xlu1 %v913_v62, %s3636_s17  ;;  %926 = vrot.lane.b32.xlu0 %v3919_v23, %s3639_s19 }
 0x746   :  { %v800_v38 = vpop.permute.xlu0 %799 }
 0x747   :  { %v802_v40 = vadd.f32 %v800_v38, %v710_v37 }
 0x749   :  { %3555 = vtanh.f32 %v802_v40 }
 0x74a   :  { %v916_v44 = vpop.permute.xlu1 %915  ;;  %v927_v3 = vpop.permute.xlu0 %926 }
 0x74b   :  { %v918_v47 = vadd.f32 %v916_v44, %v831_v46  ;;  %v929_v13 = vmul.f32 %v3554_v60, %v927_v3 }
 0x74d   :  { %3557 = vtanh.f32 %v918_v47 }
 0x753   :  { %v3556_v0 = vpop.eup %3555 }
 0x754   :  { %806 = vrot.lane.b32.xlu0 %v3556_v0, %s3637_s7 }
 0x757   :  { %v3558_v1 = vpop.eup %3557 }
 0x758   :  { %922 = vrot.lane.b32.xlu1 %v3558_v1, %s3637_s7  ;;  %815 = vrot.lane.b32.xlu0 %v523_v28, %s3640_s20 }
 0x75c   :  { %931 = vrot.lane.b32.xlu1 %v3919_v23, %s3640_s20 }
 0x760   :  { %810 = vrot.lane.b32.xlu1 %v523_v28, %s3639_s19 }
 0x7c6   :  { %v807_v6 = vpop.permute.xlu0 %806 }
 0x7c7   :  { %v809_v27 = vmul.f32 %v807_v6, %v804_v20 }
 0x7ca   :  { %v923_v11 = vpop.permute.xlu1 %922  ;;  %v816_v16 = vpop.permute.xlu0 %815 }
 0x7cb   :  { %v925_v14 = vmul.f32 %v923_v11, %v920_v7  ;;  %v818_v21 = vmul.f32 %v3552_v57, %v816_v16 }
 0x7cd   :  { %v930_v15 = vadd.f32 %v929_v13, %v925_v14  ;;  %v819_v28 = vadd.f32 %v818_v21, %v809_v27 }
 0x7ce   :  { %v932_v17 = vpop.permute.xlu1 %931 }
 0x7cf   :  { %v934_v19 = vmul.f32 %v3554_v60, %v932_v17  ;;  %937 = vrot.lane.b32.xlu1 %v930_v15, %s3637_s7 }
 0x7d1   :  { %v935_v22 = vadd.f32 %v934_v19, %v925_v14 }
 0x7d2   :  { %v811_v24 = vpop.permute.xlu1 %810 }
 0x7d3   :  { %v813_v23 = vmul.f32 %v3552_v57, %v811_v24  ;;  %941 = vrot.lane.b32.xlu0 %v935_v22, %s3638_s5 }
 0x7d5   :  { %v814_v29 = vadd.f32 %v813_v23, %v809_v27 }
 0x7d7   :  { %821 = vrot.lane.b32.xlu1 %v814_v29, %s3637_s7  ;;  %825 = vrot.lane.b32.xlu0 %v819_v28, %s3638_s5 }
 0x841   :  { %v938_v30 = vpop.permute.xlu1 %937 }
 0x845   :  { %v942_v31 = vpop.permute.xlu0 %941 }
 0x846   :  { %v3968_v32 = vsel %vm333_vm4, %v938_v30, %v942_v31 }
 0x847   :  { %3150 = vmatmul.mubr.msk.f32.vlgmr.msra.gmra.mrb[8].mxu1 %vm226_vm5, %v3968_v32 }
 0x848   :  { %3414 = vmatpush3.bf16.msra.mxu1 %v3733_v8  ;;  %3171 = vmatprep.mubr.msk.f32.mxu1 %vm3633_vm1, %v3634_v4 }
 0x849   :  { %v822_v33 = vpop.permute.xlu1 %821  ;;  %v826_v34 = vpop.permute.xlu0 %825  ;;  %3415 = vmatprep.subr.bf16.mxu1 %v3632_v2 }
 0x84a   :  { %v828_v35 = vsel %vm333_vm4, %v822_v33, %v826_v34 }
 0x84b   :  { %3161 = vmatmul.mubr.msk.f32.vlgmr.msra.gmra.mrb[14].mxu0 %vm226_vm5, %v828_v35 }
 0x84c   :  { %3417 = vmatpush3.bf16.msra.mxu1 %v3748_v12  ;;  %3420 = vmatpush3.bf16.msra.mxu0 %v3845_v5 }
 0x84d   :  { %3424 = vmatprep.subr.bf16.mxu1 %v3632_v2  ;;  %3421 = vmatprep.subr.bf16.mxu0 %v3632_v2 }
 0x84e   :  { %3182 = vmatprep.mubr.msk.f32.mxu0 %vm3633_vm1, %v3634_v4 }
 0x84f   :  { %3172 = vmatmul.mubr.msk.f32.vlgmr.msra.gmra.mrb[10].mxu1 %vm226_vm5, %v3968_v32 }
 0x850   :  { %3426 = vmatpush3.bf16.msra.mxu1 %v3834_v63  ;;  %3193 = vmatprep.mubr.msk.f32.mxu1 %vm3633_vm1, %v3634_v4 }
 0x851   :  { %3427 = vmatprep.subr.bf16.mxu1 %v3632_v2  ;;  %3423 = vmatpush3.bf16.msra.mxu0 %v3858_v10 }
 0x852   :  { %3430 = vmatprep.subr.bf16.mxu0 %v3632_v2 }
 0x854   :  { %3429 = vmatpush3.bf16.msra.mxu1 %v3854_v9 }
 0x855   :  { %3436 = vmatprep.subr.bf16.mxu1 %v3632_v2 }
 0x91a   :  { %v1014_v36 = vpop.f32.mrb[8].mxu1 }
 0x91b   :  { %v3151_v37 = vpop.f32.mrb[9].mxu1  ;;  %v1015_v54 = vadd.f32 %v3900_v26, %v1014_v36 }
 0x91e   :  { %v1087_v45 = vpop.f32.mrb[14].mxu0 }
 0x91f   :  { %v1088_v46 = vadd.f32 %v3878_v18, %v1087_v45  ;;  %v3162_v50 = vpop.f32.mrb[15].mxu0 }
 0x921   :  { %1099 = vrot.lane.b32.xlu1 %v1088_v46, %s3635_s2  ;;  %v1091_v55 = vadd.f32 %v1088_v46, %v1015_v54 }
 0x922   :  { %v1203_v51 = vpop.f32.mrb[10].mxu1 }
 0x923   :  { %v1204_v52 = vadd.f32 %v3783_v25, %v1203_v51  ;;  %v3173_v53 = vpop.f32.mrb[11].mxu1  ;;  %v2876_v57 = vmul.f32 -1.442695, %v1091_v55 }
 0x925   :  { %1215 = vrot.lane.b32.xlu0 %v1204_v52, %s3635_s2  ;;  %v1207_v58 = vadd.f32 %v1204_v52, %v1136_v56  ;;  %3559 = vpow2.f32 %v2876_v57 }
 0x927   :  { %v2878_v59 = vmul.f32 -1.442695, %v1207_v58 }
 0x929   :  { %3561 = vpow2.f32 %v2878_v59 }
 0x92f   :  { %v3560_v60 = vpop.eup %3559 }
 0x930   :  { %v1095_v61 = vadd.f32 1.0, %v3560_v60 }
 0x932   :  { %3563 = vrcp.f32 %v1095_v61 }
 0x933   :  { %v3562_v62 = vpop.eup %3561 }
 0x934   :  { %v1211_v38 = vadd.f32 1.0, %v3562_v62 }
 0x936   :  { %3565 = vrcp.f32 %v1211_v38 }
 0x93c   :  { %v3564_v40 = vpop.eup %3563 }
 0x93d   :  { %v1109_v16 = vsub.f32 1.0, %v3564_v40 }
 0x940   :  { %v3566_v0 = vpop.eup %3565 }
 0x941   :  { %v1225_v27 = vsub.f32 1.0, %v3566_v0 }
 0x993   :  { %v1100_v44 = vpop.permute.xlu1 %1099 }
 0x994   :  { %v1102_v47 = vmul.f32 %v3564_v40, %v1100_v44 }
 0x996   :  { %1104 = vrot.lane.b32.xlu1 %v1102_v47, %s3636_s17 }
 0x997   :  { %v1216_v1 = vpop.permute.xlu0 %1215 }
 0x998   :  { %v1218_v3 = vmul.f32 %v3566_v0, %v1216_v1 }
 0x99a   :  { %1220 = vrot.lane.b32.xlu0 %v1218_v3, %s3636_s17  ;;  %1120 = vrot.lane.b32.xlu1 %v828_v35, %s3640_s20 }
 0x99e   :  { %1115 = vrot.lane.b32.xlu0 %v828_v35, %s3639_s19 }
 0xa08   :  { %v1105_v39 = vpop.permute.xlu1 %1104 }
 0xa09   :  { %v1107_v41 = vadd.f32 %v1105_v39, %v1015_v54 }
 0xa0b   :  { %3567 = vtanh.f32 %v1107_v41 }
 0xa0c   :  { %v1221_v6 = vpop.permute.xlu0 %1220  ;;  %v1121_v14 = vpop.permute.xlu1 %1120 }
 0xa0d   :  { %v1223_v7 = vadd.f32 %v1221_v6, %v1136_v56  ;;  %v1123_v19 = vmul.f32 %v3564_v40, %v1121_v14 }
 0xa0f   :  { %3569 = vtanh.f32 %v1223_v7 }
 0xa10   :  { %v1116_v15 = vpop.permute.xlu0 %1115 }
 0xa11   :  { %v1118_v20 = vmul.f32 %v3564_v40, %v1116_v15 }
 0xa15   :  { %v3568_v11 = vpop.eup %3567 }
 0xa16   :  { %1111 = vrot.lane.b32.xlu1 %v3568_v11, %s3637_s7 }
 0xa19   :  { %v3570_v13 = vpop.eup %3569 }
 0xa1a   :  { %1227 = vrot.lane.b32.xlu0 %v3570_v13, %s3637_s7  ;;  %1231 = vrot.lane.b32.xlu1 %v3968_v32, %s3639_s19 }
 0xa1e   :  { %1236 = vrot.lane.b32.xlu0 %v3968_v32, %s3640_s20 }
 0xa88   :  { %v1112_v17 = vpop.permute.xlu1 %1111 }
 0xa89   :  { %v1114_v21 = vmul.f32 %v1112_v17, %v1109_v16 }
 0xa8b   :  { %v1119_v22 = vadd.f32 %v1118_v20, %v1114_v21  ;;  %v1124_v24 = vadd.f32 %v1123_v19, %v1114_v21 }
 0xa8c   :  { %v1228_v23 = vpop.permute.xlu0 %1227  ;;  %v1232_v28 = vpop.permute.xlu1 %1231 }
 0xa8d   :  { %v1230_v29 = vmul.f32 %v1228_v23, %v1225_v27  ;;  %v1234_v30 = vmul.f32 %v3566_v0, %v1232_v28  ;;  %1130 = vrot.lane.b32.xlu0 %v1124_v24, %s3638_s5  ;;  %1126 = vrot.lane.b32.xlu1 %v1119_v22, %s3637_s7 }
 0xa8f   :  { %v1235_v31 = vadd.f32 %v1234_v30, %v1230_v29 }
 0xa90   :  { %v1237_v32 = vpop.permute.xlu0 %1236 }
 0xa91   :  { %v1239_v33 = vmul.f32 %v3566_v0, %v1237_v32  ;;  %1242 = vrot.lane.b32.xlu1 %v1235_v31, %s3637_s7 }
 0xa93   :  { %v1240_v34 = vadd.f32 %v1239_v33, %v1230_v29 }
 0xa95   :  { %1246 = vrot.lane.b32.xlu0 %v1240_v34, %s3638_s5 }
 0xaff   :  { %v1127_v35 = vpop.permute.xlu1 %1126  ;;  %v1131_v36 = vpop.permute.xlu0 %1130 }
 0xb00   :  { %v1133_v37 = vsel %vm333_vm4, %v1127_v35, %v1131_v36 }
 0xb01   :  { %3194 = vmatmul.mubr.msk.f32.vlgmr.msra.gmra.mrb[12].mxu1 %vm226_vm5, %v1133_v37 }
 0xb02   :  { %3438 = vmatpush3.bf16.msra.mxu1 %v3845_v5  ;;  %3215 = vmatprep.mubr.msk.f32.mxu1 %vm3633_vm1, %v3634_v4 }
 0xb03   :  { %3439 = vmatprep.subr.bf16.mxu1 %v3632_v2  ;;  %v1243_v45 = vpop.permute.xlu1 %1242 }
 0xb06   :  { %3441 = vmatpush3.bf16.msra.mxu1 %v3858_v10 }
 0xb07   :  { %v1247_v46 = vpop.permute.xlu0 %1246  ;;  %3448 = vmatprep.subr.bf16.mxu1 %v3632_v2 }
 0xb08   :  { %v1249_v50 = vsel %vm333_vm4, %v1243_v45, %v1247_v46 }
 0xb09   :  { %3183 = vmatmul.mubr.msk.f32.vlgmr.msra.gmra.mrb[16].mxu0 %vm226_vm5, %v1249_v50 }
 0xb0a   :  { %3432 = vmatpush3.bf16.msra.mxu0 %v3733_v8  ;;  %3204 = vmatprep.mubr.msk.f32.mxu0 %vm3633_vm1, %v3634_v4 }
 0xb0b   :  { %3433 = vmatprep.subr.bf16.mxu0 %v3632_v2 }
 0xb0e   :  { %3435 = vmatpush3.bf16.msra.mxu0 %v3748_v12 }
 0xb0f   :  { %3442 = vmatprep.subr.bf16.mxu0 %v3632_v2 }
 0xb11   :  { %3205 = vmatmul.mubr.msk.f32.vlgmr.msra.gmra.mrb[18].mxu0 %vm226_vm5, %v1249_v50 }
 0xb12   :  { %3444 = vmatpush3.bf16.msra.mxu0 %v3834_v63  ;;  %3226 = vmatprep.mubr.msk.f32.mxu0 %vm3633_vm1, %v3634_v4 }
 0xb13   :  { %3445 = vmatprep.subr.bf16.mxu0 %v3632_v2 }
 0xb16   :  { %3447 = vmatpush3.bf16.msra.mxu0 %v3854_v9 }
 0xb17   :  { %3454 = vmatprep.subr.bf16.mxu0 %v3632_v2 }
 0xbd4   :  { %v1392_v51 = vpop.f32.mrb[12].mxu1 }
 0xbd5   :  { %v1393_v52 = vadd.f32 %v3878_v18, %v1392_v51  ;;  %v3195_v53 = vpop.f32.mrb[13].mxu1 }
 0xbd7   :  { %1404 = vrot.lane.b32.xlu1 %v1393_v52, %s3635_s2 }
 0xbdc   :  { %v1319_v54 = vpop.f32.mrb[16].mxu0 }
 0xbdd   :  { %v3184_v55 = vpop.f32.mrb[17].mxu0  ;;  %v1320_v59 = vadd.f32 %v3900_v26, %v1319_v54 }
 0xbdf   :  { %v1396_v60 = vadd.f32 %v1393_v52, %v1320_v59 }
 0xbe1   :  { %v2881_v61 = vmul.f32 -1.442695, %v1396_v60 }
 0xbe3   :  { %3571 = vpow2.f32 %v2881_v61 }
 0xbe4   :  { %v1506_v56 = vpop.f32.mrb[18].mxu0 }
 0xbe5   :  { %v1507_v57 = vadd.f32 %v3783_v25, %v1506_v56  ;;  %v3206_v58 = vpop.f32.mrb[19].mxu0 }
 0xbe7   :  { %1518 = vrot.lane.b32.xlu0 %v1507_v57, %s3635_s2  ;;  %v1510_v62 = vadd.f32 %v1507_v57, %v3809_v43 }
 0xbe9   :  { %v2883_v40 = vmul.f32 -1.442695, %v1510_v62 }
 0xbeb   :  { %3573 = vpow2.f32 %v2883_v40 }
 0xbed   :  { %v3572_v38 = vpop.eup %3571 }
 0xbee   :  { %v1400_v44 = vadd.f32 1.0, %v3572_v38 }
 0xbf0   :  { %3575 = vrcp.f32 %v1400_v44 }
 0xbf5   :  { %v3574_v47 = vpop.eup %3573 }
 0xbf6   :  { %v1514_v39 = vadd.f32 1.0, %v3574_v47 }
 0xbf8   :  { %3577 = vrcp.f32 %v1514_v39 }
 0xbfa   :  { %v3576_v0 = vpop.eup %3575 }
 0xbfb   :  { %v1414_v20 = vsub.f32 1.0, %v3576_v0 }
 0xc02   :  { %v3578_v41 = vpop.eup %3577 }
 0xc03   :  { %v1528_v30 = vsub.f32 1.0, %v3578_v41 }
 0xc49   :  { %v1405_v1 = vpop.permute.xlu1 %1404 }
 0xc4a   :  { %v1407_v3 = vmul.f32 %v3576_v0, %v1405_v1 }
 0xc4c   :  { %1409 = vrot.lane.b32.xlu1 %v1407_v3, %s3636_s17 }
 0xc59   :  { %v1519_v6 = vpop.permute.xlu0 %1518 }
 0xc5a   :  { %v1521_v7 = vmul.f32 %v3578_v41, %v1519_v6 }
 0xc5c   :  { %1523 = vrot.lane.b32.xlu0 %v1521_v7, %s3636_s17 }
 0xc60   :  { %1420 = vrot.lane.b32.xlu0 %v1133_v37, %s3639_s19 }
 0xcbe   :  { %v1410_v11 = vpop.permute.xlu1 %1409 }
 0xcbf   :  { %v1412_v13 = vadd.f32 %v1410_v11, %v1320_v59 }
 0xcc1   :  { %3579 = vtanh.f32 %v1412_v13 }
 0xccb   :  { %v3580_v14 = vpop.eup %3579 }
 0xccc   :  { %1416 = vrot.lane.b32.xlu1 %v3580_v14, %s3637_s7 }
 0xcce   :  { %v1524_v15 = vpop.permute.xlu0 %1523 }
 0xccf   :  { %v1526_v16 = vadd.f32 %v1524_v15, %v3809_v43 }
 0xcd0   :  { %1425 = vrot.lane.b32.xlu1 %v1133_v37, %s3640_s20 }
 0xcd1   :  { %3581 = vtanh.f32 %v1526_v16 }
 0xcd2   :  { %v1421_v19 = vpop.permute.xlu0 %1420 }
 0xcd3   :  { %v1423_v22 = vmul.f32 %v3576_v0, %v1421_v19 }
 0xcd4   :  { %1534 = vrot.lane.b32.xlu1 %v1249_v50, %s3639_s19 }
 0xcdb   :  { %v3582_v17 = vpop.eup %3581 }
 0xcdc   :  { %1530 = vrot.lane.b32.xlu0 %v3582_v17, %s3637_s7 }
 0xce0   :  { %1539 = vrot.lane.b32.xlu0 %v1249_v50, %s3640_s20 }
 0xd3e   :  { %v1417_v21 = vpop.permute.xlu1 %1416 }
 0xd3f   :  { %v1419_v24 = vmul.f32 %v1417_v21, %v1414_v20 }
 0xd41   :  { %v1424_v27 = vadd.f32 %v1423_v22, %v1419_v24 }
 0xd42   :  { %v1426_v23 = vpop.permute.xlu1 %1425 }
 0xd43   :  { %v1428_v28 = vmul.f32 %v3576_v0, %v1426_v23  ;;  %1431 = vrot.lane.b32.xlu1 %v1424_v27, %s3637_s7 }
 0xd45   :  { %v1429_v43 = vadd.f32 %v1428_v28, %v1419_v24 }
 0xd46   :  { %v1535_v29 = vpop.permute.xlu1 %1534 }
 0xd47   :  { %1435 = vrot.lane.b32.xlu0 %v1429_v43, %s3638_s5  ;;  %v1537_v32 = vmul.f32 %v3578_v41, %v1535_v29 }
 0xd4e   :  { %v1531_v31 = vpop.permute.xlu0 %1530 }
 0xd4f   :  { %v1533_v33 = vmul.f32 %v1531_v31, %v1528_v30 }
 0xd51   :  { %v1538_v34 = vadd.f32 %v1537_v32, %v1533_v33 }
 0xd52   :  { %v1540_v35 = vpop.permute.xlu0 %1539 }
 0xd53   :  { %v1542_v36 = vmul.f32 %v3578_v41, %v1540_v35  ;;  %1545 = vrot.lane.b32.xlu1 %v1538_v34, %s3637_s7 }
 0xd55   :  { %v1543_v37 = vadd.f32 %v1542_v36, %v1533_v33 }
 0xd57   :  { %1549 = vrot.lane.b32.xlu0 %v1543_v37, %s3638_s5 }
 0xdb5   :  { %v1432_v45 = vpop.permute.xlu1 %1431 }
 0xdb9   :  { %v1436_v46 = vpop.permute.xlu0 %1435 }
 0xdba   :  { %v1438_v50 = vsel %vm333_vm4, %v1432_v45, %v1436_v46 }
 0xdbb   :  { %3227 = vmatmul.mubr.msk.f32.vlgmr.msra.gmra.mrb[20].mxu0 %vm226_vm5, %v1438_v50 }
 0xdbc   :  { %3456 = vmatpush3.bf16.msra.mxu0 %v3845_v5  ;;  %3248 = vmatprep.mubr.msk.f32.mxu0 %vm3633_vm1, %v3634_v4 }
 0xdbd   :  { %3457 = vmatprep.subr.bf16.mxu0 %v3632_v2 }
 0xdc0   :  { %3459 = vmatpush3.bf16.msra.mxu0 %v3858_v10 }
 0xdc1   :  { %3466 = vmatprep.subr.bf16.mxu0 %v3632_v2 }
 0xdc5   :  { %v1546_v51 = vpop.permute.xlu1 %1545 }
 0xdc9   :  { %v1550_v52 = vpop.permute.xlu0 %1549 }
 0xdca   :  { %v1552_v53 = vsel %vm333_vm4, %v1546_v51, %v1550_v52 }
 0xdcb   :  { %3216 = vmatmul.mubr.msk.f32.vlgmr.msra.gmra.mrb[14].mxu1 %vm226_vm5, %v1552_v53 }
 0xdcc   :  { %3450 = vmatpush3.bf16.msra.mxu1 %v3733_v8  ;;  %3237 = vmatprep.mubr.msk.f32.mxu1 %vm3633_vm1, %v3634_v4 }
 0xdcd   :  { %3451 = vmatprep.subr.bf16.mxu1 %v3632_v2 }
 0xdd0   :  { %3453 = vmatpush3.bf16.msra.mxu1 %v3748_v12 }
 0xdd1   :  { %3460 = vmatprep.subr.bf16.mxu1 %v3632_v2 }
 0xdd3   :  { %3238 = vmatmul.mubr.msk.f32.vlgmr.msra.gmra.mrb[16].mxu1 %vm226_vm5, %v1552_v53 }
 0xdd4   :  { %3462 = vmatpush3.bf16.msra.mxu1 %v3834_v63  ;;  %3259 = vmatprep.mubr.msk.f32.mxu1 %vm3633_vm1, %v3634_v4 }
 0xdd5   :  { %3463 = vmatprep.subr.bf16.mxu1 %v3632_v2 }
 0xdd8   :  { %3465 = vmatpush3.bf16.msra.mxu1 %v3854_v9 }
 0xdd9   :  { %3472 = vmatprep.subr.bf16.mxu1 %v3632_v2 }
 0xe8e   :  { %v1695_v54 = vpop.f32.mrb[20].mxu0 }
 0xe8f   :  { %v1696_v55 = vadd.f32 %v3878_v18, %v1695_v54  ;;  %v3228_v56 = vpop.f32.mrb[21].mxu0 }
 0xe91   :  { %1707 = vrot.lane.b32.xlu1 %v1696_v55, %s3635_s2 }
 0xe9e   :  { %v1622_v57 = vpop.f32.mrb[14].mxu1 }
 0xe9f   :  { %v3217_v58 = vpop.f32.mrb[15].mxu1  ;;  %v1623_v62 = vadd.f32 %v3900_v26, %v1622_v57 }
 0xea1   :  { %v1699_v38 = vadd.f32 %v1696_v55, %v1623_v62 }
 0xea3   :  { %v2886_v40 = vmul.f32 -1.442695, %v1699_v38 }
 0xea5   :  { %3583 = vpow2.f32 %v2886_v40 }
 0xea6   :  { %v1809_v59 = vpop.f32.mrb[16].mxu1 }
 0xea7   :  { %v1810_v60 = vadd.f32 %v3783_v25, %v1809_v59  ;;  %v3239_v61 = vpop.f32.mrb[17].mxu1 }
 0xea8   :  { %v4128_v61 = vld [vmem:[%s4282_s4] ss:$0 sm:$0xff] }
 0xea9   :  { %1821 = vrot.lane.b32.xlu0 %v1810_v60, %s3635_s2  ;;  %v1813_v0 = vadd.f32 %v1810_v60, %v3804_v42 }
 0xeab   :  { %v2888_v1 = vmul.f32 -1.442695, %v1813_v0 }
 0xeaf   :  { %v3584_v44 = vpop.eup %3583 }
 0xeb0   :  { %v1703_v47 = vadd.f32 1.0, %v3584_v44 }
 0xeb2   :  { %3585 = vrcp.f32 %v1703_v47 }
 0xeb3   :  { %3587 = vpow2.f32 %v2888_v1 }
 0xebc   :  { %v3586_v3 = vpop.eup %3585 }
 0xebd   :  { %v3588_v25 = vpop.eup %3587  ;;  %v1717_v22 = vsub.f32 1.0, %v3586_v3 }
 0xebe   :  { %v1817_v6 = vadd.f32 1.0, %v3588_v25 }
 0xec0   :  { %3589 = vrcp.f32 %v1817_v6 }
 0xeca   :  { %v3590_v7 = vpop.eup %3589 }
 0xecb   :  { %v1831_v31 = vsub.f32 1.0, %v3590_v7 }
 0xf03   :  { %v1708_v39 = vpop.permute.xlu1 %1707 }
 0xf04   :  { %v1710_v41 = vmul.f32 %v3586_v3, %v1708_v39 }
 0xf06   :  { %1712 = vrot.lane.b32.xlu1 %v1710_v41, %s3636_s17 }
 0xf1b   :  { %v1822_v11 = vpop.permute.xlu0 %1821 }
 0xf1c   :  { %v1824_v13 = vmul.f32 %v3590_v7, %v1822_v11 }
 0xf1e   :  { %1826 = vrot.lane.b32.xlu0 %v1824_v13, %s3636_s17 }
 0xf22   :  { %1723 = vrot.lane.b32.xlu0 %v1438_v50, %s3639_s19 }
 0xf78   :  { %v1713_v14 = vpop.permute.xlu1 %1712 }
 0xf79   :  { %v1715_v15 = vadd.f32 %v1713_v14, %v1623_v62 }
 0xf7b   :  { %3591 = vtanh.f32 %v1715_v15 }
 0xf85   :  { %v3592_v16 = vpop.eup %3591 }
 0xf86   :  { %1719 = vrot.lane.b32.xlu1 %v3592_v16, %s3637_s7 }
 0xf8a   :  { %1728 = vrot.lane.b32.xlu1 %v1438_v50, %s3640_s20 }
 0xf8e   :  { %1837 = vrot.lane.b32.xlu1 %v1552_v53, %s3639_s19 }
 0xf90   :  { %v1827_v17 = vpop.permute.xlu0 %1826 }
 0xf91   :  { %v1829_v19 = vadd.f32 %v1827_v17, %v3804_v42 }
 0xf93   :  { %3593 = vtanh.f32 %v1829_v19 }
 0xf94   :  { %v1724_v21 = vpop.permute.xlu0 %1723 }
 0xf95   :  { %v1726_v27 = vmul.f32 %v3586_v3, %v1724_v21 }
 0xf9d   :  { %v3594_v20 = vpop.eup %3593 }
 0xf9e   :  { %1833 = vrot.lane.b32.xlu0 %v3594_v20, %s3637_s7 }
 0xfa2   :  { %1842 = vrot.lane.b32.xlu0 %v1552_v53, %s3640_s20 }
 0xff8   :  { %v1720_v24 = vpop.permute.xlu1 %1719 }
 0xff9   :  { %v1722_v23 = vmul.f32 %v1720_v24, %v1717_v22 }
 0xffb   :  { %v1727_v28 = vadd.f32 %v1726_v27, %v1722_v23 }
 0xffc   :  { %v1729_v43 = vpop.permute.xlu1 %1728 }
 0xffd   :  { %v1731_v29 = vmul.f32 %v3586_v3, %v1729_v43  ;;  %1734 = vrot.lane.b32.xlu1 %v1727_v28, %s3637_s7 }
 0xfff   :  { %v1732_v30 = vadd.f32 %v1731_v29, %v1722_v23 }
0x1000   :  { %v1838_v42 = vpop.permute.xlu1 %1837 }
0x1001   :  { %1738 = vrot.lane.b32.xlu0 %v1732_v30, %s3638_s5  ;;  %v1840_v33 = vmul.f32 %v3590_v7, %v1838_v42 }
0x1010   :  { %v1834_v32 = vpop.permute.xlu0 %1833 }
0x1011   :  { %v1836_v34 = vmul.f32 %v1834_v32, %v1831_v31 }
0x1013   :  { %v1841_v35 = vadd.f32 %v1840_v33, %v1836_v34 }
0x1014   :  { %v1843_v36 = vpop.permute.xlu0 %1842 }
0x1015   :  { %v1845_v37 = vmul.f32 %v3590_v7, %v1843_v36  ;;  %1848 = vrot.lane.b32.xlu1 %v1841_v35, %s3637_s7 }
0x1017   :  { %v1846_v45 = vadd.f32 %v1845_v37, %v1836_v34 }
0x1019   :  { %1852 = vrot.lane.b32.xlu0 %v1846_v45, %s3638_s5 }
0x106f   :  { %v1735_v46 = vpop.permute.xlu1 %1734 }
0x1073   :  { %v1739_v50 = vpop.permute.xlu0 %1738 }
0x1074   :  { %v1741_v51 = vsel %vm333_vm4, %v1735_v46, %v1739_v50 }
0x1075   :  { %3260 = vmatmul.mubr.msk.f32.vlgmr.msra.gmra.mrb[18].mxu1 %vm226_vm5, %v1741_v51 }
0x1076   :  { %3474 = vmatpush3.bf16.msra.mxu1 %v3845_v5  ;;  %3281 = vmatprep.mubr.msk.f32.mxu1 %vm3633_vm1, %v3634_v4 }
0x1077   :  { %3475 = vmatprep.subr.bf16.mxu1 %v3632_v2 }
0x107a   :  { %3477 = vmatpush3.bf16.msra.mxu1 %v3858_v10 }
0x107b   :  { %3484 = vmatprep.subr.bf16.mxu1 %v3632_v2 }
0x1087   :  { %v1849_v52 = vpop.permute.xlu1 %1848 }
0x108b   :  { %v1853_v53 = vpop.permute.xlu0 %1852 }
0x108c   :  { %v1855_v54 = vsel %vm333_vm4, %v1849_v52, %v1853_v53 }
0x108d   :  { %3249 = vmatmul.mubr.msk.f32.vlgmr.msra.gmra.mrb[22].mxu0 %vm226_vm5, %v1855_v54 }
0x108e   :  { %3468 = vmatpush3.bf16.msra.mxu0 %v3733_v8  ;;  %3270 = vmatprep.mubr.msk.f32.mxu0 %vm3633_vm1, %v3634_v4 }
0x108f   :  { %3469 = vmatprep.subr.bf16.mxu0 %v3632_v2 }
0x1092   :  { %3471 = vmatpush3.bf16.msra.mxu0 %v3748_v12 }
0x1093   :  { %3478 = vmatprep.subr.bf16.mxu0 %v3632_v2 }
0x1095   :  { %3271 = vmatmul.mubr.msk.f32.vlgmr.msra.gmra.mrb[24].mxu0 %vm226_vm5, %v1855_v54 }
0x1096   :  { %3480 = vmatpush3.bf16.msra.mxu0 %v3834_v63  ;;  %3292 = vmatprep.mubr.msk.f32.mxu0 %vm3633_vm1, %v3634_v4 }
0x1097   :  { %3481 = vmatprep.subr.bf16.mxu0 %v3632_v2 }
0x109a   :  { %3483 = vmatpush3.bf16.msra.mxu0 %v3854_v9 }
0x109b   :  { %3490 = vmatprep.subr.bf16.mxu0 %v3632_v2 }
0x1148   :  { %v1998_v55 = vpop.f32.mrb[18].mxu1 }
0x1149   :  { %v1999_v56 = vadd.f32 %v3878_v18, %v1998_v55  ;;  %v3261_v57 = vpop.f32.mrb[19].mxu1 }
0x114b   :  { %2010 = vrot.lane.b32.xlu1 %v1999_v56, %s3635_s2 }
0x1160   :  { %v1925_v58 = vpop.f32.mrb[22].mxu0 }
0x1161   :  { %v3250_v59 = vpop.f32.mrb[23].mxu0  ;;  %v1926_v40 = vadd.f32 %v3900_v26, %v1925_v58 }
0x1163   :  { %v2002_v44 = vadd.f32 %v1999_v56, %v1926_v40 }
0x1165   :  { %v2891_v18 = vmul.f32 -1.442695, %v2002_v44 }
0x1167   :  { %3595 = vpow2.f32 %v2891_v18 }
0x1168   :  { %v2112_v60 = vpop.f32.mrb[24].mxu0 }
0x1169   :  { %v2113_v62 = vadd.f32 %v4128_v61, %v2112_v60  ;;  %v3272_v38 = vpop.f32.mrb[25].mxu0 }
0x116b   :  { %2124 = vrot.lane.b32.xlu0 %v2113_v62, %s3635_s2  ;;  %v2116_v1 = vadd.f32 %v2113_v62, %v3821_v49 }
0x116d   :  { %v2893_v41 = vmul.f32 -1.442695, %v2116_v1 }
0x1171   :  { %v3596_v47 = vpop.eup %3595 }
0x1172   :  { %v2006_v0 = vadd.f32 1.0, %v3596_v47 }
0x1174   :  { %3597 = vrcp.f32 %v2006_v0 }
0x1175   :  { %3599 = vpow2.f32 %v2893_v41 }
0x117e   :  { %v3598_v3 = vpop.eup %3597 }
0x117f   :  { %v3600_v6 = vpop.eup %3599  ;;  %v2020_v22 = vsub.f32 1.0, %v3598_v3 }
0x1180   :  { %v2120_v7 = vadd.f32 1.0, %v3600_v6 }
0x1182   :  { %3601 = vrcp.f32 %v2120_v7 }
0x118c   :  { %v3602_v11 = vpop.eup %3601 }
0x118d   :  { %v2134_v42 = vsub.f32 1.0, %v3602_v11 }
0x11bd   :  { %v2011_v39 = vpop.permute.xlu1 %2010 }
0x11be   :  { %v2013_v25 = vmul.f32 %v3598_v3, %v2011_v39 }
0x11c0   :  { %2015 = vrot.lane.b32.xlu1 %v2013_v25, %s3636_s17 }
0x11dd   :  { %v2125_v26 = vpop.permute.xlu0 %2124 }
0x11de   :  { %v2127_v13 = vmul.f32 %v3602_v11, %v2125_v26 }
0x11e0   :  { %2129 = vrot.lane.b32.xlu0 %v2127_v13, %s3636_s17 }
0x11e4   :  { %2026 = vrot.lane.b32.xlu0 %v1741_v51, %s3639_s19 }
0x1232   :  { %v2016_v14 = vpop.permute.xlu1 %2015 }
0x1233   :  { %v2018_v15 = vadd.f32 %v2016_v14, %v1926_v40 }
0x1235   :  { %3603 = vtanh.f32 %v2018_v15 }
0x123f   :  { %v3604_v16 = vpop.eup %3603 }
0x1240   :  { %2022 = vrot.lane.b32.xlu1 %v3604_v16, %s3637_s7 }
0x1244   :  { %2031 = vrot.lane.b32.xlu1 %v1741_v51, %s3640_s20 }
0x1248   :  { %2140 = vrot.lane.b32.xlu1 %v1855_v54, %s3639_s19 }
0x1252   :  { %v2130_v17 = vpop.permute.xlu0 %2129 }
0x1253   :  { %v2132_v19 = vadd.f32 %v2130_v17, %v3821_v49 }
0x1255   :  { %3605 = vtanh.f32 %v2132_v19 }
0x1256   :  { %v2027_v21 = vpop.permute.xlu0 %2026 }
0x1257   :  { %v2029_v27 = vmul.f32 %v3598_v3, %v2027_v21 }
0x125f   :  { %v3606_v20 = vpop.eup %3605 }
0x1260   :  { %2136 = vrot.lane.b32.xlu0 %v3606_v20, %s3637_s7 }
0x1264   :  { %2145 = vrot.lane.b32.xlu0 %v1855_v54, %s3640_s20 }
0x12b2   :  { %v2023_v24 = vpop.permute.xlu1 %2022 }
0x12b3   :  { %v2025_v23 = vmul.f32 %v2023_v24, %v2020_v22 }
0x12b5   :  { %v2030_v28 = vadd.f32 %v2029_v27, %v2025_v23 }
0x12b6   :  { %v2032_v43 = vpop.permute.xlu1 %2031 }
0x12b7   :  { %v2034_v29 = vmul.f32 %v3598_v3, %v2032_v43  ;;  %2037 = vrot.lane.b32.xlu1 %v2030_v28, %s3637_s7 }
0x12b9   :  { %v2035_v30 = vadd.f32 %v2034_v29, %v2025_v23 }
0x12ba   :  { %v2141_v49 = vpop.permute.xlu1 %2140 }
0x12bb   :  { %2041 = vrot.lane.b32.xlu0 %v2035_v30, %s3638_s5  ;;  %v2143_v32 = vmul.f32 %v3602_v11, %v2141_v49 }
0x12d2   :  { %v2137_v31 = vpop.permute.xlu0 %2136 }
0x12d3   :  { %v2139_v33 = vmul.f32 %v2137_v31, %v2134_v42 }
0x12d5   :  { %v2144_v34 = vadd.f32 %v2143_v32, %v2139_v33 }
0x12d6   :  { %v2146_v35 = vpop.permute.xlu0 %2145 }
0x12d7   :  { %v2148_v36 = vmul.f32 %v3602_v11, %v2146_v35  ;;  %2151 = vrot.lane.b32.xlu1 %v2144_v34, %s3637_s7 }
0x12d9   :  { %v2149_v37 = vadd.f32 %v2148_v36, %v2139_v33 }
0x12db   :  { %2155 = vrot.lane.b32.xlu0 %v2149_v37, %s3638_s5 }
0x1329   :  { %v2038_v45 = vpop.permute.xlu1 %2037 }
0x132d   :  { %v2042_v46 = vpop.permute.xlu0 %2041 }
0x132e   :  { %v2044_v50 = vsel %vm333_vm4, %v2038_v45, %v2042_v46 }
0x132f   :  { %3293 = vmatmul.mubr.msk.f32.vlgmr.msra.gmra.mrb[26].mxu0 %vm226_vm5, %v2044_v50 }
0x1330   :  { %3492 = vmatpush3.bf16.msra.mxu0 %v3845_v5  ;;  %3314 = vmatprep.mubr.msk.f32.mxu0 %vm3633_vm1, %v3634_v4 }
0x1331   :  { %3493 = vmatprep.subr.bf16.mxu0 %v3632_v2 }
0x1334   :  { %3495 = vmatpush3.bf16.msra.mxu0 %v3858_v10 }
0x1335   :  { %3502 = vmatprep.subr.bf16.mxu0 %v3632_v2 }
0x1349   :  { %v2152_v51 = vpop.permute.xlu1 %2151 }
0x134d   :  { %v2156_v52 = vpop.permute.xlu0 %2155 }
0x134e   :  { %v2158_v53 = vsel %vm333_vm4, %v2152_v51, %v2156_v52 }
0x134f   :  { %3282 = vmatmul.mubr.msk.f32.vlgmr.msra.gmra.mrb[20].mxu1 %vm226_vm5, %v2158_v53 }
0x1350   :  { %3486 = vmatpush3.bf16.msra.mxu1 %v3733_v8  ;;  %3303 = vmatprep.mubr.msk.f32.mxu1 %vm3633_vm1, %v3634_v4 }
0x1351   :  { %3487 = vmatprep.subr.bf16.mxu1 %v3632_v2 }
0x1354   :  { %3489 = vmatpush3.bf16.msra.mxu1 %v3748_v12  ;;  %v4173_v12 = vld [vmem:[%s4285_s8] ss:$0 sm:$0xff] }
0x1355   :  { %3496 = vmatprep.subr.bf16.mxu1 %v3632_v2 }
0x1357   :  { %3304 = vmatmul.mubr.msk.f32.vlgmr.msra.gmra.mrb[22].mxu1 %vm226_vm5, %v2158_v53 }
0x1358   :  { %3498 = vmatpush3.bf16.msra.mxu1 %v3834_v63  ;;  %3325 = vmatprep.mubr.msk.f32.mxu1 %vm3633_vm1, %v3634_v4 }
0x1359   :  { %3499 = vmatprep.subr.bf16.mxu1 %v3632_v2 }
0x135c   :  { %3501 = vmatpush3.bf16.msra.mxu1 %v3854_v9  ;;  %v4182_v9 = vld [vmem:[%s4286_s6] ss:$0 sm:$0xff] }
0x135d   :  { %3514 = vmatprep.subr.bf16.mxu1 %v3632_v2 }
0x1402   :  { %v2301_v8 = vpop.f32.mrb[26].mxu0 }
0x1403   :  { %v2302_v5 = vadd.f32 %v4173_v12, %v2301_v8  ;;  %v3294_v10 = vpop.f32.mrb[27].mxu0 }
0x1405   :  { %2313 = vrot.lane.b32.xlu1 %v2302_v5, %s3635_s2 }
0x1422   :  { %v2228_v63 = vpop.f32.mrb[20].mxu1 }
0x1423   :  { %v3283_v54 = vpop.f32.mrb[21].mxu1  ;;  %v2229_v58 = vadd.f32 %v4182_v9, %v2228_v63 }
0x1425   :  { %v2305_v59 = vadd.f32 %v2302_v5, %v2229_v58 }
0x1427   :  { %v2896_v60 = vmul.f32 -1.442695, %v2305_v59 }
0x1429   :  { %3607 = vpow2.f32 %v2896_v60 }
0x142a   :  { %v2415_v55 = vpop.f32.mrb[22].mxu1 }
0x142b   :  { %v2416_v56 = vadd.f32 %v4128_v61, %v2415_v55  ;;  %v3305_v57 = vpop.f32.mrb[23].mxu1 }
0x142d   :  { %2427 = vrot.lane.b32.xlu0 %v2416_v56, %s3635_s2  ;;  %v2419_v61 = vadd.f32 %v2416_v56, %v3816_v48 }
0x142f   :  { %v2898_v47 = vmul.f32 -1.442695, %v2419_v61  ;;  %v2667_v61 = vld [vmem:[%s4287_s9 + $0x18] sm:$0xff] }
0x1433   :  { %v3608_v62 = vpop.eup %3607 }
0x1434   :  { %v2309_v38 = vadd.f32 1.0, %v3608_v62  ;;  %v2664_v62 = vld [vmem:[%s4287_s9] sm:$0xff] }
0x1436   :  { %3609 = vrcp.f32 %v2309_v38  ;;  %v2665_v38 = vld [vmem:[%s4287_s9 + $0x8] sm:$0xff] }
0x1437   :  { %3611 = vpow2.f32 %v2898_v47 }
0x1440   :  { %v3610_v40 = vpop.eup %3609 }
0x1441   :  { %v3612_v0 = vpop.eup %3611  ;;  %v2323_v15 = vsub.f32 1.0, %v3610_v40 }
0x1442   :  { %v2423_v1 = vadd.f32 1.0, %v3612_v0 }
0x1444   :  { %3613 = vrcp.f32 %v2423_v1 }
0x144e   :  { %v3614_v3 = vpop.eup %3613 }
0x144f   :  { %v2437_v27 = vsub.f32 1.0, %v3614_v3 }
0x1477   :  { %v2314_v44 = vpop.permute.xlu1 %2313 }
0x1478   :  { %v2316_v18 = vmul.f32 %v3610_v40, %v2314_v44 }
0x147a   :  { %2318 = vrot.lane.b32.xlu1 %v2316_v18, %s3636_s17  ;;  %v3503_v18 = vpack.c.bf16 %v2665_v38, %v2664_v62 }
0x149f   :  { %v2428_v39 = vpop.permute.xlu0 %2427 }
0x14a0   :  { %v2430_v41 = vmul.f32 %v3614_v3, %v2428_v39  ;;  %v2669_v39 = vld [vmem:[%s4287_s9 + $0x28] sm:$0xff] }
0x14a2   :  { %2432 = vrot.lane.b32.xlu0 %v2430_v41, %s3636_s17 }
0x14a6   :  { %2329 = vrot.lane.b32.xlu0 %v2044_v50, %s3639_s19 }
0x14ec   :  { %v2319_v25 = vpop.permute.xlu1 %2318 }
0x14ed   :  { %v2321_v6 = vadd.f32 %v2319_v25, %v2229_v58 }
0x14ef   :  { %3615 = vtanh.f32 %v2321_v6  ;;  %v2670_v6 = vld [vmem:[%s4287_s9 + $0x30] sm:$0xff] }
0x14f9   :  { %v3616_v7 = vpop.eup %3615 }
0x14fa   :  { %2325 = vrot.lane.b32.xlu1 %v3616_v7, %s3637_s7  ;;  %v2671_v7 = vld [vmem:[%s4287_s9 + $0x38] sm:$0xff] }
0x14fe   :  { %2334 = vrot.lane.b32.xlu1 %v2044_v50, %s3640_s20 }
0x1502   :  { %2443 = vrot.lane.b32.xlu1 %v2158_v53, %s3639_s19 }
0x1514   :  { %v2433_v11 = vpop.permute.xlu0 %2432 }
0x1515   :  { %v2435_v26 = vadd.f32 %v2433_v11, %v3816_v48  ;;  %v3512_v11 = vpack.c.bf16 %v2671_v7, %v2670_v6 }
0x1517   :  { %3617 = vtanh.f32 %v2435_v26  ;;  %v2756_v26 = vld [vmem:[%s4288_s11] sm:$0xff] }
0x1518   :  { %v2330_v14 = vpop.permute.xlu0 %2329 }
0x1519   :  { %v2332_v17 = vmul.f32 %v3610_v40, %v2330_v14 }
0x1521   :  { %v3618_v13 = vpop.eup %3617 }
0x1522   :  { %2439 = vrot.lane.b32.xlu0 %v3618_v13, %s3637_s7  ;;  %v2757_v13 = vld [vmem:[%s4288_s11 + $0x8] sm:$0xff] }
0x1523   :  { %v3515_v14 = vpack.c.bf16 %v2757_v13, %v2756_v26 }
0x1526   :  { %2448 = vrot.lane.b32.xlu0 %v2158_v53, %s3640_s20 }
0x156c   :  { %v2326_v16 = vpop.permute.xlu1 %2325 }
0x156d   :  { %v2328_v19 = vmul.f32 %v2326_v16, %v2323_v15 }
0x156f   :  { %v2333_v20 = vadd.f32 %v2332_v17, %v2328_v19 }
0x1570   :  { %v2335_v21 = vpop.permute.xlu1 %2334 }
0x1571   :  { %v2337_v22 = vmul.f32 %v3610_v40, %v2335_v21  ;;  %2340 = vrot.lane.b32.xlu1 %v2333_v20, %s3637_s7  ;;  %v2666_v40 = vld [vmem:[%s4287_s9 + $0x10] sm:$0xff] }
0x1572   :  { %v3506_v1 = vpack.c.bf16 %v2667_v61, %v2666_v40 }
0x1573   :  { %v2338_v24 = vadd.f32 %v2337_v22, %v2328_v19 }
0x1574   :  { %v2444_v48 = vpop.permute.xlu1 %2443 }
0x1575   :  { %2344 = vrot.lane.b32.xlu0 %v2338_v24, %s3638_s5  ;;  %v2446_v28 = vmul.f32 %v3614_v3, %v2444_v48 }
0x1594   :  { %v2440_v23 = vpop.permute.xlu0 %2439 }
0x1595   :  { %v2442_v43 = vmul.f32 %v2440_v23, %v2437_v27  ;;  %v2759_v27 = vld [vmem:[%s4288_s11 + $0x18] sm:$0xff] }
0x1597   :  { %v2447_v29 = vadd.f32 %v2446_v28, %v2442_v43  ;;  %v18_v28 = vstv %s4289_s12 }
0x1598   :  { %v2449_v30 = vpop.permute.xlu0 %2448  ;;  %19 = vst [vmem:[#allocation3] sm:$0x1] %v18_v28 }
0x1599   :  { %v2451_v49 = vmul.f32 %v3614_v3, %v2449_v30  ;;  %2454 = vrot.lane.b32.xlu1 %v2447_v29, %s3637_s7  ;;  %v2668_v3 = vld [vmem:[%s4287_s9 + $0x20] sm:$0xff] }
0x159a   :  { %v3509_v25 = vpack.c.bf16 %v2669_v39, %v2668_v3 }
0x159b   :  { %v2452_v42 = vadd.f32 %v2451_v49, %v2442_v43  ;;  %v2902_v43 = vld [vmem:[%s4290_s10] ss:$0 sm:$0xff] }
0x159d   :  { %2458 = vrot.lane.b32.xlu0 %v2452_v42, %s3638_s5 }
0x15e3   :  { %v2341_v31 = vpop.permute.xlu1 %2340 }
0x15e7   :  { %v2345_v32 = vpop.permute.xlu0 %2344 }
0x15e8   :  { %v2347_v33 = vsel %vm333_vm4, %v2341_v31, %v2345_v32  ;;  %v2904_v32 = vld [vmem:[#allocation3] ss:$0 sm:$0xff] }
0x15e9   :  { %3326 = vmatmul.mubr.msk.f32.vlgmr.msra.gmra.mrb[24].mxu1 %vm226_vm5, %v2347_v33 }
0x15ea   :  { %3355 = vmatprep.mubr.msk.f32.mxu1 %vm3633_vm1, %v3634_v4  ;;  %3516 = vmatpush3.bf16.msra.mxu1 %v3515_v14 }
0x15eb   :  { %3517 = vmatprep.subr.bf16.mxu1 %v3632_v2 }
0x160b   :  { %v2455_v34 = vpop.permute.xlu1 %2454 }
0x160f   :  { %v2459_v35 = vpop.permute.xlu0 %2458 }
0x1610   :  { %v4204_v36 = vsel %vm333_vm4, %v2455_v34, %v2459_v35 }
0x1611   :  { %3315 = vmatmul.mubr.msk.f32.vlgmr.msra.gmra.mrb[28].mxu0 %vm226_vm5, %v4204_v36 }
0x1612   :  { %3344 = vmatprep.mubr.msk.f32.mxu0 %vm3633_vm1, %v3634_v4  ;;  %3504 = vmatpush3.bf16.msra.mxu0 %v3503_v18 }
0x1613   :  { %3505 = vmatprep.subr.bf16.mxu0 %v3632_v2 }
0x1616   :  { %3507 = vmatpush3.bf16.msra.mxu0 %v3506_v1 }
0x1617   :  { %3508 = vmatprep.subr.bf16.mxu0 %v3632_v2 }
0x161a   :  { %3510 = vmatpush3.bf16.msra.mxu0 %v3509_v25 }
0x161b   :  { %3511 = vmatprep.subr.bf16.mxu0 %v3632_v2  ;;  %v2758_v2 = vld [vmem:[%s4288_s11 + $0x10] sm:$0xff] }
0x161c   :  { %v3518_v23 = vpack.c.bf16 %v2759_v27, %v2758_v2 }
0x161e   :  { %3513 = vmatpush3.bf16.msra.mxu0 %v3512_v11  ;;  %3519 = vmatpush3.bf16.msra.mxu1 %v3518_v23 }
0x16bc   :  { %v2604_v37 = vpop.f32.mrb[24].mxu1 }
0x16bd   :  { %v2605_v45 = vadd.f32 %v4173_v12, %v2604_v37  ;;  %v3327_v46 = vpop.f32.mrb[25].mxu1 }
0x16bf   :  { %2616 = vrot.lane.b32.xlu1 %v2605_v45, %s3635_s2 }
0x16e4   :  { %v2531_v50 = vpop.f32.mrb[28].mxu0 }
0x16e5   :  { %v3316_v51 = vpop.f32.mrb[29].mxu0  ;;  %v2532_v52 = vadd.f32 %v4182_v9, %v2531_v50 }
0x16e7   :  { %v2608_v53 = vadd.f32 %v2605_v45, %v2532_v52 }
0x16e9   :  { %v2901_v8 = vmul.f32 -1.442695, %v2608_v53 }
0x16eb   :  { %3619 = vpow2.f32 %v2901_v8 }
0x16f5   :  { %v3620_v5 = vpop.eup %3619 }
0x16f6   :  { %v2612_v10 = vadd.f32 1.0, %v3620_v5 }
0x16f8   :  { %3621 = vrcp.f32 %v2612_v10 }
0x1702   :  { %v3622_v63 = vpop.eup %3621 }
0x1703   :  { %v2626_v9 = vsub.f32 1.0, %v3622_v63 }
0x1731   :  { %v2617_v54 = vpop.permute.xlu1 %2616 }
0x1732   :  { %v2619_v55 = vmul.f32 %v3622_v63, %v2617_v54 }
0x1734   :  { %2621 = vrot.lane.b32.xlu0 %v2619_v55, %s3636_s17 }
0x1738   :  { %2632 = vrot.lane.b32.xlu0 %v2347_v33, %s3639_s19 }
0x17a6   :  { %v2622_v4 = vpop.permute.xlu0 %2621 }
0x17a7   :  { %v2624_v12 = vadd.f32 %v2622_v4, %v2532_v52 }
0x17a9   :  { %3623 = vtanh.f32 %v2624_v12 }
0x17aa   :  { %v2633_v57 = vpop.permute.xlu0 %2632 }
0x17ab   :  { %v2635_v59 = vmul.f32 %v3622_v63, %v2633_v57 }
0x17b3   :  { %v3624_v56 = vpop.eup %3623 }
0x17b4   :  { %2628 = vrot.lane.b32.xlu1 %v3624_v56, %s3637_s7 }
0x17b8   :  { %2637 = vrot.lane.b32.xlu1 %v2347_v33, %s3640_s20 }
0x1826   :  { %v2629_v58 = vpop.permute.xlu1 %2628 }
0x1827   :  { %v2631_v60 = vmul.f32 %v2629_v58, %v2626_v9 }
0x1829   :  { %v2636_v44 = vadd.f32 %v2635_v59, %v2631_v60 }
0x182a   :  { %v2638_v47 = vpop.permute.xlu1 %2637 }
0x182b   :  { %v2640_v0 = vmul.f32 %v3622_v63, %v2638_v47  ;;  %2643 = vrot.lane.b32.xlu0 %v2636_v44, %s3637_s7 }
0x182d   :  { %v2641_v41 = vadd.f32 %v2640_v0, %v2631_v60 }
0x182f   :  { %2647 = vrot.lane.b32.xlu1 %v2641_v41, %s3638_s5 }
0x1833   :  { %2655 = vrot.lane.b32.xlu1 %v4204_v36, %s3639_s19 }
0x189d   :  { %v2644_v15 = vpop.permute.xlu0 %2643 }
0x18a1   :  { %v2648_v16 = vpop.permute.xlu1 %2647 }
0x18a2   :  { %v2650_v17 = vsel %vm333_vm4, %v2644_v15, %v2648_v16 }
0x18a3   :  { %2652 = vrot.lane.b32.xlu0 %v2650_v17, %s3639_s19 }
0x18a5   :  { %v2656_v21 = vpop.permute.xlu1 %2655 }
0x18a7   :  { %2658 = vrot.lane.b32.xlu0 %v2650_v17, %s3636_s17 }
0x1915   :  { %v2653_v19 = vpop.permute.xlu0 %2652 }
0x1916   :  { %v2661_v20 = vsel %vm333_vm4, %v4204_v36, %v2653_v19 }
0x1917   :  { %v2662_v22 = vsel %vm226_vm5, %v2661_v20, %v2656_v21 }
0x1919   :  { %v2659_v24 = vpop.permute.xlu0 %2658 }
0x191a   :  { %v2663_v48 = vsel %vm218_vm3, %v2662_v22, %v2659_v24 }
0x191b   :  { %3345 = vmatmul.mubr.msk.f32.vlgmr.msra.gmra.mrb[30].mxu0 %vm2679_vm6, %v2663_v48 }
0x19ee   :  { %v2749_v29 = vpop.f32.mrb[30].mxu0 }
0x19ef   :  { %v2750_v30 = vadd.f32 %v2902_v43, %v2749_v29  ;;  %v3346_v49 = vpop.f32.mrb[31].mxu0 }
0x19f1   :  { %vm2753_vm7 = vcmp.ge.f32.partialorder %v2750_v30, 0.0  ;;  %v2754_v42 = vmul.f32 0.01, %v2750_v30 }
0x19f3   :  { %v2755_v31 = vsel %vm2753_vm7, %v2750_v30, %v2754_v42 }
0x19f4   :  { %3356 = vmatmul.mubr.msk.f32.vlgmr.msra.gmra.mrb[26].mxu1 %vm226_vm5, %v2755_v31 }
0x1ac7   :  { %v2836_v33 = vpop.f32.mrb[26].mxu1 }
0x1ac8   :  { %v2837_v34 = vadd.f32 %v2904_v32, %v2836_v33  ;;  %v3357_v35 = vpop.f32.mrb[27].mxu1 }
0x1aca   :  { %v2906_v36 = vmul.f32 -1.442695, %v2837_v34 }
0x1acc   :  { %3625 = vpow2.f32 %v2906_v36 }
0x1ad6   :  { %v3626_v37 = vpop.eup %3625 }
0x1ad7   :  { %v2843_v45 = vadd.f32 1.0, %v3626_v37 }
0x1ad9   :  { %3627 = vrcp.f32 %v2843_v45 }
0x1ae3   :  { %v3628_v46 = vpop.eup %3627 }
0x1ae4   :  { %2847 = vst.msk [vmem:[%s4291_s13] sm:$0xff] %vm2846_vm8, %v3628_v46 }

</bundles_post_ra>
